<compile_context>
chip_gen: v6e
topology: v6e:2x2x1
jax: 0.10.0
libtpu: 0.0.40
codegen_flags: <defaults>
</compile_context>

<pallas_src>
import functools

import jax
import jax.numpy as jnp
from jax.experimental import pallas as pl
from jax.experimental.pallas import tpu as pltpu


# --------------------------------------------------------------------------------------
# Pallas kernels
# --------------------------------------------------------------------------------------
def _matmul_act_kernel(x_ref, w_ref, o_ref, *, apply_act):
    """o = leaky_relu(x @ w) (or plain x @ w). bf16 operands, f32 MXU accumulate."""
    y = jnp.dot(x_ref[...], w_ref[...], preferred_element_type=jnp.float32)
    if apply_act:
        y = jnp.where(y > 0, y, 0.2 * y)                  # LeakyReLU(0.2)
    o_ref[...] = y.astype(o_ref.dtype)


def _conv_bn_act_kernel(x_ref, w_ref, g_ref, b_ref, o_ref, *, m_valid):
    """Fused conv-matmul + BatchNorm (batch stats) + LeakyReLU, single pass.

    The full (M, tn) conv tile stays resident in VMEM/vregs: mean is computed first,
    then variance from centered values (numerically safer than E[x^2]-E[x]^2),
    then the affine + activation is applied and stored as bf16.
    """
    y = jnp.dot(x_ref[...], w_ref[...], preferred_element_type=jnp.float32)  # (Mp, tn) f32
    mp = y.shape[0]
    if mp != m_valid:
        # Mask padded rows out of the statistics (padded patch rows are zero anyway,
        # but centered squares would not be).
        mask = (jax.lax.broadcasted_iota(jnp.int32, (mp, 1), 0) < m_valid).astype(jnp.float32)
        mean = jnp.sum(y * mask, axis=0, keepdims=True) / m_valid
        d = (y - mean) * mask
    else:
        mean = jnp.sum(y, axis=0, keepdims=True) / m_valid
        d = y - mean
    var = jnp.sum(d * d, axis=0, keepdims=True) / m_valid          # biased var (PyTorch BN)
    scale = g_ref[...] * jax.lax.rsqrt(var + 1e-5)                  # EUP rsqrt
    shift = b_ref[...] - mean * scale
    z = y * scale + shift
    o_ref[...] = jnp.where(z > 0, z, 0.2 * z).astype(o_ref.dtype)   # LeakyReLU(0.2)


# --------------------------------------------------------------------------------------
# Tiling / padding helpers
# --------------------------------------------------------------------------------------
def _round_up(n, m):
    return ((n + m - 1) // m) * m


def _pad_to(a, shape):
    pads = [(0, t - s) for s, t in zip(a.shape, shape)]
    if all(p == (0, 0) for p in pads):
        return a
    return jnp.pad(a, pads)


def _tiles(Mp, Np):
    """Full-height MXU tiles: never shrink M below 256 rows just to create blocks.
    Large layers naturally yield >=2 M blocks (v7x megacore); tiny layers run as a
    single block (grid-step overhead dominates there anyway). N tiles are lane-dense."""
    tm = Mp
    for cand in (1024, 512, 256):
        if Mp > cand and Mp % cand == 0:
            tm = cand
            break
    tn = 256 if Np % 256 == 0 else 128
    return tm, tn


_MM_COMPILER_PARAMS = pltpu.CompilerParams(
    dimension_semantics=("parallel", "parallel"),
    vmem_limit_bytes=32 * 1024 * 1024,
)


# --------------------------------------------------------------------------------------
# pallas_call wrappers (x (Mp,K) bf16 — M padded to 16 if needed, K never padded;
# w (K,Np) bf16 pre-padded along N at init)
# --------------------------------------------------------------------------------------
def pallas_matmul_act(xp, wp, apply_act):
    Mp, K = xp.shape
    _, Np = wp.shape
    tm, tn = _tiles(Mp, Np)
    return pl.pallas_call(
        functools.partial(_matmul_act_kernel, apply_act=apply_act),
        out_shape=jax.ShapeDtypeStruct((Mp, Np), jnp.bfloat16),
        grid_spec=pltpu.PrefetchScalarGridSpec(
            num_scalar_prefetch=0,
            grid=(Mp // tm, Np // tn),
            in_specs=[
                pl.BlockSpec((tm, K), lambda i, j: (i, 0)),   # full-K, single pass
                pl.BlockSpec((K, tn), lambda i, j: (0, j)),
            ],
            out_specs=pl.BlockSpec((tm, tn), lambda i, j: (i, j)),
        ),
        compiler_params=_MM_COMPILER_PARAMS,
    )(xp, wp)


def pallas_conv_bn_act(xp, wp, gamma_p, beta_p, m_valid):
    """Single fused pallas_call per BN layer: grid over N only, full M resident."""
    Mp, K = xp.shape
    _, Np = wp.shape
    tn = 128   # N-split gives >=2 blocks on the 256-channel layer (megacore on v7x)
    return pl.pallas_call(
        functools.partial(_conv_bn_act_kernel, m_valid=m_valid),
        out_shape=jax.ShapeDtypeStruct((Mp, Np), jnp.bfloat16),
        grid_spec=pltpu.PrefetchScalarGridSpec(
            num_scalar_prefetch=0,
            grid=(Np // tn,),
            in_specs=[
                pl.BlockSpec((Mp, K), lambda j: (0, 0)),      # whole patch matrix
                pl.BlockSpec((K, tn), lambda j: (0, j)),
                pl.BlockSpec((1, tn), lambda j: (0, j)),      # gamma
                pl.BlockSpec((1, tn), lambda j: (0, j)),      # beta
            ],
            out_specs=pl.BlockSpec((Mp, tn), lambda j: (0, j)),
        ),
        compiler_params=pltpu.CompilerParams(
            dimension_semantics=("parallel",),
            vmem_limit_bytes=32 * 1024 * 1024,
        ),
    )(xp, wp, gamma_p, beta_p)


# --------------------------------------------------------------------------------------
# Discriminator model
# --------------------------------------------------------------------------------------
def _layer_specs(channels):
    # (cin, cout, k, stride, pad, bn, leaky_relu)  -- all convs bias=False (matches ref)
    return (
        (channels, 32, 4, 2, 1, False, True),
        (32, 64, 4, 2, 1, False, True),
        (64, 128, 4, 2, 1, True, True),
        (128, 256, 4, 2, 1, True, True),
        (256, 1, 4, 1, 0, False, False),
    )


def init_discriminator_params(key, channels=3):
    """Weight prep (transpose to im2col layout, N padding, bf16 cast) hoisted here."""
    specs = _layer_specs(channels)
    params = []
    for li, (cin, cout, k, s, p, bn, act) in enumerate(specs):
        key, sub = jax.random.split(key)
        w = 0.02 * jax.random.normal(sub, (cout, cin, k, k), dtype=jnp.float32)
        K = k * k * cin
        # (Cout,Cin,kh,kw) -> (kh,kw,Cin,Cout) -> (K, Cout); matches im2col patch order
        w_mat = jnp.transpose(w, (2, 3, 1, 0)).reshape(K, cout)
        layer = {}
        if li == len(specs) - 1:
            layer["w_mat"] = w_mat                     # final conv: plain XLA dot, keep f32
        else:
            Np = _round_up(cout, 128)
            # K is left unpadded (full-K blocks are legal); only N is lane-padded.
            layer["w_mat"] = _pad_to(w_mat, (K, Np)).astype(jnp.bfloat16)
        if bn:
            layer["gamma"] = jnp.ones((cout,), jnp.float32)
            layer["beta"] = jnp.zeros((cout,), jnp.float32)
        params.append(layer)
    return params


def im2col(x_nhwc, k, stride, pad):
    N, H, W, C = x_nhwc.shape
    xp = jnp.pad(x_nhwc, ((0, 0), (pad, pad), (pad, pad), (0, 0)))
    Ho = (H + 2 * pad - k) // stride + 1
    Wo = (W + 2 * pad - k) // stride + 1
    patches = []
    for di in range(k):
        for dj in range(k):
            patches.append(xp[:, di:di + stride * Ho:stride, dj:dj + stride * Wo:stride, :])
    p = jnp.stack(patches, axis=3)                     # (N, Ho, Wo, k*k, C)
    return p.reshape(N * Ho * Wo, k * k * C), Ho, Wo
# TODO(synk): im2col is still materialized by XLA (k^2/s^2 = 4x activation duplication);
# a fully in-kernel conv (per-(kh,kw) DMA of shifted rows + VMEM accumulate) would remove
# that traffic but is not implemented here.


@jax.jit
def discriminator_forward(imgs_nchw, params):
    channels = imgs_nchw.shape[1]
    specs = _layer_specs(channels)
    n_layers = len(specs)
    # NCHW -> NHWC; bf16 activations everywhere (MXU operands are bf16; expect ~1e-2
    # relative deviation from an f32 reference).
    x = jnp.transpose(imgs_nchw, (0, 2, 3, 1)).astype(jnp.bfloat16)

    for li, ((cin, cout, k, s, p, bn, act), layer) in enumerate(zip(specs, params)):
        N = x.shape[0]
        patches, Ho, Wo = im2col(x, k, s, p)           # (M, K) bf16
        M, K = patches.shape

        if li == n_layers - 1:
            # Final 4x4 'valid' conv: M = batch, N = 1 -> MXU tiles would be >98%
            # padding, so use a plain XLA dot (removes one kernel launch).
            out = jnp.dot(patches.astype(jnp.float32), layer["w_mat"],
                          preferred_element_type=jnp.float32)
            x = out.reshape(N, Ho, Wo, cout)
            continue

        Np = _round_up(cout, 128)
        Mp = _round_up(M, 16)
        xp = _pad_to(patches, (Mp, K))                 # no-op here (M is 16-aligned)
        wp = layer["w_mat"]                            # (K, Np) bf16, pre-padded at init

        if bn:
            # One fused Pallas call: conv + batch-stats + affine + LeakyReLU -> bf16.
            gam = _pad_to(layer["gamma"].reshape(1, cout), (1, Np))
            bet = _pad_to(layer["beta"].reshape(1, cout), (1, Np))
            out_p = pallas_conv_bn_act(xp, wp, gam, bet, m_valid=M)
        else:
            out_p = pallas_matmul_act(xp, wp, apply_act=act)     # fused conv + LeakyReLU

        x = out_p[:M, :cout].reshape(N, Ho, Wo, cout)

    # final conv output is (N, 1, 1, 1); match out.view(-1, 1)
    return x.reshape(-1, 1).astype(jnp.float32)


# --------------------------------------------------------------------------------------
if __name__ == "__main__":
    key = jax.random.PRNGKey(0)
    pkey, xkey = jax.random.split(key)
    params = init_discriminator_params(pkey, channels=3)
    # Smallest spatial size consistent with the architecture
    # (four stride-2 4x4 convs followed by a 4x4 'valid' conv -> needs 64x64 input).
    imgs = jax.random.normal(xkey, (2, 3, 64, 64), dtype=jnp.float32)

    out = discriminator_forward(imgs, params)
    out = jax.block_until_ready(out)
    assert out.shape == (2, 1), out.shape
    assert bool(jnp.all(jnp.isfinite(out)))
    print("KERNEL_OK")
</pallas_src>

<mosaic_0001>
module attributes {stable_mosaic.version = 11 : i64} {
  func.func @_matmul_act_kernel(%arg0: i32, %arg1: i32, %arg2: memref<1024x48xbf16, #tpu.memory_space<vmem>>, %arg3: memref<48x128xbf16, #tpu.memory_space<vmem>>, %arg4: memref<1024x128xbf16, #tpu.memory_space<vmem>>) attributes {dimension_semantics = [#tpu.dimension_semantics<parallel>, #tpu.dimension_semantics<parallel>], iteration_bounds = array<i64: 2, 1>, scalar_prefetch = 0 : i64, scratch_operands = 0 : i64, tpu.core_type = #tpu.core_type<tc>, window_params = [{transform_indices = @transform_0, window_bounds = array<i64: 1024, 48>}, {transform_indices = @transform_1, window_bounds = array<i64: 48, 128>}, {transform_indices = @transform_2, window_bounds = array<i64: 1024, 128>}]} {
    %c0 = arith.constant 0 : index
    %c0_0 = arith.constant 0 : index
    %0 = vector.load %arg2[%c0, %c0_0] : memref<1024x48xbf16, #tpu.memory_space<vmem>>, vector<1024x48xbf16>
    %c0_1 = arith.constant 0 : index
    %c0_2 = arith.constant 0 : index
    %1 = vector.load %arg3[%c0_1, %c0_2] : memref<48x128xbf16, #tpu.memory_space<vmem>>, vector<48x128xbf16>
    %cst = arith.constant dense<0.000000e+00> : vector<1024x128xf32>
    %2 = tpu.matmul %0, %1, %cst {dimension_numbers = #tpu.dot_dimension_numbers<[1], [0], [0], [1], [0, 0, 1, 1], [], []>} : vector<1024x48xbf16>, vector<48x128xbf16>, vector<1024x128xf32> -> vector<1024x128xf32>
    %cst_3 = arith.constant 0.000000e+00 : f32
    %3 = vector.broadcast %cst_3 : f32 to vector<1024x128xf32>
    %4 = arith.cmpf ogt, %2, %3 : vector<1024x128xf32>
    %cst_4 = arith.constant 2.000000e-01 : f32
    %5 = vector.broadcast %cst_4 : f32 to vector<1024x128xf32>
    %6 = arith.mulf %5, %2 : vector<1024x128xf32>
    %7 = arith.select %4, %2, %6 : vector<1024x128xi1>, vector<1024x128xf32>
    %8 = arith.truncf %7 : vector<1024x128xf32> to vector<1024x128xbf16>
    %c0_5 = arith.constant 0 : index
    %c0_6 = arith.constant 0 : index
    %9 = vector.load %arg4[%c0_5, %c0_6] : memref<1024x128xbf16, #tpu.memory_space<vmem>>, vector<1024x128xbf16>
    tpu.vector_store %arg4[%c0_5, %c0_6], %8 {strides = array<i32>} : memref<1024x128xbf16, #tpu.memory_space<vmem>>, vector<1024x128xbf16>,
    return
  }
  func.func @transform_0(%arg0: i32, %arg1: i32) -> (i32, i32) {
    %c0_i32 = arith.constant 0 : i32
    %c0_i32_0 = arith.constant 0 : i32
    return %arg0, %c0_i32 : i32, i32
  }
  func.func @transform_1(%arg0: i32, %arg1: i32) -> (i32, i32) {
    %c0_i32 = arith.constant 0 : i32
    %c0_i32_0 = arith.constant 0 : i32
    return %c0_i32, %arg1 : i32, i32
  }
  func.func @transform_2(%arg0: i32, %arg1: i32) -> (i32, i32) {
    %c0_i32 = arith.constant 0 : i32
    return %arg0, %arg1 : i32, i32
  }
}

module attributes {stable_mosaic.version = 11 : i64} {
  func.func @_matmul_act_kernel(%arg0: i32, %arg1: i32, %arg2: memref<256x512xbf16, #tpu.memory_space<vmem>>, %arg3: memref<512x128xbf16, #tpu.memory_space<vmem>>, %arg4: memref<256x128xbf16, #tpu.memory_space<vmem>>) attributes {dimension_semantics = [#tpu.dimension_semantics<parallel>, #tpu.dimension_semantics<parallel>], iteration_bounds = array<i64: 2, 1>, scalar_prefetch = 0 : i64, scratch_operands = 0 : i64, tpu.core_type = #tpu.core_type<tc>, window_params = [{transform_indices = @transform_0, window_bounds = array<i64: 256, 512>}, {transform_indices = @transform_1, window_bounds = array<i64: 512, 128>}, {transform_indices = @transform_2, window_bounds = array<i64: 256, 128>}]} {
    %c0 = arith.constant 0 : index
    %c0_0 = arith.constant 0 : index
    %0 = vector.load %arg2[%c0, %c0_0] : memref<256x512xbf16, #tpu.memory_space<vmem>>, vector<256x512xbf16>
    %c0_1 = arith.constant 0 : index
    %c0_2 = arith.constant 0 : index
    %1 = vector.load %arg3[%c0_1, %c0_2] : memref<512x128xbf16, #tpu.memory_space<vmem>>, vector<512x128xbf16>
    %cst = arith.constant dense<0.000000e+00> : vector<256x128xf32>
    %2 = tpu.matmul %0, %1, %cst {dimension_numbers = #tpu.dot_dimension_numbers<[1], [0], [0], [1], [0, 0, 1, 1], [], []>} : vector<256x512xbf16>, vector<512x128xbf16>, vector<256x128xf32> -> vector<256x128xf32>
    %cst_3 = arith.constant 0.000000e+00 : f32
    %3 = vector.broadcast %cst_3 : f32 to vector<256x128xf32>
    %4 = arith.cmpf ogt, %2, %3 : vector<256x128xf32>
    %cst_4 = arith.constant 2.000000e-01 : f32
    %5 = vector.broadcast %cst_4 : f32 to vector<256x128xf32>
    %6 = arith.mulf %5, %2 : vector<256x128xf32>
    %7 = arith.select %4, %2, %6 : vector<256x128xi1>, vector<256x128xf32>
    %8 = arith.truncf %7 : vector<256x128xf32> to vector<256x128xbf16>
    %c0_5 = arith.constant 0 : index
    %c0_6 = arith.constant 0 : index
    %9 = vector.load %arg4[%c0_5, %c0_6] : memref<256x128xbf16, #tpu.memory_space<vmem>>, vector<256x128xbf16>
    tpu.vector_store %arg4[%c0_5, %c0_6], %8 {strides = array<i32>} : memref<256x128xbf16, #tpu.memory_space<vmem>>, vector<256x128xbf16>,
    return
  }
  func.func @transform_0(%arg0: i32, %arg1: i32) -> (i32, i32) {
    %c0_i32 = arith.constant 0 : i32
    %c0_i32_0 = arith.constant 0 : i32
    return %arg0, %c0_i32 : i32, i32
  }
  func.func @transform_1(%arg0: i32, %arg1: i32) -> (i32, i32) {
    %c0_i32 = arith.constant 0 : i32
    %c0_i32_0 = arith.constant 0 : i32
    return %c0_i32, %arg1 : i32, i32
  }
  func.func @transform_2(%arg0: i32, %arg1: i32) -> (i32, i32) {
    %c0_i32 = arith.constant 0 : i32
    return %arg0, %arg1 : i32, i32
  }
}

module attributes {stable_mosaic.version = 11 : i64} {
  func.func @_conv_bn_act_kernel(%arg0: i32, %arg1: memref<128x1024xbf16, #tpu.memory_space<vmem>>, %arg2: memref<1024x128xbf16, #tpu.memory_space<vmem>>, %arg3: memref<1x128xf32, #tpu.memory_space<vmem>>, %arg4: memref<1x128xf32, #tpu.memory_space<vmem>>, %arg5: memref<128x128xbf16, #tpu.memory_space<vmem>>) attributes {dimension_semantics = [#tpu.dimension_semantics<parallel>], iteration_bounds = array<i64: 1>, scalar_prefetch = 0 : i64, scratch_operands = 0 : i64, tpu.core_type = #tpu.core_type<tc>, window_params = [{pipeline_mode = #tpu.pipeline_mode<synchronous>, transform_indices = @transform_0, window_bounds = array<i64: 128, 1024>}, {transform_indices = @transform_1, window_bounds = array<i64: 1024, 128>}, {transform_indices = @transform_2, window_bounds = array<i64: 1, 128>}, {transform_indices = @transform_3, window_bounds = array<i64: 1, 128>}, {transform_indices = @transform_4, window_bounds = array<i64: 128, 128>}]} {
    %c0 = arith.constant 0 : index
    %c0_0 = arith.constant 0 : index
    %0 = vector.load %arg1[%c0, %c0_0] : memref<128x1024xbf16, #tpu.memory_space<vmem>>, vector<128x1024xbf16>
    %c0_1 = arith.constant 0 : index
    %c0_2 = arith.constant 0 : index
    %1 = vector.load %arg2[%c0_1, %c0_2] : memref<1024x128xbf16, #tpu.memory_space<vmem>>, vector<1024x128xbf16>
    %cst = arith.constant dense<0.000000e+00> : vector<128x128xf32>
    %2 = tpu.matmul %0, %1, %cst {dimension_numbers = #tpu.dot_dimension_numbers<[1], [0], [0], [1], [0, 0, 1, 1], [], []>} : vector<128x1024xbf16>, vector<1024x128xbf16>, vector<128x128xf32> -> vector<128x128xf32>
    %cst_3 = arith.constant dense<0.000000e+00> : vector<128xf32>
    %3 = vector.multi_reduction <add>, %2, %cst_3 [0] : vector<128x128xf32> to vector<128xf32>
    %4 = vector.shape_cast %3 : vector<128xf32> to vector<1x128xf32>
    %cst_4 = arith.constant 1.280000e+02 : f32
    %5 = vector.broadcast %cst_4 : f32 to vector<1x128xf32>
    %6 = arith.divf %4, %5 : vector<1x128xf32>
    %7 = vector.broadcast %6 : vector<1x128xf32> to vector<128x128xf32>
    %8 = arith.subf %2, %7 : vector<128x128xf32>
    %9 = arith.mulf %8, %8 : vector<128x128xf32>
    %cst_5 = arith.constant dense<0.000000e+00> : vector<128xf32>
    %10 = vector.multi_reduction <add>, %9, %cst_5 [0] : vector<128x128xf32> to vector<128xf32>
    %11 = vector.shape_cast %10 : vector<128xf32> to vector<1x128xf32>
    %cst_6 = arith.constant 1.280000e+02 : f32
    %12 = vector.broadcast %cst_6 : f32 to vector<1x128xf32>
    %13 = arith.divf %11, %12 : vector<1x128xf32>
    %c0_7 = arith.constant 0 : index
    %c0_8 = arith.constant 0 : index
    %14 = vector.load %arg3[%c0_7, %c0_8] : memref<1x128xf32, #tpu.memory_space<vmem>>, vector<1x128xf32>
    %cst_9 = arith.constant 9.99999974E-6 : f32
    %15 = vector.broadcast %cst_9 : f32 to vector<1x128xf32>
    %16 = arith.addf %13, %15 : vector<1x128xf32>
    %17 = math.rsqrt %16 : vector<1x128xf32>
    %18 = arith.mulf %14, %17 : vector<1x128xf32>
    %c0_10 = arith.constant 0 : index
    %c0_11 = arith.constant 0 : index
    %19 = vector.load %arg4[%c0_10, %c0_11] : memref<1x128xf32, #tpu.memory_space<vmem>>, vector<1x128xf32>
    %20 = arith.mulf %6, %18 : vector<1x128xf32>
    %21 = arith.subf %19, %20 : vector<1x128xf32>
    %22 = vector.broadcast %18 : vector<1x128xf32> to vector<128x128xf32>
    %23 = arith.mulf %2, %22 : vector<128x128xf32>
    %24 = vector.broadcast %21 : vector<1x128xf32> to vector<128x128xf32>
    %25 = arith.addf %23, %24 : vector<128x128xf32>
    %cst_12 = arith.constant 0.000000e+00 : f32
    %26 = vector.broadcast %cst_12 : f32 to vector<128x128xf32>
    %27 = arith.cmpf ogt, %25, %26 : vector<128x128xf32>
    %cst_13 = arith.constant 2.000000e-01 : f32
    %28 = vector.broadcast %cst_13 : f32 to vector<128x128xf32>
    %29 = arith.mulf %28, %25 : vector<128x128xf32>
    %30 = arith.select %27, %25, %29 : vector<128x128xi1>, vector<128x128xf32>
    %31 = arith.truncf %30 : vector<128x128xf32> to vector<128x128xbf16>
    %c0_14 = arith.constant 0 : index
    %c0_15 = arith.constant 0 : index
    %32 = vector.load %arg5[%c0_14, %c0_15] : memref<128x128xbf16, #tpu.memory_space<vmem>>, vector<128x128xbf16>
    tpu.vector_store %arg5[%c0_14, %c0_15], %31 {strides = array<i32>} : memref<128x128xbf16, #tpu.memory_space<vmem>>, vector<128x128xbf16>,
    return
  }
  func.func @transform_0(%arg0: i32) -> (i32, i32) {
    %c0_i32 = arith.constant 0 : i32
    %c0_i32_0 = arith.constant 0 : i32
    %c0_i32_1 = arith.constant 0 : i32
    return %c0_i32, %c0_i32_0 : i32, i32
  }
  func.func @transform_1(%arg0: i32) -> (i32, i32) {
    %c0_i32 = arith.constant 0 : i32
    %c0_i32_0 = arith.constant 0 : i32
    return %c0_i32, %arg0 : i32, i32
  }
  func.func @transform_2(%arg0: i32) -> (i32, i32) {
    %c0_i32 = arith.constant 0 : i32
    %c0_i32_0 = arith.constant 0 : i32
    return %c0_i32, %arg0 : i32, i32
  }
  func.func @transform_3(%arg0: i32) -> (i32, i32) {
    %c0_i32 = arith.constant 0 : i32
    %c0_i32_0 = arith.constant 0 : i32
    return %c0_i32, %arg0 : i32, i32
  }
  func.func @transform_4(%arg0: i32) -> (i32, i32) {
    %c0_i32 = arith.constant 0 : i32
    %c0_i32_0 = arith.constant 0 : i32
    return %c0_i32, %arg0 : i32, i32
  }
}

module attributes {stable_mosaic.version = 11 : i64} {
  func.func @_conv_bn_act_kernel(%arg0: i32, %arg1: memref<32x2048xbf16, #tpu.memory_space<vmem>>, %arg2: memref<2048x128xbf16, #tpu.memory_space<vmem>>, %arg3: memref<1x128xf32, #tpu.memory_space<vmem>>, %arg4: memref<1x128xf32, #tpu.memory_space<vmem>>, %arg5: memref<32x128xbf16, #tpu.memory_space<vmem>>) attributes {dimension_semantics = [#tpu.dimension_semantics<parallel>], iteration_bounds = array<i64: 2>, scalar_prefetch = 0 : i64, scratch_operands = 0 : i64, tpu.core_type = #tpu.core_type<tc>, window_params = [{pipeline_mode = #tpu.pipeline_mode<synchronous>, transform_indices = @transform_0, window_bounds = array<i64: 32, 2048>}, {transform_indices = @transform_1, window_bounds = array<i64: 2048, 128>}, {transform_indices = @transform_2, window_bounds = array<i64: 1, 128>}, {transform_indices = @transform_3, window_bounds = array<i64: 1, 128>}, {transform_indices = @transform_4, window_bounds = array<i64: 32, 128>}]} {
    %c0 = arith.constant 0 : index
    %c0_0 = arith.constant 0 : index
    %0 = vector.load %arg1[%c0, %c0_0] : memref<32x2048xbf16, #tpu.memory_space<vmem>>, vector<32x2048xbf16>
    %c0_1 = arith.constant 0 : index
    %c0_2 = arith.constant 0 : index
    %1 = vector.load %arg2[%c0_1, %c0_2] : memref<2048x128xbf16, #tpu.memory_space<vmem>>, vector<2048x128xbf16>
    %cst = arith.constant dense<0.000000e+00> : vector<32x128xf32>
    %2 = tpu.matmul %0, %1, %cst {dimension_numbers = #tpu.dot_dimension_numbers<[1], [0], [0], [1], [0, 0, 1, 1], [], []>} : vector<32x2048xbf16>, vector<2048x128xbf16>, vector<32x128xf32> -> vector<32x128xf32>
    %cst_3 = arith.constant dense<0.000000e+00> : vector<128xf32>
    %3 = vector.multi_reduction <add>, %2, %cst_3 [0] : vector<32x128xf32> to vector<128xf32>
    %4 = vector.shape_cast %3 : vector<128xf32> to vector<1x128xf32>
    %cst_4 = arith.constant 3.200000e+01 : f32
    %5 = vector.broadcast %cst_4 : f32 to vector<1x128xf32>
    %6 = arith.divf %4, %5 : vector<1x128xf32>
    %7 = vector.broadcast %6 : vector<1x128xf32> to vector<32x128xf32>
    %8 = arith.subf %2, %7 : vector<32x128xf32>
    %9 = arith.mulf %8, %8 : vector<32x128xf32>
    %cst_5 = arith.constant dense<0.000000e+00> : vector<128xf32>
    %10 = vector.multi_reduction <add>, %9, %cst_5 [0] : vector<32x128xf32> to vector<128xf32>
    %11 = vector.shape_cast %10 : vector<128xf32> to vector<1x128xf32>
    %cst_6 = arith.constant 3.200000e+01 : f32
    %12 = vector.broadcast %cst_6 : f32 to vector<1x128xf32>
    %13 = arith.divf %11, %12 : vector<1x128xf32>
    %c0_7 = arith.constant 0 : index
    %c0_8 = arith.constant 0 : index
    %14 = vector.load %arg3[%c0_7, %c0_8] : memref<1x128xf32, #tpu.memory_space<vmem>>, vector<1x128xf32>
    %cst_9 = arith.constant 9.99999974E-6 : f32
    %15 = vector.broadcast %cst_9 : f32 to vector<1x128xf32>
    %16 = arith.addf %13, %15 : vector<1x128xf32>
    %17 = math.rsqrt %16 : vector<1x128xf32>
    %18 = arith.mulf %14, %17 : vector<1x128xf32>
    %c0_10 = arith.constant 0 : index
    %c0_11 = arith.constant 0 : index
    %19 = vector.load %arg4[%c0_10, %c0_11] : memref<1x128xf32, #tpu.memory_space<vmem>>, vector<1x128xf32>
    %20 = arith.mulf %6, %18 : vector<1x128xf32>
    %21 = arith.subf %19, %20 : vector<1x128xf32>
    %22 = vector.broadcast %18 : vector<1x128xf32> to vector<32x128xf32>
    %23 = arith.mulf %2, %22 : vector<32x128xf32>
    %24 = vector.broadcast %21 : vector<1x128xf32> to vector<32x128xf32>
    %25 = arith.addf %23, %24 : vector<32x128xf32>
    %cst_12 = arith.constant 0.000000e+00 : f32
    %26 = vector.broadcast %cst_12 : f32 to vector<32x128xf32>
    %27 = arith.cmpf ogt, %25, %26 : vector<32x128xf32>
    %cst_13 = arith.constant 2.000000e-01 : f32
    %28 = vector.broadcast %cst_13 : f32 to vector<32x128xf32>
    %29 = arith.mulf %28, %25 : vector<32x128xf32>
    %30 = arith.select %27, %25, %29 : vector<32x128xi1>, vector<32x128xf32>
    %31 = arith.truncf %30 : vector<32x128xf32> to vector<32x128xbf16>
    %c0_14 = arith.constant 0 : index
    %c0_15 = arith.constant 0 : index
    %32 = vector.load %arg5[%c0_14, %c0_15] : memref<32x128xbf16, #tpu.memory_space<vmem>>, vector<32x128xbf16>
    tpu.vector_store %arg5[%c0_14, %c0_15], %31 {strides = array<i32>} : memref<32x128xbf16, #tpu.memory_space<vmem>>, vector<32x128xbf16>,
    return
  }
  func.func @transform_0(%arg0: i32) -> (i32, i32) {
    %c0_i32 = arith.constant 0 : i32
    %c0_i32_0 = arith.constant 0 : i32
    %c0_i32_1 = arith.constant 0 : i32
    return %c0_i32, %c0_i32_0 : i32, i32
  }
  func.func @transform_1(%arg0: i32) -> (i32, i32) {
    %c0_i32 = arith.constant 0 : i32
    %c0_i32_0 = arith.constant 0 : i32
    return %c0_i32, %arg0 : i32, i32
  }
  func.func @transform_2(%arg0: i32) -> (i32, i32) {
    %c0_i32 = arith.constant 0 : i32
    %c0_i32_0 = arith.constant 0 : i32
    return %c0_i32, %arg0 : i32, i32
  }
  func.func @transform_3(%arg0: i32) -> (i32, i32) {
    %c0_i32 = arith.constant 0 : i32
    %c0_i32_0 = arith.constant 0 : i32
    return %c0_i32, %arg0 : i32, i32
  }
  func.func @transform_4(%arg0: i32) -> (i32, i32) {
    %c0_i32 = arith.constant 0 : i32
    %c0_i32_0 = arith.constant 0 : i32
    return %c0_i32, %arg0 : i32, i32
  }
}

</mosaic_0001>

<bundles_post_ra>
// kernel: discriminator_forward.4
= control target key start
LH: loop header
LB: loop body
LE: loop exit
PB: predicated region body
PF: predicated region fallthrough
CT: control target
= control target key end

     0   :  { %s3628_s9 = smov 0   ;;  %s3630_s10 = smov 0   ;;  %s3890_s0 = inlined_call_operand.vmem [shape: bf16[2048,48], index: 0, kind: input, shape index: {}]   ;;  %s3891_s1 = inlined_call_operand.vmem [shape: bf16[48,128], index: 1, kind: input, shape index: {}]   ;;  %s3892_s2 = inlined_call_operand.vmem [shape: bf16[2048,128], index: 2, kind: output, shape index: {}]  }
   0x1   :  { %s3632_s11 = smov 0  }
   0x2 LB: > { %s24_s12 = sadd.s32 1, %s3607_s10  ;;  %p2514_p0 = scmp.ge.s32.totalorder %s3611_s11, 1  ;;  %s3611_s11 = sphi %s3632_s11, %s12_s11   ;;  %s3607_s10 = sphi %s3630_s10, %s3894_s10   ;;  %s3603_s9 = sphi %s3628_s9, %s3893_s9  }
   0x3   : > { %p26_p1 = scmp.ge.s32.totalorder %s24_s12, 2  ;;  %p136_p2 = scmp.lt.s32.totalorder %s3611_s11, 3 }
   0x5   : > { %s3896_s12 = smov (%p26_p1, %s24_s12), 0  ;;  %p137_p3 = pnand %p2514_p0, %p136_p2 }
   0x6   : > { %s2515_s15 = sshll.u32 (!%p137_p3), %s3603_s9, 7 }
   0x7   : > { %140 = sbr.rel (%p137_p3) target bundleno = 351 (0x15f), region = 28  ;;  %p166_p4 = scmp.lt.s32.totalorder (!%p137_p3), %s2515_s15, 255 }
   0xc   : > { %v3522_v0 = vld [vmem:[%s3891_s1 + $0x10] sm:$0xff]   ;;  %v3523_v1 = vld [vmem:[%s3891_s1 + $0x8] sm:$0xff]   ;;  %s3898_s15 = smov (!%p166_p4, %s2515_s15), 255  ;;  %v3524_v2 = vld [vmem:[%s3891_s1] sm:$0xff]   ;;  %vm657_vm0 = vcmask 392192  }
   0xd   : > { %3358 = vmatprep.subr.bf16.mxu0 %v3522_v0  ;;  %3492 = vmatprep.subr.bf16.mxu1 %v3522_v0  ;;  %s2516_s20 = sshll.u32 %s3898_s15, 2 }
   0xe   : > { %3359 = vmatpush3.bf16.msra.mxu0 %v3522_v0  ;;  %3495 = vmatpush3.bf16.msra.mxu1 %v3522_v0  ;;  %s3663_s23 = scalar_lea.vmem %s3890_s0, %s2516_s20  ;;  %s3798_s26 = scalar_lea.vmem %s3892_s2, %s2516_s20 }
   0xf   : > { %3360 = vmatprep.subr.bf16.mxu0 %v3523_v1  ;;  %3493 = vmatprep.subr.bf16.mxu1 %v3523_v1  ;;  %v3525_v3 = vld [vmem:[%s3663_s23] sm:$0xff]   ;;  %v3527_v5 = vld [vmem:[%s3663_s23 + $0x8] sm:$0xff]   ;;  %v3529_v7 = vld [vmem:[%s3663_s23 + $0x10] sm:$0xff]  }
  0x10   : > { %v3526_v4 = vld [vmem:[%s3663_s23 + $0x100] sm:$0xff]   ;;  %3364 = vmatprep.mubr.msk.bf16.mxu0 %vm657_vm0, %v3525_v3  ;;  %v3528_v6 = vld [vmem:[%s3663_s23 + $0x108] sm:$0xff]   ;;  %v3530_v8 = vld [vmem:[%s3663_s23 + $0x110] sm:$0xff]  }
  0x11   : > { %3428 = vmatprep.mubr.msk.bf16.mxu1 %vm657_vm0, %v3526_v4  ;;  %v3531_v9 = vld [vmem:[%s3663_s23 + $0x18] sm:$0xff]   ;;  %v3533_v11 = vld [vmem:[%s3663_s23 + $0x20] sm:$0xff]   ;;  %v3535_v13 = vld [vmem:[%s3663_s23 + $0x28] sm:$0xff]  }
  0x12   : > { %3361 = vmatpush3.bf16.msra.mxu0 %v3523_v1  ;;  %3496 = vmatpush3.bf16.msra.mxu1 %v3523_v1  ;;  %v3532_v10 = vld [vmem:[%s3663_s23 + $0x118] sm:$0xff]   ;;  %v3534_v12 = vld [vmem:[%s3663_s23 + $0x120] sm:$0xff]   ;;  %v3536_v14 = vld [vmem:[%s3663_s23 + $0x128] sm:$0xff]  }
  0x13   : > { %3362 = vmatprep.subr.bf16.mxu0 %v3524_v2  ;;  %3494 = vmatprep.subr.bf16.mxu1 %v3524_v2  ;;  %v3537_v15 = vld [vmem:[%s3663_s23 + $0x30] sm:$0xff]   ;;  %v3539_v17 = vld [vmem:[%s3663_s23 + $0x38] sm:$0xff]   ;;  %v3541_v19 = vld [vmem:[%s3663_s23 + $0x40] sm:$0xff]  }
  0x14   : > { %v3538_v16 = vld [vmem:[%s3663_s23 + $0x130] sm:$0xff]   ;;  %v3540_v18 = vld [vmem:[%s3663_s23 + $0x138] sm:$0xff]   ;;  %v3542_v20 = vld [vmem:[%s3663_s23 + $0x140] sm:$0xff]  }
  0x15   : > { %v3543_v21 = vld [vmem:[%s3663_s23 + $0x48] sm:$0xff]   ;;  %v3545_v23 = vld [vmem:[%s3663_s23 + $0x50] sm:$0xff]   ;;  %v3547_v25 = vld [vmem:[%s3663_s23 + $0x58] sm:$0xff]  }
  0x16   : > { %3363 = vmatpush3.bf16.msra.mxu0 %v3524_v2  ;;  %3497 = vmatpush3.bf16.msra.mxu1 %v3524_v2  ;;  %v3544_v22 = vld [vmem:[%s3663_s23 + $0x148] sm:$0xff]   ;;  %v3546_v24 = vld [vmem:[%s3663_s23 + $0x150] sm:$0xff]   ;;  %v3548_v26 = vld [vmem:[%s3663_s23 + $0x158] sm:$0xff]  }
  0x17   : > { %v3549_v27 = vld [vmem:[%s3663_s23 + $0x60] sm:$0xff]   ;;  %v3551_v29 = vld [vmem:[%s3663_s23 + $0x68] sm:$0xff]   ;;  %v3553_v31 = vld [vmem:[%s3663_s23 + $0x70] sm:$0xff]  }
  0x18   : > { %v3550_v28 = vld [vmem:[%s3663_s23 + $0x160] sm:$0xff]   ;;  %v3552_v30 = vld [vmem:[%s3663_s23 + $0x168] sm:$0xff]   ;;  %v3554_v32 = vld [vmem:[%s3663_s23 + $0x170] sm:$0xff]  }
  0x19   : > { %3365 = vmatmul.mubr.msk.bf16.vlgmr.msra.gmra.mxu0 %vm657_vm0, %v3527_v5  ;;  %3429 = vmatmul.mubr.msk.bf16.vlgmr.msra.gmra.mxu1 %vm657_vm0, %v3528_v6  ;;  %v3555_v33 = vld [vmem:[%s3663_s23 + $0x78] sm:$0xff]   ;;  %v3557_v35 = vld [vmem:[%s3663_s23 + $0x80] sm:$0xff]   ;;  %v3559_v37 = vld [vmem:[%s3663_s23 + $0x88] sm:$0xff]  }
  0x1a   : > { %3368 = vmatprep.mubr.msk.bf16.mxu0 %vm657_vm0, %v3529_v7  ;;  %3432 = vmatprep.mubr.msk.bf16.mxu1 %vm657_vm0, %v3530_v8  ;;  %v3556_v34 = vld [vmem:[%s3663_s23 + $0x178] sm:$0xff]   ;;  %v3558_v36 = vld [vmem:[%s3663_s23 + $0x180] sm:$0xff]   ;;  %v3560_v38 = vld [vmem:[%s3663_s23 + $0x188] sm:$0xff]  }
  0x1b   : > { %v3561_v39 = vld [vmem:[%s3663_s23 + $0x90] sm:$0xff]   ;;  %v3563_v41 = vld [vmem:[%s3663_s23 + $0x98] sm:$0xff]   ;;  %v3565_v43 = vld [vmem:[%s3663_s23 + $0xa0] sm:$0xff]  }
  0x1c   : > { %v3562_v40 = vld [vmem:[%s3663_s23 + $0x190] sm:$0xff]   ;;  %v3564_v42 = vld [vmem:[%s3663_s23 + $0x198] sm:$0xff]   ;;  %v3566_v44 = vld [vmem:[%s3663_s23 + $0x1a0] sm:$0xff]  }
  0x1d   : > { %v3567_v45 = vld [vmem:[%s3663_s23 + $0xa8] sm:$0xff]   ;;  %v3569_v47 = vld [vmem:[%s3663_s23 + $0xb0] sm:$0xff]   ;;  %v3571_v49 = vld [vmem:[%s3663_s23 + $0xb8] sm:$0xff]  }
  0x1e   : > { %v3568_v46 = vld [vmem:[%s3663_s23 + $0x1a8] sm:$0xff]   ;;  %v3570_v48 = vld [vmem:[%s3663_s23 + $0x1b0] sm:$0xff]   ;;  %v3572_v50 = vld [vmem:[%s3663_s23 + $0x1b8] sm:$0xff]  }
  0x1f   : > { %v3573_v51 = vld [vmem:[%s3663_s23 + $0xc0] sm:$0xff]   ;;  %v3575_v53 = vld [vmem:[%s3663_s23 + $0xc8] sm:$0xff]   ;;  %v3577_v55 = vld [vmem:[%s3663_s23 + $0xd0] sm:$0xff]  }
  0x20   : > { %v3574_v52 = vld [vmem:[%s3663_s23 + $0x1c0] sm:$0xff]   ;;  %v3576_v54 = vld [vmem:[%s3663_s23 + $0x1c8] sm:$0xff]   ;;  %v3578_v56 = vld [vmem:[%s3663_s23 + $0x1d0] sm:$0xff]  }
  0x21   : > { %3369 = vmatmul.mubr.msk.bf16.gmra.mxu0 %vm657_vm0, %v3531_v9  ;;  %3433 = vmatmul.mubr.msk.bf16.gmra.mxu1 %vm657_vm0, %v3532_v10  ;;  %v3579_v57 = vld [vmem:[%s3663_s23 + $0xd8] sm:$0xff]   ;;  %v3581_v59 = vld [vmem:[%s3663_s23 + $0xe0] sm:$0xff]   ;;  %v3583_v61 = vld [vmem:[%s3663_s23 + $0xe8] sm:$0xff]  }
  0x22   : > { %3372 = vmatprep.mubr.msk.bf16.mxu0 %vm657_vm0, %v3533_v11  ;;  %3436 = vmatprep.mubr.msk.bf16.mxu1 %vm657_vm0, %v3534_v12  ;;  %v3580_v58 = vld [vmem:[%s3663_s23 + $0x1d8] sm:$0xff]   ;;  %v3582_v60 = vld [vmem:[%s3663_s23 + $0x1e0] sm:$0xff]   ;;  %v3584_v62 = vld [vmem:[%s3663_s23 + $0x1e8] sm:$0xff]  }
  0x23   : > { %v3585_v63 = vld [vmem:[%s3663_s23 + $0xf0] sm:$0xff]   ;;  %v3587_v1 = vld [vmem:[%s3663_s23 + $0xf8] sm:$0xff]  }
  0x24   : > { %v3586_v0 = vld [vmem:[%s3663_s23 + $0x1f0] sm:$0xff]   ;;  %v3588_v2 = vld [vmem:[%s3663_s23 + $0x1f8] sm:$0xff]  }
  0x29   : > { %3373 = vmatmul.mubr.msk.bf16.gmra.mxu0 %vm657_vm0, %v3535_v13  ;;  %3437 = vmatmul.mubr.msk.bf16.gmra.mxu1 %vm657_vm0, %v3536_v14 }
  0x2a   : > { %3376 = vmatprep.mubr.msk.bf16.mxu0 %vm657_vm0, %v3537_v15  ;;  %3440 = vmatprep.mubr.msk.bf16.mxu1 %vm657_vm0, %v3538_v16 }
  0x31   : > { %3377 = vmatmul.mubr.msk.bf16.gmra.mxu0 %vm657_vm0, %v3539_v17  ;;  %3441 = vmatmul.mubr.msk.bf16.gmra.mxu1 %vm657_vm0, %v3540_v18 }
  0x32   : > { %3380 = vmatprep.mubr.msk.bf16.mxu0 %vm657_vm0, %v3541_v19  ;;  %3444 = vmatprep.mubr.msk.bf16.mxu1 %vm657_vm0, %v3542_v20 }
  0x39   : > { %3381 = vmatmul.mubr.msk.bf16.gmra.mxu0 %vm657_vm0, %v3543_v21  ;;  %3445 = vmatmul.mubr.msk.bf16.gmra.mxu1 %vm657_vm0, %v3544_v22 }
  0x3a   : > { %3384 = vmatprep.mubr.msk.bf16.mxu0 %vm657_vm0, %v3545_v23  ;;  %3448 = vmatprep.mubr.msk.bf16.mxu1 %vm657_vm0, %v3546_v24 }
  0x41   : > { %3385 = vmatmul.mubr.msk.bf16.gmra.mxu0 %vm657_vm0, %v3547_v25  ;;  %3449 = vmatmul.mubr.msk.bf16.gmra.mxu1 %vm657_vm0, %v3548_v26 }
  0x42   : > { %3388 = vmatprep.mubr.msk.bf16.mxu0 %vm657_vm0, %v3549_v27  ;;  %3452 = vmatprep.mubr.msk.bf16.mxu1 %vm657_vm0, %v3550_v28 }
  0x49   : > { %3389 = vmatmul.mubr.msk.bf16.gmra.mxu0 %vm657_vm0, %v3551_v29  ;;  %3453 = vmatmul.mubr.msk.bf16.gmra.mxu1 %vm657_vm0, %v3552_v30 }
  0x4a   : > { %3392 = vmatprep.mubr.msk.bf16.mxu0 %vm657_vm0, %v3553_v31  ;;  %3456 = vmatprep.mubr.msk.bf16.mxu1 %vm657_vm0, %v3554_v32 }
  0x51   : > { %3393 = vmatmul.mubr.msk.bf16.gmra.mxu0 %vm657_vm0, %v3555_v33  ;;  %3457 = vmatmul.mubr.msk.bf16.gmra.mxu1 %vm657_vm0, %v3556_v34 }
  0x52   : > { %3396 = vmatprep.mubr.msk.bf16.mxu0 %vm657_vm0, %v3557_v35  ;;  %3460 = vmatprep.mubr.msk.bf16.mxu1 %vm657_vm0, %v3558_v36 }
  0x59   : > { %3397 = vmatmul.mubr.msk.bf16.gmra.mxu0 %vm657_vm0, %v3559_v37  ;;  %3461 = vmatmul.mubr.msk.bf16.gmra.mxu1 %vm657_vm0, %v3560_v38 }
  0x5a   : > { %3400 = vmatprep.mubr.msk.bf16.mxu0 %vm657_vm0, %v3561_v39  ;;  %3464 = vmatprep.mubr.msk.bf16.mxu1 %vm657_vm0, %v3562_v40 }
  0x61   : > { %3401 = vmatmul.mubr.msk.bf16.gmra.mxu0 %vm657_vm0, %v3563_v41  ;;  %3465 = vmatmul.mubr.msk.bf16.gmra.mxu1 %vm657_vm0, %v3564_v42 }
  0x62   : > { %3404 = vmatprep.mubr.msk.bf16.mxu0 %vm657_vm0, %v3565_v43  ;;  %3468 = vmatprep.mubr.msk.bf16.mxu1 %vm657_vm0, %v3566_v44 }
  0x69   : > { %3405 = vmatmul.mubr.msk.bf16.gmra.mxu0 %vm657_vm0, %v3567_v45  ;;  %3469 = vmatmul.mubr.msk.bf16.gmra.mxu1 %vm657_vm0, %v3568_v46 }
  0x6a   : > { %3408 = vmatprep.mubr.msk.bf16.mxu0 %vm657_vm0, %v3569_v47  ;;  %3472 = vmatprep.mubr.msk.bf16.mxu1 %vm657_vm0, %v3570_v48 }
  0x71   : > { %3409 = vmatmul.mubr.msk.bf16.gmra.mxu0 %vm657_vm0, %v3571_v49  ;;  %3473 = vmatmul.mubr.msk.bf16.gmra.mxu1 %vm657_vm0, %v3572_v50 }
  0x72   : > { %3412 = vmatprep.mubr.msk.bf16.mxu0 %vm657_vm0, %v3573_v51  ;;  %3476 = vmatprep.mubr.msk.bf16.mxu1 %vm657_vm0, %v3574_v52 }
  0x79   : > { %3413 = vmatmul.mubr.msk.bf16.gmra.mxu0 %vm657_vm0, %v3575_v53  ;;  %3477 = vmatmul.mubr.msk.bf16.gmra.mxu1 %vm657_vm0, %v3576_v54 }
  0x7a   : > { %3416 = vmatprep.mubr.msk.bf16.mxu0 %vm657_vm0, %v3577_v55  ;;  %3480 = vmatprep.mubr.msk.bf16.mxu1 %vm657_vm0, %v3578_v56 }
  0x81   : > { %3417 = vmatmul.mubr.msk.bf16.gmra.mxu0 %vm657_vm0, %v3579_v57  ;;  %3481 = vmatmul.mubr.msk.bf16.gmra.mxu1 %vm657_vm0, %v3580_v58 }
  0x82   : > { %3420 = vmatprep.mubr.msk.bf16.mxu0 %vm657_vm0, %v3581_v59  ;;  %3484 = vmatprep.mubr.msk.bf16.mxu1 %vm657_vm0, %v3582_v60 }
  0x89   : > { %3421 = vmatmul.mubr.msk.bf16.gmra.mxu0 %vm657_vm0, %v3583_v61  ;;  %3485 = vmatmul.mubr.msk.bf16.gmra.mxu1 %vm657_vm0, %v3584_v62 }
  0x8a   : > { %3424 = vmatprep.mubr.msk.bf16.mxu0 %vm657_vm0, %v3585_v63  ;;  %3488 = vmatprep.mubr.msk.bf16.mxu1 %vm657_vm0, %v3586_v0 }
  0x91   : > { %3425 = vmatmul.mubr.msk.bf16.gmra.mxu0 %vm657_vm0, %v3587_v1  ;;  %3489 = vmatmul.mubr.msk.bf16.gmra.mxu1 %vm657_vm0, %v3588_v2 }
  0xd9   : > { %v3366_v3 = vpop.f32.mrf.mxu0  ;;  %v3430_v4 = vpop.f32.mrf.mxu1 }
  0xda   : > { %vm1397_vm1 = vcmp.gt.f32.partialorder %v3366_v3, 0.0  ;;  %v1525_v5 = vmul.f32 0.2, %v3366_v3  ;;  %v1589_v6 = vmul.f32 0.2, %v3430_v4  ;;  %vm1461_vm2 = vcmp.gt.f32.partialorder %v3430_v4, 0.0 }
  0xdb   : > { %v884_v7 = vpop.f32.mrf.mxu0  ;;  %v1140_v8 = vpop.f32.mrf.mxu1 }
  0xdc   : > { %v1653_v9 = vsel %vm1397_vm1, %v3366_v3, %v1525_v5  ;;  %v1523_v10 = vmul.f32 0.2, %v884_v7  ;;  %vm1395_vm3 = vcmp.gt.f32.partialorder %v884_v7, 0.0  ;;  %v1717_v14 = vsel %vm1461_vm2, %v3430_v4, %v1589_v6 }
  0xdd   : > { %v3367_v11 = vpop.f32.mrf.mxu0  ;;  %v3431_v12 = vpop.f32.mrf.mxu1  ;;  %vm1459_vm6 = vcmp.gt.f32.partialorder %v1140_v8, 0.0  ;;  %v1587_v15 = vmul.f32 0.2, %v1140_v8 }
  0xde   : > { %vm1398_vm4 = vcmp.gt.f32.partialorder %v3367_v11, 0.0  ;;  %v1526_v13 = vmul.f32 0.2, %v3367_v11  ;;  %vm1462_vm5 = vcmp.gt.f32.partialorder %v3431_v12, 0.0  ;;  %v1590_v16 = vmul.f32 0.2, %v3431_v12 }
  0xdf   : > { %v887_v17 = vpop.f32.mrf.mxu0  ;;  %v1143_v18 = vpop.f32.mrf.mxu1  ;;  %v1651_v21 = vsel %vm1395_vm3, %v884_v7, %v1523_v10  ;;  %v1715_v30 = vsel %vm1459_vm6, %v1140_v8, %v1587_v15 }
  0xe0   : > { %v1654_v19 = vsel %vm1398_vm4, %v3367_v11, %v1526_v13  ;;  %vm1396_vm7 = vcmp.gt.f32.partialorder %v887_v17, 0.0  ;;  %v1524_v20 = vmul.f32 0.2, %v887_v17  ;;  %vm1460_vm8 = vcmp.gt.f32.partialorder %v1143_v18, 0.0 }
  0xe1   : > { %v2916_v22 = vpack.c.bf16 %v1654_v19, %v1653_v9  ;;  %v1718_v23 = vsel %vm1462_vm5, %v3431_v12, %v1590_v16  ;;  %v1588_v24 = vmul.f32 0.2, %v1143_v18  ;;  %v3370_v25 = vpop.f32.mrf.mxu0  ;;  %v3434_v26 = vpop.f32.mrf.mxu1 }
  0xe2   : > { %v3076_v27 = vpack.c.bf16 %v1718_v23, %v1717_v14  ;;  %v1652_v28 = vsel %vm1396_vm7, %v887_v17, %v1524_v20  ;;  %vm1401_vm9 = vcmp.gt.f32.partialorder %v3370_v25, 0.0  ;;  %v1529_v29 = vmul.f32 0.2, %v3370_v25 }
  0xe3   : > { %3228 = vst [vmem:[%s3798_s26 + $0x8] sm:$0xff] %v2916_v22   ;;  %v2911_v31 = vpack.c.bf16 %v1652_v28, %v1651_v21  ;;  %v1716_v32 = vsel %vm1460_vm8, %v1143_v18, %v1588_v24  ;;  %v1593_v33 = vmul.f32 0.2, %v3434_v26  ;;  %v900_v34 = vpop.f32.mrf.mxu0  ;;  %v1156_v35 = vpop.f32.mrf.mxu1  ;;  %vm1465_vm10 = vcmp.gt.f32.partialorder %v3434_v26, 0.0 }
  0xe4   : > { %3260 = vst [vmem:[%s3798_s26 + $0x108] sm:$0xff] %v3076_v27   ;;  %v3071_v36 = vpack.c.bf16 %v1716_v32, %v1715_v30  ;;  %v1657_v37 = vsel %vm1401_vm9, %v3370_v25, %v1529_v29  ;;  %v1527_v38 = vmul.f32 0.2, %v900_v34  ;;  %vm1399_vm11 = vcmp.gt.f32.partialorder %v900_v34, 0.0 }
  0xe5   : > { %2912 = vst [vmem:[%s3798_s26] sm:$0xff] %v2911_v31   ;;  %v3371_v39 = vpop.f32.mrf.mxu0  ;;  %v3435_v40 = vpop.f32.mrf.mxu1  ;;  %v1721_v42 = vsel %vm1465_vm10, %v3434_v26, %v1593_v33  ;;  %vm1463_vm14 = vcmp.gt.f32.partialorder %v1156_v35, 0.0  ;;  %v1591_v43 = vmul.f32 0.2, %v1156_v35 }
  0xe6   : > { %3259 = vst [vmem:[%s3798_s26 + $0x100] sm:$0xff] %v3071_v36   ;;  %vm1402_vm12 = vcmp.gt.f32.partialorder %v3371_v39, 0.0  ;;  %v1530_v41 = vmul.f32 0.2, %v3371_v39  ;;  %vm1466_vm13 = vcmp.gt.f32.partialorder %v3435_v40, 0.0  ;;  %v1655_v49 = vsel %vm1399_vm11, %v900_v34, %v1527_v38 }
  0xe7   : > { %v1594_v44 = vmul.f32 0.2, %v3435_v40  ;;  %v903_v45 = vpop.f32.mrf.mxu0  ;;  %v1159_v46 = vpop.f32.mrf.mxu1  ;;  %v1719_v58 = vsel %vm1463_vm14, %v1156_v35, %v1591_v43 }
  0xe8   : > { %v1658_v47 = vsel %vm1402_vm12, %v3371_v39, %v1530_v41  ;;  %vm1400_vm15 = vcmp.gt.f32.partialorder %v903_v45, 0.0  ;;  %v1528_v48 = vmul.f32 0.2, %v903_v45  ;;  %vm1464_vm0 = vcmp.gt.f32.partialorder %v1159_v46, 0.0 }
  0xe9   : > { %v2926_v50 = vpack.c.bf16 %v1658_v47, %v1657_v37  ;;  %v1722_v51 = vsel %vm1466_vm13, %v3435_v40, %v1594_v44  ;;  %v1592_v52 = vmul.f32 0.2, %v1159_v46  ;;  %v3374_v53 = vpop.f32.mrf.mxu0  ;;  %v3438_v54 = vpop.f32.mrf.mxu1 }
  0xea   : > { %v3086_v55 = vpack.c.bf16 %v1722_v51, %v1721_v42  ;;  %v1656_v56 = vsel %vm1400_vm15, %v903_v45, %v1528_v48  ;;  %vm1405_vm1 = vcmp.gt.f32.partialorder %v3374_v53, 0.0  ;;  %v1533_v57 = vmul.f32 0.2, %v3374_v53 }
  0xeb   : > { %3230 = vst [vmem:[%s3798_s26 + $0x18] sm:$0xff] %v2926_v50   ;;  %v2921_v59 = vpack.c.bf16 %v1656_v56, %v1655_v49  ;;  %v1720_v60 = vsel %vm1464_vm0, %v1159_v46, %v1592_v52  ;;  %v1597_v61 = vmul.f32 0.2, %v3438_v54  ;;  %v916_v62 = vpop.f32.mrf.mxu0  ;;  %v1172_v63 = vpop.f32.mrf.mxu1  ;;  %vm1469_vm2 = vcmp.gt.f32.partialorder %v3438_v54, 0.0 }
  0xec   : > { %3262 = vst [vmem:[%s3798_s26 + $0x118] sm:$0xff] %v3086_v55   ;;  %v3081_v0 = vpack.c.bf16 %v1720_v60, %v1719_v58  ;;  %v1661_v1 = vsel %vm1405_vm1, %v3374_v53, %v1533_v57  ;;  %v1531_v2 = vmul.f32 0.2, %v916_v62  ;;  %vm1403_vm3 = vcmp.gt.f32.partialorder %v916_v62, 0.0 }
  0xed   : > { %3229 = vst [vmem:[%s3798_s26 + $0x10] sm:$0xff] %v2921_v59   ;;  %v3375_v3 = vpop.f32.mrf.mxu0  ;;  %v3439_v4 = vpop.f32.mrf.mxu1  ;;  %v1725_v6 = vsel %vm1469_vm2, %v3438_v54, %v1597_v61  ;;  %vm1467_vm6 = vcmp.gt.f32.partialorder %v1172_v63, 0.0  ;;  %v1595_v7 = vmul.f32 0.2, %v1172_v63 }
  0xee   : > { %3261 = vst [vmem:[%s3798_s26 + $0x110] sm:$0xff] %v3081_v0   ;;  %vm1406_vm4 = vcmp.gt.f32.partialorder %v3375_v3, 0.0  ;;  %v1534_v5 = vmul.f32 0.2, %v3375_v3  ;;  %vm1470_vm5 = vcmp.gt.f32.partialorder %v3439_v4, 0.0  ;;  %v1659_v13 = vsel %vm1403_vm3, %v916_v62, %v1531_v2 }
  0xef   : > { %v1598_v8 = vmul.f32 0.2, %v3439_v4  ;;  %v919_v9 = vpop.f32.mrf.mxu0  ;;  %v1175_v10 = vpop.f32.mrf.mxu1  ;;  %v1723_v22 = vsel %vm1467_vm6, %v1172_v63, %v1595_v7 }
  0xf0   : > { %v1662_v11 = vsel %vm1406_vm4, %v3375_v3, %v1534_v5  ;;  %vm1404_vm7 = vcmp.gt.f32.partialorder %v919_v9, 0.0  ;;  %v1532_v12 = vmul.f32 0.2, %v919_v9  ;;  %vm1468_vm8 = vcmp.gt.f32.partialorder %v1175_v10, 0.0 }
  0xf1   : > { %v2936_v14 = vpack.c.bf16 %v1662_v11, %v1661_v1  ;;  %v1726_v15 = vsel %vm1470_vm5, %v3439_v4, %v1598_v8  ;;  %v1596_v16 = vmul.f32 0.2, %v1175_v10  ;;  %v3378_v17 = vpop.f32.mrf.mxu0  ;;  %v3442_v18 = vpop.f32.mrf.mxu1 }
  0xf2   : > { %v3096_v19 = vpack.c.bf16 %v1726_v15, %v1725_v6  ;;  %v1660_v20 = vsel %vm1404_vm7, %v919_v9, %v1532_v12  ;;  %vm1409_vm9 = vcmp.gt.f32.partialorder %v3378_v17, 0.0  ;;  %v1537_v21 = vmul.f32 0.2, %v3378_v17 }
  0xf3   : > { %3232 = vst [vmem:[%s3798_s26 + $0x28] sm:$0xff] %v2936_v14   ;;  %v2931_v23 = vpack.c.bf16 %v1660_v20, %v1659_v13  ;;  %v1724_v24 = vsel %vm1468_vm8, %v1175_v10, %v1596_v16  ;;  %v1601_v25 = vmul.f32 0.2, %v3442_v18  ;;  %v932_v26 = vpop.f32.mrf.mxu0  ;;  %v1188_v27 = vpop.f32.mrf.mxu1  ;;  %vm1473_vm10 = vcmp.gt.f32.partialorder %v3442_v18, 0.0 }
  0xf4   : > { %3264 = vst [vmem:[%s3798_s26 + $0x128] sm:$0xff] %v3096_v19   ;;  %v3091_v28 = vpack.c.bf16 %v1724_v24, %v1723_v22  ;;  %v1665_v29 = vsel %vm1409_vm9, %v3378_v17, %v1537_v21  ;;  %v1535_v30 = vmul.f32 0.2, %v932_v26  ;;  %vm1407_vm11 = vcmp.gt.f32.partialorder %v932_v26, 0.0 }
  0xf5   : > { %3231 = vst [vmem:[%s3798_s26 + $0x20] sm:$0xff] %v2931_v23   ;;  %v3379_v31 = vpop.f32.mrf.mxu0  ;;  %v3443_v32 = vpop.f32.mrf.mxu1  ;;  %v1729_v34 = vsel %vm1473_vm10, %v3442_v18, %v1601_v25  ;;  %vm1471_vm14 = vcmp.gt.f32.partialorder %v1188_v27, 0.0  ;;  %v1599_v35 = vmul.f32 0.2, %v1188_v27 }
  0xf6   : > { %3263 = vst [vmem:[%s3798_s26 + $0x120] sm:$0xff] %v3091_v28   ;;  %vm1410_vm12 = vcmp.gt.f32.partialorder %v3379_v31, 0.0  ;;  %v1538_v33 = vmul.f32 0.2, %v3379_v31  ;;  %vm1474_vm13 = vcmp.gt.f32.partialorder %v3443_v32, 0.0  ;;  %v1663_v41 = vsel %vm1407_vm11, %v932_v26, %v1535_v30 }
  0xf7   : > { %v1602_v36 = vmul.f32 0.2, %v3443_v32  ;;  %v935_v37 = vpop.f32.mrf.mxu0  ;;  %v1191_v38 = vpop.f32.mrf.mxu1  ;;  %v1727_v50 = vsel %vm1471_vm14, %v1188_v27, %v1599_v35 }
  0xf8   : > { %v1666_v39 = vsel %vm1410_vm12, %v3379_v31, %v1538_v33  ;;  %vm1408_vm15 = vcmp.gt.f32.partialorder %v935_v37, 0.0  ;;  %v1536_v40 = vmul.f32 0.2, %v935_v37  ;;  %vm1472_vm0 = vcmp.gt.f32.partialorder %v1191_v38, 0.0 }
  0xf9   : > { %v2946_v42 = vpack.c.bf16 %v1666_v39, %v1665_v29  ;;  %v1730_v43 = vsel %vm1474_vm13, %v3443_v32, %v1602_v36  ;;  %v1600_v44 = vmul.f32 0.2, %v1191_v38  ;;  %v3382_v45 = vpop.f32.mrf.mxu0  ;;  %v3446_v46 = vpop.f32.mrf.mxu1 }
  0xfa   : > { %v3106_v47 = vpack.c.bf16 %v1730_v43, %v1729_v34  ;;  %v1664_v48 = vsel %vm1408_vm15, %v935_v37, %v1536_v40  ;;  %vm1413_vm1 = vcmp.gt.f32.partialorder %v3382_v45, 0.0  ;;  %v1541_v49 = vmul.f32 0.2, %v3382_v45 }
  0xfb   : > { %3234 = vst [vmem:[%s3798_s26 + $0x38] sm:$0xff] %v2946_v42   ;;  %v2941_v51 = vpack.c.bf16 %v1664_v48, %v1663_v41  ;;  %v1728_v52 = vsel %vm1472_vm0, %v1191_v38, %v1600_v44  ;;  %v1605_v53 = vmul.f32 0.2, %v3446_v46  ;;  %v948_v54 = vpop.f32.mrf.mxu0  ;;  %v1204_v55 = vpop.f32.mrf.mxu1  ;;  %vm1477_vm2 = vcmp.gt.f32.partialorder %v3446_v46, 0.0 }
  0xfc   : > { %3266 = vst [vmem:[%s3798_s26 + $0x138] sm:$0xff] %v3106_v47   ;;  %v3101_v56 = vpack.c.bf16 %v1728_v52, %v1727_v50  ;;  %v1669_v57 = vsel %vm1413_vm1, %v3382_v45, %v1541_v49  ;;  %v1539_v58 = vmul.f32 0.2, %v948_v54  ;;  %vm1411_vm3 = vcmp.gt.f32.partialorder %v948_v54, 0.0 }
  0xfd   : > { %3233 = vst [vmem:[%s3798_s26 + $0x30] sm:$0xff] %v2941_v51   ;;  %v3383_v59 = vpop.f32.mrf.mxu0  ;;  %v3447_v60 = vpop.f32.mrf.mxu1  ;;  %v1733_v62 = vsel %vm1477_vm2, %v3446_v46, %v1605_v53  ;;  %vm1475_vm6 = vcmp.gt.f32.partialorder %v1204_v55, 0.0  ;;  %v1603_v63 = vmul.f32 0.2, %v1204_v55 }
  0xfe   : > { %3265 = vst [vmem:[%s3798_s26 + $0x130] sm:$0xff] %v3101_v56   ;;  %vm1414_vm4 = vcmp.gt.f32.partialorder %v3383_v59, 0.0  ;;  %v1542_v61 = vmul.f32 0.2, %v3383_v59  ;;  %vm1478_vm5 = vcmp.gt.f32.partialorder %v3447_v60, 0.0  ;;  %v1667_v5 = vsel %vm1411_vm3, %v948_v54, %v1539_v58 }
  0xff   : > { %v1606_v0 = vmul.f32 0.2, %v3447_v60  ;;  %v951_v1 = vpop.f32.mrf.mxu0  ;;  %v1207_v2 = vpop.f32.mrf.mxu1  ;;  %v1731_v14 = vsel %vm1475_vm6, %v1204_v55, %v1603_v63 }
 0x100   : > { %v1670_v3 = vsel %vm1414_vm4, %v3383_v59, %v1542_v61  ;;  %vm1412_vm7 = vcmp.gt.f32.partialorder %v951_v1, 0.0  ;;  %v1540_v4 = vmul.f32 0.2, %v951_v1  ;;  %vm1476_vm8 = vcmp.gt.f32.partialorder %v1207_v2, 0.0 }
 0x101   : > { %v2956_v6 = vpack.c.bf16 %v1670_v3, %v1669_v57  ;;  %v1734_v7 = vsel %vm1478_vm5, %v3447_v60, %v1606_v0  ;;  %v1604_v8 = vmul.f32 0.2, %v1207_v2  ;;  %v3386_v9 = vpop.f32.mrf.mxu0  ;;  %v3450_v10 = vpop.f32.mrf.mxu1 }
 0x102   : > { %v3116_v11 = vpack.c.bf16 %v1734_v7, %v1733_v62  ;;  %v1668_v12 = vsel %vm1412_vm7, %v951_v1, %v1540_v4  ;;  %vm1417_vm9 = vcmp.gt.f32.partialorder %v3386_v9, 0.0  ;;  %v1545_v13 = vmul.f32 0.2, %v3386_v9 }
 0x103   : > { %3236 = vst [vmem:[%s3798_s26 + $0x48] sm:$0xff] %v2956_v6   ;;  %v2951_v15 = vpack.c.bf16 %v1668_v12, %v1667_v5  ;;  %v1732_v16 = vsel %vm1476_vm8, %v1207_v2, %v1604_v8  ;;  %v1609_v17 = vmul.f32 0.2, %v3450_v10  ;;  %v964_v18 = vpop.f32.mrf.mxu0  ;;  %v1220_v19 = vpop.f32.mrf.mxu1  ;;  %vm1481_vm10 = vcmp.gt.f32.partialorder %v3450_v10, 0.0 }
 0x104   : > { %3268 = vst [vmem:[%s3798_s26 + $0x148] sm:$0xff] %v3116_v11   ;;  %v3111_v20 = vpack.c.bf16 %v1732_v16, %v1731_v14  ;;  %v1673_v21 = vsel %vm1417_vm9, %v3386_v9, %v1545_v13  ;;  %v1543_v22 = vmul.f32 0.2, %v964_v18  ;;  %vm1415_vm11 = vcmp.gt.f32.partialorder %v964_v18, 0.0 }
 0x105   : > { %3235 = vst [vmem:[%s3798_s26 + $0x40] sm:$0xff] %v2951_v15   ;;  %v3387_v23 = vpop.f32.mrf.mxu0  ;;  %v3451_v24 = vpop.f32.mrf.mxu1  ;;  %v1737_v26 = vsel %vm1481_vm10, %v3450_v10, %v1609_v17  ;;  %vm1479_vm14 = vcmp.gt.f32.partialorder %v1220_v19, 0.0  ;;  %v1607_v27 = vmul.f32 0.2, %v1220_v19 }
 0x106   : > { %3267 = vst [vmem:[%s3798_s26 + $0x140] sm:$0xff] %v3111_v20   ;;  %vm1418_vm12 = vcmp.gt.f32.partialorder %v3387_v23, 0.0  ;;  %v1546_v25 = vmul.f32 0.2, %v3387_v23  ;;  %vm1482_vm13 = vcmp.gt.f32.partialorder %v3451_v24, 0.0  ;;  %v1671_v33 = vsel %vm1415_vm11, %v964_v18, %v1543_v22 }
 0x107   : > { %v1610_v28 = vmul.f32 0.2, %v3451_v24  ;;  %v967_v29 = vpop.f32.mrf.mxu0  ;;  %v1223_v30 = vpop.f32.mrf.mxu1  ;;  %v1735_v42 = vsel %vm1479_vm14, %v1220_v19, %v1607_v27 }
 0x108   : > { %v1674_v31 = vsel %vm1418_vm12, %v3387_v23, %v1546_v25  ;;  %vm1416_vm15 = vcmp.gt.f32.partialorder %v967_v29, 0.0  ;;  %v1544_v32 = vmul.f32 0.2, %v967_v29  ;;  %vm1480_vm0 = vcmp.gt.f32.partialorder %v1223_v30, 0.0 }
 0x109   : > { %v2966_v34 = vpack.c.bf16 %v1674_v31, %v1673_v21  ;;  %v1738_v35 = vsel %vm1482_vm13, %v3451_v24, %v1610_v28  ;;  %v1608_v36 = vmul.f32 0.2, %v1223_v30  ;;  %v3390_v37 = vpop.f32.mrf.mxu0  ;;  %v3454_v38 = vpop.f32.mrf.mxu1 }
 0x10a   : > { %v3126_v39 = vpack.c.bf16 %v1738_v35, %v1737_v26  ;;  %v1672_v40 = vsel %vm1416_vm15, %v967_v29, %v1544_v32  ;;  %vm1421_vm1 = vcmp.gt.f32.partialorder %v3390_v37, 0.0  ;;  %v1549_v41 = vmul.f32 0.2, %v3390_v37 }
 0x10b   : > { %3238 = vst [vmem:[%s3798_s26 + $0x58] sm:$0xff] %v2966_v34   ;;  %v2961_v43 = vpack.c.bf16 %v1672_v40, %v1671_v33  ;;  %v1736_v44 = vsel %vm1480_vm0, %v1223_v30, %v1608_v36  ;;  %v1613_v45 = vmul.f32 0.2, %v3454_v38  ;;  %v980_v46 = vpop.f32.mrf.mxu0  ;;  %v1236_v47 = vpop.f32.mrf.mxu1  ;;  %vm1485_vm2 = vcmp.gt.f32.partialorder %v3454_v38, 0.0 }
 0x10c   : > { %3270 = vst [vmem:[%s3798_s26 + $0x158] sm:$0xff] %v3126_v39   ;;  %v3121_v48 = vpack.c.bf16 %v1736_v44, %v1735_v42  ;;  %v1677_v49 = vsel %vm1421_vm1, %v3390_v37, %v1549_v41  ;;  %v1547_v50 = vmul.f32 0.2, %v980_v46  ;;  %vm1419_vm3 = vcmp.gt.f32.partialorder %v980_v46, 0.0 }
 0x10d   : > { %3237 = vst [vmem:[%s3798_s26 + $0x50] sm:$0xff] %v2961_v43   ;;  %v3391_v51 = vpop.f32.mrf.mxu0  ;;  %v3455_v52 = vpop.f32.mrf.mxu1  ;;  %v1741_v54 = vsel %vm1485_vm2, %v3454_v38, %v1613_v45  ;;  %vm1483_vm6 = vcmp.gt.f32.partialorder %v1236_v47, 0.0  ;;  %v1611_v55 = vmul.f32 0.2, %v1236_v47 }
 0x10e   : > { %3269 = vst [vmem:[%s3798_s26 + $0x150] sm:$0xff] %v3121_v48   ;;  %vm1422_vm4 = vcmp.gt.f32.partialorder %v3391_v51, 0.0  ;;  %v1550_v53 = vmul.f32 0.2, %v3391_v51  ;;  %vm1486_vm5 = vcmp.gt.f32.partialorder %v3455_v52, 0.0  ;;  %v1675_v61 = vsel %vm1419_vm3, %v980_v46, %v1547_v50 }
 0x10f   : > { %v1614_v56 = vmul.f32 0.2, %v3455_v52  ;;  %v983_v57 = vpop.f32.mrf.mxu0  ;;  %v1239_v58 = vpop.f32.mrf.mxu1  ;;  %v1739_v6 = vsel %vm1483_vm6, %v1236_v47, %v1611_v55 }
 0x110   : > { %v1678_v59 = vsel %vm1422_vm4, %v3391_v51, %v1550_v53  ;;  %vm1420_vm7 = vcmp.gt.f32.partialorder %v983_v57, 0.0  ;;  %v1548_v60 = vmul.f32 0.2, %v983_v57  ;;  %vm1484_vm8 = vcmp.gt.f32.partialorder %v1239_v58, 0.0 }
 0x111   : > { %v2976_v62 = vpack.c.bf16 %v1678_v59, %v1677_v49  ;;  %v1742_v63 = vsel %vm1486_vm5, %v3455_v52, %v1614_v56  ;;  %v1612_v0 = vmul.f32 0.2, %v1239_v58  ;;  %v3394_v1 = vpop.f32.mrf.mxu0  ;;  %v3458_v2 = vpop.f32.mrf.mxu1 }
 0x112   : > { %v3136_v3 = vpack.c.bf16 %v1742_v63, %v1741_v54  ;;  %v1676_v4 = vsel %vm1420_vm7, %v983_v57, %v1548_v60  ;;  %vm1425_vm9 = vcmp.gt.f32.partialorder %v3394_v1, 0.0  ;;  %v1553_v5 = vmul.f32 0.2, %v3394_v1 }
 0x113   : > { %3240 = vst [vmem:[%s3798_s26 + $0x68] sm:$0xff] %v2976_v62   ;;  %v2971_v7 = vpack.c.bf16 %v1676_v4, %v1675_v61  ;;  %v1740_v8 = vsel %vm1484_vm8, %v1239_v58, %v1612_v0  ;;  %v1617_v9 = vmul.f32 0.2, %v3458_v2  ;;  %v996_v10 = vpop.f32.mrf.mxu0  ;;  %v1252_v11 = vpop.f32.mrf.mxu1  ;;  %vm1489_vm10 = vcmp.gt.f32.partialorder %v3458_v2, 0.0 }
 0x114   : > { %3272 = vst [vmem:[%s3798_s26 + $0x168] sm:$0xff] %v3136_v3   ;;  %v3131_v12 = vpack.c.bf16 %v1740_v8, %v1739_v6  ;;  %v1681_v13 = vsel %vm1425_vm9, %v3394_v1, %v1553_v5  ;;  %v1551_v14 = vmul.f32 0.2, %v996_v10  ;;  %vm1423_vm11 = vcmp.gt.f32.partialorder %v996_v10, 0.0 }
 0x115   : > { %3239 = vst [vmem:[%s3798_s26 + $0x60] sm:$0xff] %v2971_v7   ;;  %v3395_v15 = vpop.f32.mrf.mxu0  ;;  %v3459_v16 = vpop.f32.mrf.mxu1  ;;  %v1745_v18 = vsel %vm1489_vm10, %v3458_v2, %v1617_v9  ;;  %vm1487_vm14 = vcmp.gt.f32.partialorder %v1252_v11, 0.0  ;;  %v1615_v19 = vmul.f32 0.2, %v1252_v11 }
 0x116   : > { %3271 = vst [vmem:[%s3798_s26 + $0x160] sm:$0xff] %v3131_v12   ;;  %vm1426_vm12 = vcmp.gt.f32.partialorder %v3395_v15, 0.0  ;;  %v1554_v17 = vmul.f32 0.2, %v3395_v15  ;;  %vm1490_vm13 = vcmp.gt.f32.partialorder %v3459_v16, 0.0  ;;  %v1679_v25 = vsel %vm1423_vm11, %v996_v10, %v1551_v14 }
 0x117   : > { %v1618_v20 = vmul.f32 0.2, %v3459_v16  ;;  %v999_v21 = vpop.f32.mrf.mxu0  ;;  %v1255_v22 = vpop.f32.mrf.mxu1  ;;  %v1743_v34 = vsel %vm1487_vm14, %v1252_v11, %v1615_v19 }
 0x118   : > { %v1682_v23 = vsel %vm1426_vm12, %v3395_v15, %v1554_v17  ;;  %vm1424_vm15 = vcmp.gt.f32.partialorder %v999_v21, 0.0  ;;  %v1552_v24 = vmul.f32 0.2, %v999_v21  ;;  %vm1488_vm0 = vcmp.gt.f32.partialorder %v1255_v22, 0.0 }
 0x119   : > { %v2986_v26 = vpack.c.bf16 %v1682_v23, %v1681_v13  ;;  %v1746_v27 = vsel %vm1490_vm13, %v3459_v16, %v1618_v20  ;;  %v1616_v28 = vmul.f32 0.2, %v1255_v22  ;;  %v3398_v29 = vpop.f32.mrf.mxu0  ;;  %v3462_v30 = vpop.f32.mrf.mxu1 }
 0x11a   : > { %v3146_v31 = vpack.c.bf16 %v1746_v27, %v1745_v18  ;;  %v1680_v32 = vsel %vm1424_vm15, %v999_v21, %v1552_v24  ;;  %vm1429_vm1 = vcmp.gt.f32.partialorder %v3398_v29, 0.0  ;;  %v1557_v33 = vmul.f32 0.2, %v3398_v29 }
 0x11b   : > { %3242 = vst [vmem:[%s3798_s26 + $0x78] sm:$0xff] %v2986_v26   ;;  %v2981_v35 = vpack.c.bf16 %v1680_v32, %v1679_v25  ;;  %v1744_v36 = vsel %vm1488_vm0, %v1255_v22, %v1616_v28  ;;  %v1621_v37 = vmul.f32 0.2, %v3462_v30  ;;  %v1012_v38 = vpop.f32.mrf.mxu0  ;;  %v1268_v39 = vpop.f32.mrf.mxu1  ;;  %vm1493_vm2 = vcmp.gt.f32.partialorder %v3462_v30, 0.0 }
 0x11c   : > { %3274 = vst [vmem:[%s3798_s26 + $0x178] sm:$0xff] %v3146_v31   ;;  %v3141_v40 = vpack.c.bf16 %v1744_v36, %v1743_v34  ;;  %v1685_v41 = vsel %vm1429_vm1, %v3398_v29, %v1557_v33  ;;  %v1555_v42 = vmul.f32 0.2, %v1012_v38  ;;  %vm1427_vm3 = vcmp.gt.f32.partialorder %v1012_v38, 0.0 }
 0x11d   : > { %3241 = vst [vmem:[%s3798_s26 + $0x70] sm:$0xff] %v2981_v35   ;;  %v3399_v43 = vpop.f32.mrf.mxu0  ;;  %v3463_v44 = vpop.f32.mrf.mxu1  ;;  %v1749_v46 = vsel %vm1493_vm2, %v3462_v30, %v1621_v37  ;;  %vm1491_vm6 = vcmp.gt.f32.partialorder %v1268_v39, 0.0  ;;  %v1619_v47 = vmul.f32 0.2, %v1268_v39 }
 0x11e   : > { %3273 = vst [vmem:[%s3798_s26 + $0x170] sm:$0xff] %v3141_v40   ;;  %vm1430_vm4 = vcmp.gt.f32.partialorder %v3399_v43, 0.0  ;;  %v1558_v45 = vmul.f32 0.2, %v3399_v43  ;;  %vm1494_vm5 = vcmp.gt.f32.partialorder %v3463_v44, 0.0  ;;  %v1683_v53 = vsel %vm1427_vm3, %v1012_v38, %v1555_v42 }
 0x11f   : > { %v1622_v48 = vmul.f32 0.2, %v3463_v44  ;;  %v1015_v49 = vpop.f32.mrf.mxu0  ;;  %v1271_v50 = vpop.f32.mrf.mxu1  ;;  %v1747_v62 = vsel %vm1491_vm6, %v1268_v39, %v1619_v47 }
 0x120   : > { %v1686_v51 = vsel %vm1430_vm4, %v3399_v43, %v1558_v45  ;;  %vm1428_vm7 = vcmp.gt.f32.partialorder %v1015_v49, 0.0  ;;  %v1556_v52 = vmul.f32 0.2, %v1015_v49  ;;  %vm1492_vm8 = vcmp.gt.f32.partialorder %v1271_v50, 0.0 }
 0x121   : > { %v2996_v54 = vpack.c.bf16 %v1686_v51, %v1685_v41  ;;  %v1750_v55 = vsel %vm1494_vm5, %v3463_v44, %v1622_v48  ;;  %v1620_v56 = vmul.f32 0.2, %v1271_v50  ;;  %v3402_v57 = vpop.f32.mrf.mxu0  ;;  %v3466_v58 = vpop.f32.mrf.mxu1 }
 0x122   : > { %v3156_v59 = vpack.c.bf16 %v1750_v55, %v1749_v46  ;;  %v1684_v60 = vsel %vm1428_vm7, %v1015_v49, %v1556_v52  ;;  %vm1433_vm9 = vcmp.gt.f32.partialorder %v3402_v57, 0.0  ;;  %v1561_v61 = vmul.f32 0.2, %v3402_v57 }
 0x123   : > { %3244 = vst [vmem:[%s3798_s26 + $0x88] sm:$0xff] %v2996_v54   ;;  %v2991_v63 = vpack.c.bf16 %v1684_v60, %v1683_v53  ;;  %v1748_v0 = vsel %vm1492_vm8, %v1271_v50, %v1620_v56  ;;  %v1625_v1 = vmul.f32 0.2, %v3466_v58  ;;  %v1028_v2 = vpop.f32.mrf.mxu0  ;;  %v1284_v3 = vpop.f32.mrf.mxu1  ;;  %vm1497_vm10 = vcmp.gt.f32.partialorder %v3466_v58, 0.0 }
 0x124   : > { %3276 = vst [vmem:[%s3798_s26 + $0x188] sm:$0xff] %v3156_v59   ;;  %v3151_v4 = vpack.c.bf16 %v1748_v0, %v1747_v62  ;;  %v1689_v5 = vsel %vm1433_vm9, %v3402_v57, %v1561_v61  ;;  %v1559_v6 = vmul.f32 0.2, %v1028_v2  ;;  %vm1431_vm11 = vcmp.gt.f32.partialorder %v1028_v2, 0.0 }
 0x125   : > { %3243 = vst [vmem:[%s3798_s26 + $0x80] sm:$0xff] %v2991_v63   ;;  %v3403_v7 = vpop.f32.mrf.mxu0  ;;  %v3467_v8 = vpop.f32.mrf.mxu1  ;;  %v1753_v10 = vsel %vm1497_vm10, %v3466_v58, %v1625_v1  ;;  %vm1495_vm14 = vcmp.gt.f32.partialorder %v1284_v3, 0.0  ;;  %v1623_v11 = vmul.f32 0.2, %v1284_v3 }
 0x126   : > { %3275 = vst [vmem:[%s3798_s26 + $0x180] sm:$0xff] %v3151_v4   ;;  %vm1434_vm12 = vcmp.gt.f32.partialorder %v3403_v7, 0.0  ;;  %v1562_v9 = vmul.f32 0.2, %v3403_v7  ;;  %vm1498_vm13 = vcmp.gt.f32.partialorder %v3467_v8, 0.0  ;;  %v1687_v17 = vsel %vm1431_vm11, %v1028_v2, %v1559_v6 }
 0x127   : > { %v1626_v12 = vmul.f32 0.2, %v3467_v8  ;;  %v1031_v13 = vpop.f32.mrf.mxu0  ;;  %v1287_v14 = vpop.f32.mrf.mxu1  ;;  %v1751_v26 = vsel %vm1495_vm14, %v1284_v3, %v1623_v11 }
 0x128   : > { %v1690_v15 = vsel %vm1434_vm12, %v3403_v7, %v1562_v9  ;;  %vm1432_vm15 = vcmp.gt.f32.partialorder %v1031_v13, 0.0  ;;  %v1560_v16 = vmul.f32 0.2, %v1031_v13  ;;  %vm1496_vm0 = vcmp.gt.f32.partialorder %v1287_v14, 0.0 }
 0x129   : > { %v3006_v18 = vpack.c.bf16 %v1690_v15, %v1689_v5  ;;  %v1754_v19 = vsel %vm1498_vm13, %v3467_v8, %v1626_v12  ;;  %v1624_v20 = vmul.f32 0.2, %v1287_v14  ;;  %v3406_v21 = vpop.f32.mrf.mxu0  ;;  %v3470_v22 = vpop.f32.mrf.mxu1 }
 0x12a   : > { %v3166_v23 = vpack.c.bf16 %v1754_v19, %v1753_v10  ;;  %v1688_v24 = vsel %vm1432_vm15, %v1031_v13, %v1560_v16  ;;  %vm1437_vm1 = vcmp.gt.f32.partialorder %v3406_v21, 0.0  ;;  %v1565_v25 = vmul.f32 0.2, %v3406_v21 }
 0x12b   : > { %3246 = vst [vmem:[%s3798_s26 + $0x98] sm:$0xff] %v3006_v18   ;;  %v3001_v27 = vpack.c.bf16 %v1688_v24, %v1687_v17  ;;  %v1752_v28 = vsel %vm1496_vm0, %v1287_v14, %v1624_v20  ;;  %v1629_v29 = vmul.f32 0.2, %v3470_v22  ;;  %v1044_v30 = vpop.f32.mrf.mxu0  ;;  %v1300_v31 = vpop.f32.mrf.mxu1  ;;  %vm1501_vm2 = vcmp.gt.f32.partialorder %v3470_v22, 0.0 }
 0x12c   : > { %3278 = vst [vmem:[%s3798_s26 + $0x198] sm:$0xff] %v3166_v23   ;;  %v3161_v32 = vpack.c.bf16 %v1752_v28, %v1751_v26  ;;  %v1693_v33 = vsel %vm1437_vm1, %v3406_v21, %v1565_v25  ;;  %v1563_v34 = vmul.f32 0.2, %v1044_v30  ;;  %vm1435_vm3 = vcmp.gt.f32.partialorder %v1044_v30, 0.0 }
 0x12d   : > { %3245 = vst [vmem:[%s3798_s26 + $0x90] sm:$0xff] %v3001_v27   ;;  %v3407_v35 = vpop.f32.mrf.mxu0  ;;  %v3471_v36 = vpop.f32.mrf.mxu1  ;;  %v1757_v38 = vsel %vm1501_vm2, %v3470_v22, %v1629_v29  ;;  %vm1499_vm6 = vcmp.gt.f32.partialorder %v1300_v31, 0.0  ;;  %v1627_v39 = vmul.f32 0.2, %v1300_v31 }
 0x12e   : > { %3277 = vst [vmem:[%s3798_s26 + $0x190] sm:$0xff] %v3161_v32   ;;  %vm1438_vm4 = vcmp.gt.f32.partialorder %v3407_v35, 0.0  ;;  %v1566_v37 = vmul.f32 0.2, %v3407_v35  ;;  %vm1502_vm5 = vcmp.gt.f32.partialorder %v3471_v36, 0.0  ;;  %v1691_v45 = vsel %vm1435_vm3, %v1044_v30, %v1563_v34 }
 0x12f   : > { %v1630_v40 = vmul.f32 0.2, %v3471_v36  ;;  %v1047_v41 = vpop.f32.mrf.mxu0  ;;  %v1303_v42 = vpop.f32.mrf.mxu1  ;;  %v1755_v54 = vsel %vm1499_vm6, %v1300_v31, %v1627_v39 }
 0x130   : > { %v1694_v43 = vsel %vm1438_vm4, %v3407_v35, %v1566_v37  ;;  %vm1436_vm7 = vcmp.gt.f32.partialorder %v1047_v41, 0.0  ;;  %v1564_v44 = vmul.f32 0.2, %v1047_v41  ;;  %vm1500_vm8 = vcmp.gt.f32.partialorder %v1303_v42, 0.0 }
 0x131   : > { %v3016_v46 = vpack.c.bf16 %v1694_v43, %v1693_v33  ;;  %v1758_v47 = vsel %vm1502_vm5, %v3471_v36, %v1630_v40  ;;  %v1628_v48 = vmul.f32 0.2, %v1303_v42  ;;  %v3410_v49 = vpop.f32.mrf.mxu0  ;;  %v3474_v50 = vpop.f32.mrf.mxu1 }
 0x132   : > { %v3176_v51 = vpack.c.bf16 %v1758_v47, %v1757_v38  ;;  %v1692_v52 = vsel %vm1436_vm7, %v1047_v41, %v1564_v44  ;;  %vm1441_vm9 = vcmp.gt.f32.partialorder %v3410_v49, 0.0  ;;  %v1569_v53 = vmul.f32 0.2, %v3410_v49 }
 0x133   : > { %3248 = vst [vmem:[%s3798_s26 + $0xa8] sm:$0xff] %v3016_v46   ;;  %v3011_v55 = vpack.c.bf16 %v1692_v52, %v1691_v45  ;;  %v1756_v56 = vsel %vm1500_vm8, %v1303_v42, %v1628_v48  ;;  %v1633_v57 = vmul.f32 0.2, %v3474_v50  ;;  %v1060_v58 = vpop.f32.mrf.mxu0  ;;  %v1316_v59 = vpop.f32.mrf.mxu1  ;;  %vm1505_vm10 = vcmp.gt.f32.partialorder %v3474_v50, 0.0 }
 0x134   : > { %3280 = vst [vmem:[%s3798_s26 + $0x1a8] sm:$0xff] %v3176_v51   ;;  %v3171_v60 = vpack.c.bf16 %v1756_v56, %v1755_v54  ;;  %v1697_v61 = vsel %vm1441_vm9, %v3410_v49, %v1569_v53  ;;  %v1567_v62 = vmul.f32 0.2, %v1060_v58  ;;  %vm1439_vm11 = vcmp.gt.f32.partialorder %v1060_v58, 0.0 }
 0x135   : > { %3247 = vst [vmem:[%s3798_s26 + $0xa0] sm:$0xff] %v3011_v55   ;;  %v3411_v63 = vpop.f32.mrf.mxu0  ;;  %v3475_v0 = vpop.f32.mrf.mxu1  ;;  %v1761_v2 = vsel %vm1505_vm10, %v3474_v50, %v1633_v57  ;;  %vm1503_vm14 = vcmp.gt.f32.partialorder %v1316_v59, 0.0  ;;  %v1631_v3 = vmul.f32 0.2, %v1316_v59 }
 0x136   : > { %3279 = vst [vmem:[%s3798_s26 + $0x1a0] sm:$0xff] %v3171_v60   ;;  %vm1442_vm12 = vcmp.gt.f32.partialorder %v3411_v63, 0.0  ;;  %v1570_v1 = vmul.f32 0.2, %v3411_v63  ;;  %vm1506_vm13 = vcmp.gt.f32.partialorder %v3475_v0, 0.0  ;;  %v1695_v9 = vsel %vm1439_vm11, %v1060_v58, %v1567_v62 }
 0x137   : > { %v1634_v4 = vmul.f32 0.2, %v3475_v0  ;;  %v1063_v5 = vpop.f32.mrf.mxu0  ;;  %v1319_v6 = vpop.f32.mrf.mxu1  ;;  %v1759_v18 = vsel %vm1503_vm14, %v1316_v59, %v1631_v3 }
 0x138   : > { %v1698_v7 = vsel %vm1442_vm12, %v3411_v63, %v1570_v1  ;;  %vm1440_vm15 = vcmp.gt.f32.partialorder %v1063_v5, 0.0  ;;  %v1568_v8 = vmul.f32 0.2, %v1063_v5  ;;  %vm1504_vm0 = vcmp.gt.f32.partialorder %v1319_v6, 0.0 }
 0x139   : > { %v3026_v10 = vpack.c.bf16 %v1698_v7, %v1697_v61  ;;  %v1762_v11 = vsel %vm1506_vm13, %v3475_v0, %v1634_v4  ;;  %v1632_v12 = vmul.f32 0.2, %v1319_v6  ;;  %v3414_v13 = vpop.f32.mrf.mxu0  ;;  %v3478_v14 = vpop.f32.mrf.mxu1 }
 0x13a   : > { %v3186_v15 = vpack.c.bf16 %v1762_v11, %v1761_v2  ;;  %v1696_v16 = vsel %vm1440_vm15, %v1063_v5, %v1568_v8  ;;  %vm1445_vm1 = vcmp.gt.f32.partialorder %v3414_v13, 0.0  ;;  %v1573_v17 = vmul.f32 0.2, %v3414_v13 }
 0x13b   : > { %3250 = vst [vmem:[%s3798_s26 + $0xb8] sm:$0xff] %v3026_v10   ;;  %v3021_v19 = vpack.c.bf16 %v1696_v16, %v1695_v9  ;;  %v1760_v20 = vsel %vm1504_vm0, %v1319_v6, %v1632_v12  ;;  %v1637_v21 = vmul.f32 0.2, %v3478_v14  ;;  %v1076_v22 = vpop.f32.mrf.mxu0  ;;  %v1332_v23 = vpop.f32.mrf.mxu1  ;;  %vm1509_vm2 = vcmp.gt.f32.partialorder %v3478_v14, 0.0 }
 0x13c   : > { %3282 = vst [vmem:[%s3798_s26 + $0x1b8] sm:$0xff] %v3186_v15   ;;  %v3181_v24 = vpack.c.bf16 %v1760_v20, %v1759_v18  ;;  %v1701_v25 = vsel %vm1445_vm1, %v3414_v13, %v1573_v17  ;;  %v1571_v26 = vmul.f32 0.2, %v1076_v22  ;;  %vm1443_vm3 = vcmp.gt.f32.partialorder %v1076_v22, 0.0 }
 0x13d   : > { %3249 = vst [vmem:[%s3798_s26 + $0xb0] sm:$0xff] %v3021_v19   ;;  %v3415_v27 = vpop.f32.mrf.mxu0  ;;  %v3479_v28 = vpop.f32.mrf.mxu1  ;;  %v1765_v30 = vsel %vm1509_vm2, %v3478_v14, %v1637_v21  ;;  %vm1507_vm6 = vcmp.gt.f32.partialorder %v1332_v23, 0.0  ;;  %v1635_v31 = vmul.f32 0.2, %v1332_v23 }
 0x13e   : > { %3281 = vst [vmem:[%s3798_s26 + $0x1b0] sm:$0xff] %v3181_v24   ;;  %vm1446_vm4 = vcmp.gt.f32.partialorder %v3415_v27, 0.0  ;;  %v1574_v29 = vmul.f32 0.2, %v3415_v27  ;;  %vm1510_vm5 = vcmp.gt.f32.partialorder %v3479_v28, 0.0  ;;  %v1699_v37 = vsel %vm1443_vm3, %v1076_v22, %v1571_v26 }
 0x13f   : > { %v1638_v32 = vmul.f32 0.2, %v3479_v28  ;;  %v1079_v33 = vpop.f32.mrf.mxu0  ;;  %v1335_v34 = vpop.f32.mrf.mxu1  ;;  %v1763_v46 = vsel %vm1507_vm6, %v1332_v23, %v1635_v31 }
 0x140   : > { %v1702_v35 = vsel %vm1446_vm4, %v3415_v27, %v1574_v29  ;;  %vm1444_vm7 = vcmp.gt.f32.partialorder %v1079_v33, 0.0  ;;  %v1572_v36 = vmul.f32 0.2, %v1079_v33  ;;  %vm1508_vm8 = vcmp.gt.f32.partialorder %v1335_v34, 0.0 }
 0x141   : > { %v3036_v38 = vpack.c.bf16 %v1702_v35, %v1701_v25  ;;  %v1766_v39 = vsel %vm1510_vm5, %v3479_v28, %v1638_v32  ;;  %v1636_v40 = vmul.f32 0.2, %v1335_v34  ;;  %v3418_v41 = vpop.f32.mrf.mxu0  ;;  %v3482_v42 = vpop.f32.mrf.mxu1 }
 0x142   : > { %v3196_v43 = vpack.c.bf16 %v1766_v39, %v1765_v30  ;;  %v1700_v44 = vsel %vm1444_vm7, %v1079_v33, %v1572_v36  ;;  %vm1449_vm9 = vcmp.gt.f32.partialorder %v3418_v41, 0.0  ;;  %v1577_v45 = vmul.f32 0.2, %v3418_v41 }
 0x143   : > { %3252 = vst [vmem:[%s3798_s26 + $0xc8] sm:$0xff] %v3036_v38   ;;  %v3031_v47 = vpack.c.bf16 %v1700_v44, %v1699_v37  ;;  %v1764_v48 = vsel %vm1508_vm8, %v1335_v34, %v1636_v40  ;;  %v1641_v49 = vmul.f32 0.2, %v3482_v42  ;;  %v1092_v50 = vpop.f32.mrf.mxu0  ;;  %v1348_v51 = vpop.f32.mrf.mxu1  ;;  %vm1513_vm10 = vcmp.gt.f32.partialorder %v3482_v42, 0.0 }
 0x144   : > { %3284 = vst [vmem:[%s3798_s26 + $0x1c8] sm:$0xff] %v3196_v43   ;;  %v3191_v52 = vpack.c.bf16 %v1764_v48, %v1763_v46  ;;  %v1705_v53 = vsel %vm1449_vm9, %v3418_v41, %v1577_v45  ;;  %v1575_v54 = vmul.f32 0.2, %v1092_v50  ;;  %vm1447_vm11 = vcmp.gt.f32.partialorder %v1092_v50, 0.0 }
 0x145   : > { %3251 = vst [vmem:[%s3798_s26 + $0xc0] sm:$0xff] %v3031_v47   ;;  %v3419_v55 = vpop.f32.mrf.mxu0  ;;  %v3483_v56 = vpop.f32.mrf.mxu1  ;;  %v1769_v58 = vsel %vm1513_vm10, %v3482_v42, %v1641_v49  ;;  %vm1511_vm14 = vcmp.gt.f32.partialorder %v1348_v51, 0.0  ;;  %v1639_v59 = vmul.f32 0.2, %v1348_v51 }
 0x146   : > { %3283 = vst [vmem:[%s3798_s26 + $0x1c0] sm:$0xff] %v3191_v52   ;;  %vm1450_vm12 = vcmp.gt.f32.partialorder %v3419_v55, 0.0  ;;  %v1578_v57 = vmul.f32 0.2, %v3419_v55  ;;  %vm1514_vm13 = vcmp.gt.f32.partialorder %v3483_v56, 0.0  ;;  %v1703_v1 = vsel %vm1447_vm11, %v1092_v50, %v1575_v54 }
 0x147   : > { %v1642_v60 = vmul.f32 0.2, %v3483_v56  ;;  %v1095_v61 = vpop.f32.mrf.mxu0  ;;  %v1351_v62 = vpop.f32.mrf.mxu1  ;;  %v1767_v10 = vsel %vm1511_vm14, %v1348_v51, %v1639_v59 }
 0x148   : > { %v1706_v63 = vsel %vm1450_vm12, %v3419_v55, %v1578_v57  ;;  %vm1448_vm15 = vcmp.gt.f32.partialorder %v1095_v61, 0.0  ;;  %v1576_v0 = vmul.f32 0.2, %v1095_v61  ;;  %vm1512_vm0 = vcmp.gt.f32.partialorder %v1351_v62, 0.0 }
 0x149   : > { %v3046_v2 = vpack.c.bf16 %v1706_v63, %v1705_v53  ;;  %v1770_v3 = vsel %vm1514_vm13, %v3483_v56, %v1642_v60  ;;  %v1640_v4 = vmul.f32 0.2, %v1351_v62  ;;  %v3422_v5 = vpop.f32.mrf.mxu0  ;;  %v3486_v6 = vpop.f32.mrf.mxu1 }
 0x14a   : > { %v3206_v7 = vpack.c.bf16 %v1770_v3, %v1769_v58  ;;  %v1704_v8 = vsel %vm1448_vm15, %v1095_v61, %v1576_v0  ;;  %vm1453_vm1 = vcmp.gt.f32.partialorder %v3422_v5, 0.0  ;;  %v1581_v9 = vmul.f32 0.2, %v3422_v5 }
 0x14b   : > { %3254 = vst [vmem:[%s3798_s26 + $0xd8] sm:$0xff] %v3046_v2   ;;  %v3041_v11 = vpack.c.bf16 %v1704_v8, %v1703_v1  ;;  %v1768_v12 = vsel %vm1512_vm0, %v1351_v62, %v1640_v4  ;;  %v1645_v13 = vmul.f32 0.2, %v3486_v6  ;;  %v1108_v14 = vpop.f32.mrf.mxu0  ;;  %v1364_v15 = vpop.f32.mrf.mxu1  ;;  %vm1517_vm2 = vcmp.gt.f32.partialorder %v3486_v6, 0.0 }
 0x14c   : > { %3286 = vst [vmem:[%s3798_s26 + $0x1d8] sm:$0xff] %v3206_v7   ;;  %v3201_v16 = vpack.c.bf16 %v1768_v12, %v1767_v10  ;;  %v1709_v17 = vsel %vm1453_vm1, %v3422_v5, %v1581_v9  ;;  %v1579_v18 = vmul.f32 0.2, %v1108_v14  ;;  %vm1451_vm3 = vcmp.gt.f32.partialorder %v1108_v14, 0.0 }
 0x14d   : > { %3253 = vst [vmem:[%s3798_s26 + $0xd0] sm:$0xff] %v3041_v11   ;;  %v3423_v19 = vpop.f32.mrf.mxu0  ;;  %v3487_v20 = vpop.f32.mrf.mxu1  ;;  %v1773_v22 = vsel %vm1517_vm2, %v3486_v6, %v1645_v13  ;;  %vm1515_vm6 = vcmp.gt.f32.partialorder %v1364_v15, 0.0  ;;  %v1643_v23 = vmul.f32 0.2, %v1364_v15 }
 0x14e   : > { %3285 = vst [vmem:[%s3798_s26 + $0x1d0] sm:$0xff] %v3201_v16   ;;  %vm1454_vm4 = vcmp.gt.f32.partialorder %v3423_v19, 0.0  ;;  %v1582_v21 = vmul.f32 0.2, %v3423_v19  ;;  %vm1518_vm5 = vcmp.gt.f32.partialorder %v3487_v20, 0.0  ;;  %v1707_v29 = vsel %vm1451_vm3, %v1108_v14, %v1579_v18 }
 0x14f   : > { %v1646_v24 = vmul.f32 0.2, %v3487_v20  ;;  %v1111_v25 = vpop.f32.mrf.mxu0  ;;  %v1367_v26 = vpop.f32.mrf.mxu1  ;;  %v1771_v38 = vsel %vm1515_vm6, %v1364_v15, %v1643_v23 }
 0x150   : > { %v1710_v27 = vsel %vm1454_vm4, %v3423_v19, %v1582_v21  ;;  %vm1452_vm7 = vcmp.gt.f32.partialorder %v1111_v25, 0.0  ;;  %v1580_v28 = vmul.f32 0.2, %v1111_v25  ;;  %vm1516_vm8 = vcmp.gt.f32.partialorder %v1367_v26, 0.0 }
 0x151   : > { %v3056_v30 = vpack.c.bf16 %v1710_v27, %v1709_v17  ;;  %v1774_v31 = vsel %vm1518_vm5, %v3487_v20, %v1646_v24  ;;  %v1644_v32 = vmul.f32 0.2, %v1367_v26  ;;  %v3426_v33 = vpop.f32.mrf.mxu0  ;;  %v3490_v34 = vpop.f32.mrf.mxu1 }
 0x152   : > { %v3216_v35 = vpack.c.bf16 %v1774_v31, %v1773_v22  ;;  %v1708_v36 = vsel %vm1452_vm7, %v1111_v25, %v1580_v28  ;;  %vm1457_vm9 = vcmp.gt.f32.partialorder %v3426_v33, 0.0  ;;  %v1585_v37 = vmul.f32 0.2, %v3426_v33 }
 0x153   : > { %3256 = vst [vmem:[%s3798_s26 + $0xe8] sm:$0xff] %v3056_v30   ;;  %v3051_v39 = vpack.c.bf16 %v1708_v36, %v1707_v29  ;;  %v1772_v40 = vsel %vm1516_vm8, %v1367_v26, %v1644_v32  ;;  %v1124_v41 = vpop.f32.mrf.mxu0  ;;  %v1380_v42 = vpop.f32.mrf.mxu1  ;;  %vm1521_vm10 = vcmp.gt.f32.partialorder %v3490_v34, 0.0  ;;  %v1649_v45 = vmul.f32 0.2, %v3490_v34 }
 0x154   : > { %3288 = vst [vmem:[%s3798_s26 + $0x1e8] sm:$0xff] %v3216_v35   ;;  %v3211_v43 = vpack.c.bf16 %v1772_v40, %v1771_v38  ;;  %v1713_v44 = vsel %vm1457_vm9, %v3426_v33, %v1585_v37  ;;  %v1583_v48 = vmul.f32 0.2, %v1124_v41  ;;  %vm1455_vm13 = vcmp.gt.f32.partialorder %v1124_v41, 0.0 }
 0x155   : > { %3255 = vst [vmem:[%s3798_s26 + $0xe0] sm:$0xff] %v3051_v39   ;;  %v3427_v46 = vpop.f32.mrf.mxu0  ;;  %v3491_v47 = vpop.f32.mrf.mxu1  ;;  %vm1519_vm14 = vcmp.gt.f32.partialorder %v1380_v42, 0.0  ;;  %v1647_v50 = vmul.f32 0.2, %v1380_v42  ;;  %v1777_v56 = vsel %vm1521_vm10, %v3490_v34, %v1649_v45 }
 0x156   : > { %3287 = vst [vmem:[%s3798_s26 + $0x1e0] sm:$0xff] %v3211_v43   ;;  %vm1458_vm11 = vcmp.gt.f32.partialorder %v3427_v46, 0.0  ;;  %v1586_v49 = vmul.f32 0.2, %v3427_v46  ;;  %vm1522_vm12 = vcmp.gt.f32.partialorder %v3491_v47, 0.0  ;;  %v1711_v60 = vsel %vm1455_vm13, %v1124_v41, %v1583_v48 }
 0x157   : > { %v1650_v51 = vmul.f32 0.2, %v3491_v47  ;;  %v1127_v52 = vpop.f32.mrf.mxu0  ;;  %v1383_v53 = vpop.f32.mrf.mxu1  ;;  %v1775_v63 = vsel %vm1519_vm14, %v1380_v42, %v1647_v50 }
 0x158   : > { %v1714_v54 = vsel %vm1458_vm11, %v3427_v46, %v1586_v49  ;;  %vm1456_vm15 = vcmp.gt.f32.partialorder %v1127_v52, 0.0  ;;  %v1584_v55 = vmul.f32 0.2, %v1127_v52  ;;  %vm1520_vm0 = vcmp.gt.f32.partialorder %v1383_v53, 0.0 }
 0x159   : > { %v3066_v57 = vpack.c.bf16 %v1714_v54, %v1713_v44  ;;  %v1778_v58 = vsel %vm1522_vm12, %v3491_v47, %v1650_v51  ;;  %v1648_v59 = vmul.f32 0.2, %v1383_v53 }
 0x15a   : > { %v3226_v61 = vpack.c.bf16 %v1778_v58, %v1777_v56  ;;  %v1712_v62 = vsel %vm1456_vm15, %v1127_v52, %v1584_v55 }
 0x15b   : > { %3258 = vst [vmem:[%s3798_s26 + $0xf8] sm:$0xff] %v3066_v57   ;;  %v3061_v0 = vpack.c.bf16 %v1712_v62, %v1711_v60  ;;  %v1776_v1 = vsel %vm1520_vm0, %v1383_v53, %v1648_v59 }
 0x15c   : > { %3290 = vst [vmem:[%s3798_s26 + $0x1f8] sm:$0xff] %v3226_v61   ;;  %v3221_v2 = vpack.c.bf16 %v1776_v1, %v1775_v63 }
 0x15d   : > { %3257 = vst [vmem:[%s3798_s26 + $0xf0] sm:$0xff] %v3061_v0  }
 0x15e   : > { %3289 = vst [vmem:[%s3798_s26 + $0x1f0] sm:$0xff] %v3221_v2  }
 0x15f PF: > { %s12_s11 = sadd.s32 1, %s3611_s11   ;;  %s3893_s9 = smov %s3607_s10 }
 0x160   : > { %p9_p5 = scmp.ge.s32.totalorder %s12_s11, 4   ;;  %s3894_s10 = smov %s3896_s12 }
 0x162   :  { %11 = sbr.rel (!%p9_p5) target bundleno = 2 (0x2), region = 61 }

// kernel: discriminator_forward.5
= control target key start
LH: loop header
LB: loop body
LE: loop exit
PB: predicated region body
PF: predicated region fallthrough
CT: control target
= control target key end

     0   :  { %s2180_s9 = smov 0   ;;  %s2182_s10 = smov 0   ;;  %s2400_s0 = inlined_call_operand.vmem [shape: bf16[512,512], index: 0, kind: input, shape index: {}]   ;;  %s2401_s1 = inlined_call_operand.vmem [shape: bf16[512,128], index: 1, kind: input, shape index: {}]   ;;  %s2402_s2 = inlined_call_operand.vmem [shape: bf16[512,128], index: 2, kind: output, shape index: {}]  }
   0x1   :  { %s2184_s11 = smov 0  }
   0x2 LB: > { %s24_s12 = sadd.s32 1, %s2159_s10  ;;  %p1501_p0 = scmp.ge.s32.totalorder %s2163_s11, 1  ;;  %s2163_s11 = sphi %s2184_s11, %s12_s11   ;;  %s2159_s10 = sphi %s2182_s10, %s2404_s10   ;;  %s2155_s9 = sphi %s2180_s9, %s2403_s9  }
   0x3   : > { %p26_p1 = scmp.ge.s32.totalorder %s24_s12, 2  ;;  %p137_p2 = scmp.lt.s32.totalorder %s2163_s11, 3 }
   0x5   : > { %s2406_s12 = smov (%p26_p1, %s24_s12), 0  ;;  %p138_p3 = pnand %p1501_p0, %p137_p2 }
   0x6   : > { %s1502_s21 = sshll.u32 (!%p138_p3), %s2155_s9, 5 }
   0x7   : > { %141 = sbr.rel (%p138_p3) target bundleno = 376 (0x178), region = 28  ;;  %p168_p4 = scmp.lt.s32.totalorder (!%p138_p3), %s1502_s21, 63 }
   0xc   : > { %v2013_v0 = vld [vmem:[%s2401_s1 + $0x78] sm:$0xff]   ;;  %v2017_v4 = vld [vmem:[%s2401_s1 + $0x70] sm:$0xff]   ;;  %v2021_v8 = vld [vmem:[%s2401_s1 + $0x68] sm:$0xff]   ;;  %s2408_s21 = smov (!%p168_p4, %s1502_s21), 63 }
   0xd   : > { %v2014_v1 = vld [vmem:[%s2401_s1 + $0xf8] sm:$0xff]   ;;  %1765 = vmatprep.subr.bf16.mxu0 %v2013_v0  ;;  %v2018_v5 = vld [vmem:[%s2401_s1 + $0xf0] sm:$0xff]   ;;  %v2022_v9 = vld [vmem:[%s2401_s1 + $0xe8] sm:$0xff]   ;;  %s1637_s19 = sshll.u32 %s2408_s21, 4  ;;  %s1506_s5 = sshll.u32 %s2408_s21, 2 }
   0xe   : > { %v2015_v2 = vld [vmem:[%s2401_s1 + $0x38] sm:$0xff]   ;;  %1877 = vmatprep.subr.bf16.mxu1 %v2014_v1  ;;  %v2019_v6 = vld [vmem:[%s2401_s1 + $0x30] sm:$0xff]   ;;  %v2023_v10 = vld [vmem:[%s2401_s1 + $0x28] sm:$0xff]   ;;  %s2297_s29 = scalar_lea.vmem %s2400_s0, %s1637_s19  ;;  %s2373_s8 = scalar_lea.vmem %s2402_s2, %s1506_s5 }
   0xf   : > { %v2016_v3 = vld [vmem:[%s2401_s1 + $0xb8] sm:$0xff]   ;;  %1766 = vmatpush3.bf16.msra.mxu0 %v2015_v2  ;;  %v2020_v7 = vld [vmem:[%s2401_s1 + $0xb0] sm:$0xff]   ;;  %v2024_v11 = vld [vmem:[%s2401_s1 + $0xa8] sm:$0xff]  }
  0x10   : > { %1878 = vmatpush3.bf16.msra.mxu1 %v2016_v3  ;;  %1767 = vmatprep.subr.bf16.mxu0 %v2017_v4  ;;  %v2025_v12 = vld [vmem:[%s2401_s1 + $0x60] sm:$0xff]   ;;  %v2029_v16 = vld [vmem:[%s2401_s1 + $0x58] sm:$0xff]   ;;  %v2033_v20 = vld [vmem:[%s2401_s1 + $0x50] sm:$0xff]  }
  0x11   : > { %1879 = vmatprep.subr.bf16.mxu1 %v2018_v5  ;;  %v2026_v13 = vld [vmem:[%s2401_s1 + $0xe0] sm:$0xff]   ;;  %v2030_v17 = vld [vmem:[%s2401_s1 + $0xd8] sm:$0xff]   ;;  %v2034_v21 = vld [vmem:[%s2401_s1 + $0xd0] sm:$0xff]  }
  0x12   : > { %v2027_v14 = vld [vmem:[%s2401_s1 + $0x20] sm:$0xff]   ;;  %v2031_v18 = vld [vmem:[%s2401_s1 + $0x18] sm:$0xff]   ;;  %v2035_v22 = vld [vmem:[%s2401_s1 + $0x10] sm:$0xff]  }
  0x13   : > { %1768 = vmatpush3.bf16.msra.mxu0 %v2019_v6  ;;  %v2028_v15 = vld [vmem:[%s2401_s1 + $0xa0] sm:$0xff]   ;;  %v2032_v19 = vld [vmem:[%s2401_s1 + $0x98] sm:$0xff]   ;;  %v2036_v23 = vld [vmem:[%s2401_s1 + $0x90] sm:$0xff]  }
  0x14   : > { %1880 = vmatpush3.bf16.msra.mxu1 %v2020_v7  ;;  %1769 = vmatprep.subr.bf16.mxu0 %v2021_v8  ;;  %v2037_v24 = vld [vmem:[%s2401_s1 + $0x48] sm:$0xff]   ;;  %v2041_v28 = vld [vmem:[%s2401_s1 + $0x40] sm:$0xff]  }
  0x15   : > { %1881 = vmatprep.subr.bf16.mxu1 %v2022_v9  ;;  %v2038_v25 = vld [vmem:[%s2401_s1 + $0xc8] sm:$0xff]   ;;  %v2042_v29 = vld [vmem:[%s2401_s1 + $0xc0] sm:$0xff]  }
  0x16   : > { %v2039_v26 = vld [vmem:[%s2401_s1 + $0x8] sm:$0xff]   ;;  %v2043_v30 = vld [vmem:[%s2401_s1] sm:$0xff]  }
  0x17   : > { %1770 = vmatpush3.bf16.msra.mxu0 %v2023_v10  ;;  %v2040_v27 = vld [vmem:[%s2401_s1 + $0x88] sm:$0xff]   ;;  %v2044_v31 = vld [vmem:[%s2401_s1 + $0x80] sm:$0xff]  }
  0x18   : > { %1882 = vmatpush3.bf16.msra.mxu1 %v2024_v11  ;;  %1771 = vmatprep.subr.bf16.mxu0 %v2025_v12  ;;  %v2045_v32 = vld [vmem:[%s2297_s29] ss:$16 sps:$4 sm:$0xff]   ;;  %v2047_v33 = vld [vmem:[%s2297_s29 + $0x4] ss:$16 sps:$4 sm:$0xff]   ;;  %v2048_v34 = vld [vmem:[%s2297_s29 + $0x8] ss:$16 sps:$4 sm:$0xff]  }
  0x19   : > { %1883 = vmatprep.subr.bf16.mxu1 %v2026_v13  ;;  %v2050_v35 = vld [vmem:[%s2297_s29 + $0xc] ss:$16 sps:$4 sm:$0xff]   ;;  %860 = vmatprep.mubr.bf16.mxu0 %v2047_v33  ;;  %v2051_v36 = vld [vmem:[%s2297_s29 + $0x24] ss:$16 sps:$4 sm:$0xff]   ;;  %v2055_v38 = vld [vmem:[%s2297_s29 + $0x20] ss:$16 sps:$4 sm:$0xff]  }
  0x1a   : > { %1021 = vmatprep.mubr.bf16.mxu1 %v2050_v35  ;;  %v2053_v37 = vld [vmem:[%s2297_s29 + $0x2c] ss:$16 sps:$4 sm:$0xff]   ;;  %v2056_v39 = vld [vmem:[%s2297_s29 + $0x28] ss:$16 sps:$4 sm:$0xff]   ;;  %v2057_v40 = vld [vmem:[%s2297_s29 + $0x44] ss:$16 sps:$4 sm:$0xff]  }
  0x1b   : > { %1772 = vmatpush3.bf16.msra.mxu0 %v2027_v14  ;;  %v2059_v41 = vld [vmem:[%s2297_s29 + $0x4c] ss:$16 sps:$4 sm:$0xff]   ;;  %v2061_v42 = vld [vmem:[%s2297_s29 + $0x40] ss:$16 sps:$4 sm:$0xff]   ;;  %v2062_v43 = vld [vmem:[%s2297_s29 + $0x48] ss:$16 sps:$4 sm:$0xff]  }
  0x1c   : > { %1884 = vmatpush3.bf16.msra.mxu1 %v2028_v15  ;;  %1773 = vmatprep.subr.bf16.mxu0 %v2029_v16  ;;  %v2063_v44 = vld [vmem:[%s2297_s29 + $0x64] ss:$16 sps:$4 sm:$0xff]   ;;  %v2065_v45 = vld [vmem:[%s2297_s29 + $0x6c] ss:$16 sps:$4 sm:$0xff]   ;;  %v2067_v46 = vld [vmem:[%s2297_s29 + $0x60] ss:$16 sps:$4 sm:$0xff]  }
  0x1d   : > { %1885 = vmatprep.subr.bf16.mxu1 %v2030_v17  ;;  %v2068_v47 = vld [vmem:[%s2297_s29 + $0x68] ss:$16 sps:$4 sm:$0xff]   ;;  %v2069_v48 = vld [vmem:[%s2297_s29 + $0x84] ss:$16 sps:$4 sm:$0xff]   ;;  %v2071_v49 = vld [vmem:[%s2297_s29 + $0x8c] ss:$16 sps:$4 sm:$0xff]  }
  0x1e   : > { %v2073_v50 = vld [vmem:[%s2297_s29 + $0x80] ss:$16 sps:$4 sm:$0xff]   ;;  %v2074_v51 = vld [vmem:[%s2297_s29 + $0x88] ss:$16 sps:$4 sm:$0xff]   ;;  %v2075_v52 = vld [vmem:[%s2297_s29 + $0xa4] ss:$16 sps:$4 sm:$0xff]  }
  0x1f   : > { %1774 = vmatpush3.bf16.msra.mxu0 %v2031_v18  ;;  %v2077_v53 = vld [vmem:[%s2297_s29 + $0xac] ss:$16 sps:$4 sm:$0xff]   ;;  %v2079_v54 = vld [vmem:[%s2297_s29 + $0xa0] ss:$16 sps:$4 sm:$0xff]   ;;  %v2080_v55 = vld [vmem:[%s2297_s29 + $0xa8] ss:$16 sps:$4 sm:$0xff]  }
  0x20   : > { %1886 = vmatpush3.bf16.msra.mxu1 %v2032_v19  ;;  %1775 = vmatprep.subr.bf16.mxu0 %v2033_v20  ;;  %v2081_v56 = vld [vmem:[%s2297_s29 + $0xc4] ss:$16 sps:$4 sm:$0xff]   ;;  %v2083_v57 = vld [vmem:[%s2297_s29 + $0xcc] ss:$16 sps:$4 sm:$0xff]   ;;  %v2085_v58 = vld [vmem:[%s2297_s29 + $0xc0] ss:$16 sps:$4 sm:$0xff]  }
  0x21   : > { %1887 = vmatprep.subr.bf16.mxu1 %v2034_v21  ;;  %v2086_v59 = vld [vmem:[%s2297_s29 + $0xc8] ss:$16 sps:$4 sm:$0xff]   ;;  %v2087_v60 = vld [vmem:[%s2297_s29 + $0xe4] ss:$16 sps:$4 sm:$0xff]   ;;  %v2089_v61 = vld [vmem:[%s2297_s29 + $0xec] ss:$16 sps:$4 sm:$0xff]  }
  0x22   : > { %v2091_v62 = vld [vmem:[%s2297_s29 + $0xe0] ss:$16 sps:$4 sm:$0xff]   ;;  %v2092_v63 = vld [vmem:[%s2297_s29 + $0xe8] ss:$16 sps:$4 sm:$0xff]   ;;  %v2093_v0 = vld [vmem:[%s2297_s29 + $0x104] ss:$16 sps:$4 sm:$0xff]  }
  0x23   : > { %1776 = vmatpush3.bf16.msra.mxu0 %v2035_v22  ;;  %v2095_v1 = vld [vmem:[%s2297_s29 + $0x10c] ss:$16 sps:$4 sm:$0xff]   ;;  %v2097_v2 = vld [vmem:[%s2297_s29 + $0x100] ss:$16 sps:$4 sm:$0xff]   ;;  %v2098_v3 = vld [vmem:[%s2297_s29 + $0x108] ss:$16 sps:$4 sm:$0xff]  }
  0x24   : > { %1888 = vmatpush3.bf16.msra.mxu1 %v2036_v23  ;;  %1777 = vmatprep.subr.bf16.mxu0 %v2037_v24  ;;  %v2099_v4 = vld [vmem:[%s2297_s29 + $0x124] ss:$16 sps:$4 sm:$0xff]   ;;  %v2101_v5 = vld [vmem:[%s2297_s29 + $0x12c] ss:$16 sps:$4 sm:$0xff]   ;;  %v2103_v6 = vld [vmem:[%s2297_s29 + $0x120] ss:$16 sps:$4 sm:$0xff]  }
  0x25   : > { %1889 = vmatprep.subr.bf16.mxu1 %v2038_v25  ;;  %v2104_v7 = vld [vmem:[%s2297_s29 + $0x128] ss:$16 sps:$4 sm:$0xff]   ;;  %v2105_v8 = vld [vmem:[%s2297_s29 + $0x144] ss:$16 sps:$4 sm:$0xff]   ;;  %v2107_v9 = vld [vmem:[%s2297_s29 + $0x14c] ss:$16 sps:$4 sm:$0xff]  }
  0x26   : > { %v2109_v10 = vld [vmem:[%s2297_s29 + $0x140] ss:$16 sps:$4 sm:$0xff]   ;;  %v2110_v11 = vld [vmem:[%s2297_s29 + $0x148] ss:$16 sps:$4 sm:$0xff]   ;;  %v2111_v12 = vld [vmem:[%s2297_s29 + $0x164] ss:$16 sps:$4 sm:$0xff]  }
  0x27   : > { %1778 = vmatpush3.bf16.msra.mxu0 %v2039_v26  ;;  %v2113_v13 = vld [vmem:[%s2297_s29 + $0x16c] ss:$16 sps:$4 sm:$0xff]   ;;  %v2115_v14 = vld [vmem:[%s2297_s29 + $0x160] ss:$16 sps:$4 sm:$0xff]   ;;  %v2116_v15 = vld [vmem:[%s2297_s29 + $0x168] ss:$16 sps:$4 sm:$0xff]  }
  0x28   : > { %1890 = vmatpush3.bf16.msra.mxu1 %v2040_v27  ;;  %1779 = vmatprep.subr.bf16.mxu0 %v2041_v28  ;;  %v2117_v16 = vld [vmem:[%s2297_s29 + $0x184] ss:$16 sps:$4 sm:$0xff]   ;;  %v2119_v17 = vld [vmem:[%s2297_s29 + $0x18c] ss:$16 sps:$4 sm:$0xff]   ;;  %v2121_v18 = vld [vmem:[%s2297_s29 + $0x180] ss:$16 sps:$4 sm:$0xff]  }
  0x29   : > { %1891 = vmatprep.subr.bf16.mxu1 %v2042_v29  ;;  %v2122_v19 = vld [vmem:[%s2297_s29 + $0x188] ss:$16 sps:$4 sm:$0xff]   ;;  %v2123_v20 = vld [vmem:[%s2297_s29 + $0x1a4] ss:$16 sps:$4 sm:$0xff]   ;;  %v2125_v21 = vld [vmem:[%s2297_s29 + $0x1ac] ss:$16 sps:$4 sm:$0xff]  }
  0x2a   : > { %v2127_v22 = vld [vmem:[%s2297_s29 + $0x1a0] ss:$16 sps:$4 sm:$0xff]   ;;  %v2128_v23 = vld [vmem:[%s2297_s29 + $0x1a8] ss:$16 sps:$4 sm:$0xff]   ;;  %v2129_v24 = vld [vmem:[%s2297_s29 + $0x1c4] ss:$16 sps:$4 sm:$0xff]  }
  0x2b   : > { %1780 = vmatpush3.bf16.msra.mxu0 %v2043_v30  ;;  %v2131_v25 = vld [vmem:[%s2297_s29 + $0x1cc] ss:$16 sps:$4 sm:$0xff]   ;;  %v2133_v26 = vld [vmem:[%s2297_s29 + $0x1c0] ss:$16 sps:$4 sm:$0xff]   ;;  %v2134_v27 = vld [vmem:[%s2297_s29 + $0x1c8] ss:$16 sps:$4 sm:$0xff]  }
  0x2c   : > { %1892 = vmatpush3.bf16.msra.mxu1 %v2044_v31  ;;  %v2135_v28 = vld [vmem:[%s2297_s29 + $0x1e4] ss:$16 sps:$4 sm:$0xff]   ;;  %v2137_v29 = vld [vmem:[%s2297_s29 + $0x1ec] ss:$16 sps:$4 sm:$0xff]   ;;  %v2139_v30 = vld [vmem:[%s2297_s29 + $0x1e0] ss:$16 sps:$4 sm:$0xff]  }
  0x2d   : > { %v2140_v31 = vld [vmem:[%s2297_s29 + $0x1e8] ss:$16 sps:$4 sm:$0xff]  }
  0x2e   : > { %861 = vmatmul.mubr.bf16.vlgmr.msra.gmra.mxu0 %v2045_v32 }
  0x2f   : > { %1022 = vmatmul.mubr.bf16.vlgmr.msra.gmra.mxu1 %v2048_v34  ;;  %868 = vmatprep.mubr.bf16.mxu0 %v2051_v36 }
  0x30   : > { %1029 = vmatprep.mubr.bf16.mxu1 %v2053_v37 }
  0x36   : > { %869 = vmatmul.mubr.bf16.gmra.mxu0 %v2055_v38 }
  0x37   : > { %1030 = vmatmul.mubr.bf16.gmra.mxu1 %v2056_v39  ;;  %876 = vmatprep.mubr.bf16.mxu0 %v2057_v40 }
  0x38   : > { %1037 = vmatprep.mubr.bf16.mxu1 %v2059_v41 }
  0x3e   : > { %877 = vmatmul.mubr.bf16.gmra.mxu0 %v2061_v42 }
  0x3f   : > { %1038 = vmatmul.mubr.bf16.gmra.mxu1 %v2062_v43  ;;  %884 = vmatprep.mubr.bf16.mxu0 %v2063_v44 }
  0x40   : > { %1045 = vmatprep.mubr.bf16.mxu1 %v2065_v45 }
  0x46   : > { %885 = vmatmul.mubr.bf16.gmra.mxu0 %v2067_v46 }
  0x47   : > { %1046 = vmatmul.mubr.bf16.gmra.mxu1 %v2068_v47  ;;  %892 = vmatprep.mubr.bf16.mxu0 %v2069_v48 }
  0x48   : > { %1053 = vmatprep.mubr.bf16.mxu1 %v2071_v49 }
  0x4e   : > { %893 = vmatmul.mubr.bf16.gmra.mxu0 %v2073_v50 }
  0x4f   : > { %1054 = vmatmul.mubr.bf16.gmra.mxu1 %v2074_v51  ;;  %900 = vmatprep.mubr.bf16.mxu0 %v2075_v52 }
  0x50   : > { %1061 = vmatprep.mubr.bf16.mxu1 %v2077_v53 }
  0x56   : > { %901 = vmatmul.mubr.bf16.gmra.mxu0 %v2079_v54 }
  0x57   : > { %1062 = vmatmul.mubr.bf16.gmra.mxu1 %v2080_v55  ;;  %908 = vmatprep.mubr.bf16.mxu0 %v2081_v56 }
  0x58   : > { %1069 = vmatprep.mubr.bf16.mxu1 %v2083_v57 }
  0x5e   : > { %909 = vmatmul.mubr.bf16.gmra.mxu0 %v2085_v58 }
  0x5f   : > { %1070 = vmatmul.mubr.bf16.gmra.mxu1 %v2086_v59  ;;  %916 = vmatprep.mubr.bf16.mxu0 %v2087_v60 }
  0x60   : > { %1077 = vmatprep.mubr.bf16.mxu1 %v2089_v61 }
  0x66   : > { %917 = vmatmul.mubr.bf16.gmra.mxu0 %v2091_v62 }
  0x67   : > { %1078 = vmatmul.mubr.bf16.gmra.mxu1 %v2092_v63  ;;  %924 = vmatprep.mubr.bf16.mxu0 %v2093_v0 }
  0x68   : > { %1085 = vmatprep.mubr.bf16.mxu1 %v2095_v1 }
  0x6e   : > { %925 = vmatmul.mubr.bf16.gmra.mxu0 %v2097_v2 }
  0x6f   : > { %1086 = vmatmul.mubr.bf16.gmra.mxu1 %v2098_v3  ;;  %932 = vmatprep.mubr.bf16.mxu0 %v2099_v4 }
  0x70   : > { %1093 = vmatprep.mubr.bf16.mxu1 %v2101_v5 }
  0x76   : > { %933 = vmatmul.mubr.bf16.gmra.mxu0 %v2103_v6 }
  0x77   : > { %1094 = vmatmul.mubr.bf16.gmra.mxu1 %v2104_v7  ;;  %940 = vmatprep.mubr.bf16.mxu0 %v2105_v8 }
  0x78   : > { %1101 = vmatprep.mubr.bf16.mxu1 %v2107_v9 }
  0x7e   : > { %941 = vmatmul.mubr.bf16.gmra.mxu0 %v2109_v10 }
  0x7f   : > { %1102 = vmatmul.mubr.bf16.gmra.mxu1 %v2110_v11  ;;  %948 = vmatprep.mubr.bf16.mxu0 %v2111_v12 }
  0x80   : > { %1109 = vmatprep.mubr.bf16.mxu1 %v2113_v13 }
  0x86   : > { %949 = vmatmul.mubr.bf16.gmra.mxu0 %v2115_v14 }
  0x87   : > { %1110 = vmatmul.mubr.bf16.gmra.mxu1 %v2116_v15  ;;  %956 = vmatprep.mubr.bf16.mxu0 %v2117_v16 }
  0x88   : > { %1117 = vmatprep.mubr.bf16.mxu1 %v2119_v17 }
  0x8e   : > { %957 = vmatmul.mubr.bf16.gmra.mxu0 %v2121_v18 }
  0x8f   : > { %1118 = vmatmul.mubr.bf16.gmra.mxu1 %v2122_v19  ;;  %964 = vmatprep.mubr.bf16.mxu0 %v2123_v20 }
  0x90   : > { %1125 = vmatprep.mubr.bf16.mxu1 %v2125_v21 }
  0x96   : > { %965 = vmatmul.mubr.bf16.gmra.mxu0 %v2127_v22 }
  0x97   : > { %1126 = vmatmul.mubr.bf16.gmra.mxu1 %v2128_v23  ;;  %972 = vmatprep.mubr.bf16.mxu0 %v2129_v24 }
  0x98   : > { %1133 = vmatprep.mubr.bf16.mxu1 %v2131_v25 }
  0x9e   : > { %973 = vmatmul.mubr.bf16.gmra.mxu0 %v2133_v26 }
  0x9f   : > { %1134 = vmatmul.mubr.bf16.gmra.mxu1 %v2134_v27  ;;  %980 = vmatprep.mubr.bf16.mxu0 %v2135_v28 }
  0xa0   : > { %1141 = vmatprep.mubr.bf16.mxu1 %v2137_v29 }
  0xa6   : > { %981 = vmatmul.mubr.bf16.gmra.mxu0 %v2139_v30 }
  0xa7   : > { %1142 = vmatmul.mubr.bf16.gmra.mxu1 %v2140_v31 }
  0xee   : > { %v1781_v32 = vpop.f32.mrf.mxu0 }
  0xef   : > { %v1893_v33 = vpop.f32.mrf.mxu1 }
  0xf0   : > { %v1782_v34 = vpop.f32.mrf.mxu0 }
  0xf1   : > { %v1783_v35 = vadd.f32 %v1782_v34, %v1781_v32  ;;  %v1894_v36 = vpop.f32.mrf.mxu1 }
  0xf2   : > { %v1895_v37 = vadd.f32 %v1894_v36, %v1893_v33  ;;  %v1784_v38 = vpop.f32.mrf.mxu0 }
  0xf3   : > { %v1896_v39 = vpop.f32.mrf.mxu1 }
  0xf4   : > { %v1024_v40 = vadd.f32 %v1895_v37, %v1783_v35  ;;  %v1785_v41 = vpop.f32.mrf.mxu0 }
  0xf5   : > { %v1786_v42 = vadd.f32 %v1785_v41, %v1784_v38  ;;  %v1897_v43 = vpop.f32.mrf.mxu1 }
  0xf6   : > { %v1898_v44 = vadd.f32 %v1897_v43, %v1896_v39  ;;  %v1787_v45 = vpop.f32.mrf.mxu0  ;;  %v1182_v47 = vmul.f32 0.2, %v1024_v40  ;;  %vm1150_vm0 = vcmp.gt.f32.partialorder %v1024_v40, 0.0 }
  0xf7   : > { %v1899_v46 = vpop.f32.mrf.mxu1 }
  0xf8   : > { %v1027_v48 = vadd.f32 %v1898_v44, %v1786_v42  ;;  %v1788_v49 = vpop.f32.mrf.mxu0  ;;  %v1214_v56 = vsel %vm1150_vm0, %v1024_v40, %v1182_v47 }
  0xf9   : > { %v1789_v50 = vadd.f32 %v1788_v49, %v1787_v45  ;;  %v1900_v51 = vpop.f32.mrf.mxu1 }
  0xfa   : > { %vm1151_vm1 = vcmp.gt.f32.partialorder %v1027_v48, 0.0  ;;  %v1183_v52 = vmul.f32 0.2, %v1027_v48  ;;  %v1901_v53 = vadd.f32 %v1900_v51, %v1899_v46  ;;  %v1790_v54 = vpop.f32.mrf.mxu0 }
  0xfb   : > { %v1902_v55 = vpop.f32.mrf.mxu1 }
  0xfc   : > { %v1215_v57 = vsel %vm1151_vm1, %v1027_v48, %v1183_v52  ;;  %v1032_v58 = vadd.f32 %v1901_v53, %v1789_v50  ;;  %v1791_v59 = vpop.f32.mrf.mxu0 }
  0xfd   : > { %v1673_v60 = vpack.c.bf16 %v1215_v57, %v1214_v56  ;;  %v1792_v61 = vadd.f32 %v1791_v59, %v1790_v54  ;;  %v1903_v62 = vpop.f32.mrf.mxu1 }
  0xfe   : > { %v1904_v63 = vadd.f32 %v1903_v62, %v1902_v55  ;;  %v1793_v0 = vpop.f32.mrf.mxu0  ;;  %v1184_v2 = vmul.f32 0.2, %v1032_v58  ;;  %vm1152_vm2 = vcmp.gt.f32.partialorder %v1032_v58, 0.0 }
  0xff   : > { %1674 = vst [vmem:[%s2373_s8] sm:$0xff] %v1673_v60   ;;  %v1905_v1 = vpop.f32.mrf.mxu1 }
 0x100   : > { %v1035_v3 = vadd.f32 %v1904_v63, %v1792_v61  ;;  %v1794_v4 = vpop.f32.mrf.mxu0  ;;  %v1216_v11 = vsel %vm1152_vm2, %v1032_v58, %v1184_v2 }
 0x101   : > { %v1795_v5 = vadd.f32 %v1794_v4, %v1793_v0  ;;  %v1906_v6 = vpop.f32.mrf.mxu1 }
 0x102   : > { %vm1153_vm3 = vcmp.gt.f32.partialorder %v1035_v3, 0.0  ;;  %v1185_v7 = vmul.f32 0.2, %v1035_v3  ;;  %v1907_v8 = vadd.f32 %v1906_v6, %v1905_v1  ;;  %v1796_v9 = vpop.f32.mrf.mxu0 }
 0x103   : > { %v1908_v10 = vpop.f32.mrf.mxu1 }
 0x104   : > { %v1217_v12 = vsel %vm1153_vm3, %v1035_v3, %v1185_v7  ;;  %v1040_v13 = vadd.f32 %v1907_v8, %v1795_v5  ;;  %v1797_v14 = vpop.f32.mrf.mxu0 }
 0x105   : > { %v1678_v15 = vpack.c.bf16 %v1217_v12, %v1216_v11  ;;  %v1798_v16 = vadd.f32 %v1797_v14, %v1796_v9  ;;  %v1909_v17 = vpop.f32.mrf.mxu1 }
 0x106   : > { %v1910_v18 = vadd.f32 %v1909_v17, %v1908_v10  ;;  %v1799_v19 = vpop.f32.mrf.mxu0  ;;  %v1186_v21 = vmul.f32 0.2, %v1040_v13  ;;  %vm1154_vm4 = vcmp.gt.f32.partialorder %v1040_v13, 0.0 }
 0x107   : > { %1750 = vst [vmem:[%s2373_s8 + $0x8] sm:$0xff] %v1678_v15   ;;  %v1911_v20 = vpop.f32.mrf.mxu1 }
 0x108   : > { %v1043_v22 = vadd.f32 %v1910_v18, %v1798_v16  ;;  %v1800_v23 = vpop.f32.mrf.mxu0  ;;  %v1218_v30 = vsel %vm1154_vm4, %v1040_v13, %v1186_v21 }
 0x109   : > { %v1801_v24 = vadd.f32 %v1800_v23, %v1799_v19  ;;  %v1912_v25 = vpop.f32.mrf.mxu1 }
 0x10a   : > { %vm1155_vm5 = vcmp.gt.f32.partialorder %v1043_v22, 0.0  ;;  %v1187_v26 = vmul.f32 0.2, %v1043_v22  ;;  %v1913_v27 = vadd.f32 %v1912_v25, %v1911_v20  ;;  %v1802_v28 = vpop.f32.mrf.mxu0 }
 0x10b   : > { %v1914_v29 = vpop.f32.mrf.mxu1 }
 0x10c   : > { %v1219_v31 = vsel %vm1155_vm5, %v1043_v22, %v1187_v26  ;;  %v1048_v32 = vadd.f32 %v1913_v27, %v1801_v24  ;;  %v1803_v33 = vpop.f32.mrf.mxu0 }
 0x10d   : > { %v1683_v34 = vpack.c.bf16 %v1219_v31, %v1218_v30  ;;  %v1804_v35 = vadd.f32 %v1803_v33, %v1802_v28  ;;  %v1915_v36 = vpop.f32.mrf.mxu1 }
 0x10e   : > { %v1916_v37 = vadd.f32 %v1915_v36, %v1914_v29  ;;  %v1805_v38 = vpop.f32.mrf.mxu0  ;;  %v1188_v40 = vmul.f32 0.2, %v1048_v32  ;;  %vm1156_vm6 = vcmp.gt.f32.partialorder %v1048_v32, 0.0 }
 0x10f   : > { %1751 = vst [vmem:[%s2373_s8 + $0x10] sm:$0xff] %v1683_v34   ;;  %v1917_v39 = vpop.f32.mrf.mxu1 }
 0x110   : > { %v1051_v41 = vadd.f32 %v1916_v37, %v1804_v35  ;;  %v1806_v42 = vpop.f32.mrf.mxu0  ;;  %v1220_v49 = vsel %vm1156_vm6, %v1048_v32, %v1188_v40 }
 0x111   : > { %v1807_v43 = vadd.f32 %v1806_v42, %v1805_v38  ;;  %v1918_v44 = vpop.f32.mrf.mxu1 }
 0x112   : > { %vm1157_vm7 = vcmp.gt.f32.partialorder %v1051_v41, 0.0  ;;  %v1189_v45 = vmul.f32 0.2, %v1051_v41  ;;  %v1919_v46 = vadd.f32 %v1918_v44, %v1917_v39  ;;  %v1808_v47 = vpop.f32.mrf.mxu0 }
 0x113   : > { %v1920_v48 = vpop.f32.mrf.mxu1 }
 0x114   : > { %v1221_v50 = vsel %vm1157_vm7, %v1051_v41, %v1189_v45  ;;  %v1056_v51 = vadd.f32 %v1919_v46, %v1807_v43  ;;  %v1809_v52 = vpop.f32.mrf.mxu0 }
 0x115   : > { %v1688_v53 = vpack.c.bf16 %v1221_v50, %v1220_v49  ;;  %v1810_v54 = vadd.f32 %v1809_v52, %v1808_v47  ;;  %v1921_v55 = vpop.f32.mrf.mxu1 }
 0x116   : > { %v1922_v56 = vadd.f32 %v1921_v55, %v1920_v48  ;;  %v1811_v57 = vpop.f32.mrf.mxu0  ;;  %v1190_v59 = vmul.f32 0.2, %v1056_v51  ;;  %vm1158_vm8 = vcmp.gt.f32.partialorder %v1056_v51, 0.0 }
 0x117   : > { %1752 = vst [vmem:[%s2373_s8 + $0x18] sm:$0xff] %v1688_v53   ;;  %v1923_v58 = vpop.f32.mrf.mxu1 }
 0x118   : > { %v1059_v60 = vadd.f32 %v1922_v56, %v1810_v54  ;;  %v1812_v61 = vpop.f32.mrf.mxu0  ;;  %v1222_v4 = vsel %vm1158_vm8, %v1056_v51, %v1190_v59 }
 0x119   : > { %v1813_v62 = vadd.f32 %v1812_v61, %v1811_v57  ;;  %v1924_v63 = vpop.f32.mrf.mxu1 }
 0x11a   : > { %vm1159_vm9 = vcmp.gt.f32.partialorder %v1059_v60, 0.0  ;;  %v1191_v0 = vmul.f32 0.2, %v1059_v60  ;;  %v1925_v1 = vadd.f32 %v1924_v63, %v1923_v58  ;;  %v1814_v2 = vpop.f32.mrf.mxu0 }
 0x11b   : > { %v1926_v3 = vpop.f32.mrf.mxu1 }
 0x11c   : > { %v1223_v5 = vsel %vm1159_vm9, %v1059_v60, %v1191_v0  ;;  %v1064_v6 = vadd.f32 %v1925_v1, %v1813_v62  ;;  %v1815_v7 = vpop.f32.mrf.mxu0 }
 0x11d   : > { %v1693_v8 = vpack.c.bf16 %v1223_v5, %v1222_v4  ;;  %v1816_v9 = vadd.f32 %v1815_v7, %v1814_v2  ;;  %v1927_v10 = vpop.f32.mrf.mxu1 }
 0x11e   : > { %v1928_v11 = vadd.f32 %v1927_v10, %v1926_v3  ;;  %v1817_v12 = vpop.f32.mrf.mxu0  ;;  %v1192_v14 = vmul.f32 0.2, %v1064_v6  ;;  %vm1160_vm10 = vcmp.gt.f32.partialorder %v1064_v6, 0.0 }
 0x11f   : > { %1753 = vst [vmem:[%s2373_s8 + $0x20] sm:$0xff] %v1693_v8   ;;  %v1929_v13 = vpop.f32.mrf.mxu1 }
 0x120   : > { %v1067_v15 = vadd.f32 %v1928_v11, %v1816_v9  ;;  %v1818_v16 = vpop.f32.mrf.mxu0  ;;  %v1224_v23 = vsel %vm1160_vm10, %v1064_v6, %v1192_v14 }
 0x121   : > { %v1819_v17 = vadd.f32 %v1818_v16, %v1817_v12  ;;  %v1930_v18 = vpop.f32.mrf.mxu1 }
 0x122   : > { %vm1161_vm11 = vcmp.gt.f32.partialorder %v1067_v15, 0.0  ;;  %v1193_v19 = vmul.f32 0.2, %v1067_v15  ;;  %v1931_v20 = vadd.f32 %v1930_v18, %v1929_v13  ;;  %v1820_v21 = vpop.f32.mrf.mxu0 }
 0x123   : > { %v1932_v22 = vpop.f32.mrf.mxu1 }
 0x124   : > { %v1225_v24 = vsel %vm1161_vm11, %v1067_v15, %v1193_v19  ;;  %v1072_v25 = vadd.f32 %v1931_v20, %v1819_v17  ;;  %v1821_v26 = vpop.f32.mrf.mxu0 }
 0x125   : > { %v1698_v27 = vpack.c.bf16 %v1225_v24, %v1224_v23  ;;  %v1822_v28 = vadd.f32 %v1821_v26, %v1820_v21  ;;  %v1933_v29 = vpop.f32.mrf.mxu1 }
 0x126   : > { %v1934_v30 = vadd.f32 %v1933_v29, %v1932_v22  ;;  %v1823_v31 = vpop.f32.mrf.mxu0  ;;  %v1194_v33 = vmul.f32 0.2, %v1072_v25  ;;  %vm1162_vm12 = vcmp.gt.f32.partialorder %v1072_v25, 0.0 }
 0x127   : > { %1754 = vst [vmem:[%s2373_s8 + $0x28] sm:$0xff] %v1698_v27   ;;  %v1935_v32 = vpop.f32.mrf.mxu1 }
 0x128   : > { %v1075_v34 = vadd.f32 %v1934_v30, %v1822_v28  ;;  %v1824_v35 = vpop.f32.mrf.mxu0  ;;  %v1226_v42 = vsel %vm1162_vm12, %v1072_v25, %v1194_v33 }
 0x129   : > { %v1825_v36 = vadd.f32 %v1824_v35, %v1823_v31  ;;  %v1936_v37 = vpop.f32.mrf.mxu1 }
 0x12a   : > { %vm1163_vm13 = vcmp.gt.f32.partialorder %v1075_v34, 0.0  ;;  %v1195_v38 = vmul.f32 0.2, %v1075_v34  ;;  %v1937_v39 = vadd.f32 %v1936_v37, %v1935_v32  ;;  %v1826_v40 = vpop.f32.mrf.mxu0 }
 0x12b   : > { %v1938_v41 = vpop.f32.mrf.mxu1 }
 0x12c   : > { %v1227_v43 = vsel %vm1163_vm13, %v1075_v34, %v1195_v38  ;;  %v1080_v44 = vadd.f32 %v1937_v39, %v1825_v36  ;;  %v1827_v45 = vpop.f32.mrf.mxu0 }
 0x12d   : > { %v1703_v46 = vpack.c.bf16 %v1227_v43, %v1226_v42  ;;  %v1828_v47 = vadd.f32 %v1827_v45, %v1826_v40  ;;  %v1939_v48 = vpop.f32.mrf.mxu1 }
 0x12e   : > { %v1940_v49 = vadd.f32 %v1939_v48, %v1938_v41  ;;  %v1829_v50 = vpop.f32.mrf.mxu0  ;;  %v1196_v52 = vmul.f32 0.2, %v1080_v44  ;;  %vm1164_vm14 = vcmp.gt.f32.partialorder %v1080_v44, 0.0 }
 0x12f   : > { %1755 = vst [vmem:[%s2373_s8 + $0x30] sm:$0xff] %v1703_v46   ;;  %v1941_v51 = vpop.f32.mrf.mxu1 }
 0x130   : > { %v1083_v53 = vadd.f32 %v1940_v49, %v1828_v47  ;;  %v1830_v54 = vpop.f32.mrf.mxu0  ;;  %v1228_v61 = vsel %vm1164_vm14, %v1080_v44, %v1196_v52 }
 0x131   : > { %v1831_v55 = vadd.f32 %v1830_v54, %v1829_v50  ;;  %v1942_v56 = vpop.f32.mrf.mxu1 }
 0x132   : > { %vm1165_vm15 = vcmp.gt.f32.partialorder %v1083_v53, 0.0  ;;  %v1197_v57 = vmul.f32 0.2, %v1083_v53  ;;  %v1943_v58 = vadd.f32 %v1942_v56, %v1941_v51  ;;  %v1832_v59 = vpop.f32.mrf.mxu0 }
 0x133   : > { %v1944_v60 = vpop.f32.mrf.mxu1 }
 0x134   : > { %v1229_v62 = vsel %vm1165_vm15, %v1083_v53, %v1197_v57  ;;  %v1088_v63 = vadd.f32 %v1943_v58, %v1831_v55  ;;  %v1833_v0 = vpop.f32.mrf.mxu0 }
 0x135   : > { %v1708_v1 = vpack.c.bf16 %v1229_v62, %v1228_v61  ;;  %v1834_v2 = vadd.f32 %v1833_v0, %v1832_v59  ;;  %v1945_v3 = vpop.f32.mrf.mxu1 }
 0x136   : > { %v1946_v4 = vadd.f32 %v1945_v3, %v1944_v60  ;;  %v1835_v5 = vpop.f32.mrf.mxu0  ;;  %v1198_v7 = vmul.f32 0.2, %v1088_v63  ;;  %vm1166_vm0 = vcmp.gt.f32.partialorder %v1088_v63, 0.0 }
 0x137   : > { %1756 = vst [vmem:[%s2373_s8 + $0x38] sm:$0xff] %v1708_v1   ;;  %v1947_v6 = vpop.f32.mrf.mxu1 }
 0x138   : > { %v1091_v8 = vadd.f32 %v1946_v4, %v1834_v2  ;;  %v1836_v9 = vpop.f32.mrf.mxu0  ;;  %v1230_v16 = vsel %vm1166_vm0, %v1088_v63, %v1198_v7 }
 0x139   : > { %v1837_v10 = vadd.f32 %v1836_v9, %v1835_v5  ;;  %v1948_v11 = vpop.f32.mrf.mxu1 }
 0x13a   : > { %vm1167_vm1 = vcmp.gt.f32.partialorder %v1091_v8, 0.0  ;;  %v1199_v12 = vmul.f32 0.2, %v1091_v8  ;;  %v1949_v13 = vadd.f32 %v1948_v11, %v1947_v6  ;;  %v1838_v14 = vpop.f32.mrf.mxu0 }
 0x13b   : > { %v1950_v15 = vpop.f32.mrf.mxu1 }
 0x13c   : > { %v1231_v17 = vsel %vm1167_vm1, %v1091_v8, %v1199_v12  ;;  %v1096_v18 = vadd.f32 %v1949_v13, %v1837_v10  ;;  %v1839_v19 = vpop.f32.mrf.mxu0 }
 0x13d   : > { %v1713_v20 = vpack.c.bf16 %v1231_v17, %v1230_v16  ;;  %v1840_v21 = vadd.f32 %v1839_v19, %v1838_v14  ;;  %v1951_v22 = vpop.f32.mrf.mxu1 }
 0x13e   : > { %v1952_v23 = vadd.f32 %v1951_v22, %v1950_v15  ;;  %v1841_v24 = vpop.f32.mrf.mxu0  ;;  %v1200_v26 = vmul.f32 0.2, %v1096_v18  ;;  %vm1168_vm2 = vcmp.gt.f32.partialorder %v1096_v18, 0.0 }
 0x13f   : > { %1757 = vst [vmem:[%s2373_s8 + $0x40] sm:$0xff] %v1713_v20   ;;  %v1953_v25 = vpop.f32.mrf.mxu1 }
 0x140   : > { %v1099_v27 = vadd.f32 %v1952_v23, %v1840_v21  ;;  %v1842_v28 = vpop.f32.mrf.mxu0  ;;  %v1232_v35 = vsel %vm1168_vm2, %v1096_v18, %v1200_v26 }
 0x141   : > { %v1843_v29 = vadd.f32 %v1842_v28, %v1841_v24  ;;  %v1954_v30 = vpop.f32.mrf.mxu1 }
 0x142   : > { %vm1169_vm3 = vcmp.gt.f32.partialorder %v1099_v27, 0.0  ;;  %v1201_v31 = vmul.f32 0.2, %v1099_v27  ;;  %v1955_v32 = vadd.f32 %v1954_v30, %v1953_v25  ;;  %v1844_v33 = vpop.f32.mrf.mxu0 }
 0x143   : > { %v1956_v34 = vpop.f32.mrf.mxu1 }
 0x144   : > { %v1233_v36 = vsel %vm1169_vm3, %v1099_v27, %v1201_v31  ;;  %v1104_v37 = vadd.f32 %v1955_v32, %v1843_v29  ;;  %v1845_v38 = vpop.f32.mrf.mxu0 }
 0x145   : > { %v1718_v39 = vpack.c.bf16 %v1233_v36, %v1232_v35  ;;  %v1846_v40 = vadd.f32 %v1845_v38, %v1844_v33  ;;  %v1957_v41 = vpop.f32.mrf.mxu1 }
 0x146   : > { %v1958_v42 = vadd.f32 %v1957_v41, %v1956_v34  ;;  %v1847_v43 = vpop.f32.mrf.mxu0  ;;  %v1202_v45 = vmul.f32 0.2, %v1104_v37  ;;  %vm1170_vm4 = vcmp.gt.f32.partialorder %v1104_v37, 0.0 }
 0x147   : > { %1758 = vst [vmem:[%s2373_s8 + $0x48] sm:$0xff] %v1718_v39   ;;  %v1959_v44 = vpop.f32.mrf.mxu1 }
 0x148   : > { %v1107_v46 = vadd.f32 %v1958_v42, %v1846_v40  ;;  %v1848_v47 = vpop.f32.mrf.mxu0  ;;  %v1234_v54 = vsel %vm1170_vm4, %v1104_v37, %v1202_v45 }
 0x149   : > { %v1849_v48 = vadd.f32 %v1848_v47, %v1847_v43  ;;  %v1960_v49 = vpop.f32.mrf.mxu1 }
 0x14a   : > { %vm1171_vm5 = vcmp.gt.f32.partialorder %v1107_v46, 0.0  ;;  %v1203_v50 = vmul.f32 0.2, %v1107_v46  ;;  %v1961_v51 = vadd.f32 %v1960_v49, %v1959_v44  ;;  %v1850_v52 = vpop.f32.mrf.mxu0 }
 0x14b   : > { %v1962_v53 = vpop.f32.mrf.mxu1 }
 0x14c   : > { %v1235_v55 = vsel %vm1171_vm5, %v1107_v46, %v1203_v50  ;;  %v1112_v56 = vadd.f32 %v1961_v51, %v1849_v48  ;;  %v1851_v57 = vpop.f32.mrf.mxu0 }
 0x14d   : > { %v1723_v58 = vpack.c.bf16 %v1235_v55, %v1234_v54  ;;  %v1852_v59 = vadd.f32 %v1851_v57, %v1850_v52  ;;  %v1963_v60 = vpop.f32.mrf.mxu1 }
 0x14e   : > { %v1964_v61 = vadd.f32 %v1963_v60, %v1962_v53  ;;  %v1853_v62 = vpop.f32.mrf.mxu0  ;;  %v1204_v0 = vmul.f32 0.2, %v1112_v56  ;;  %vm1172_vm6 = vcmp.gt.f32.partialorder %v1112_v56, 0.0 }
 0x14f   : > { %1759 = vst [vmem:[%s2373_s8 + $0x50] sm:$0xff] %v1723_v58   ;;  %v1965_v63 = vpop.f32.mrf.mxu1 }
 0x150   : > { %v1115_v1 = vadd.f32 %v1964_v61, %v1852_v59  ;;  %v1854_v2 = vpop.f32.mrf.mxu0  ;;  %v1236_v9 = vsel %vm1172_vm6, %v1112_v56, %v1204_v0 }
 0x151   : > { %v1855_v3 = vadd.f32 %v1854_v2, %v1853_v62  ;;  %v1966_v4 = vpop.f32.mrf.mxu1 }
 0x152   : > { %vm1173_vm7 = vcmp.gt.f32.partialorder %v1115_v1, 0.0  ;;  %v1205_v5 = vmul.f32 0.2, %v1115_v1  ;;  %v1967_v6 = vadd.f32 %v1966_v4, %v1965_v63  ;;  %v1856_v7 = vpop.f32.mrf.mxu0 }
 0x153   : > { %v1968_v8 = vpop.f32.mrf.mxu1 }
 0x154   : > { %v1237_v10 = vsel %vm1173_vm7, %v1115_v1, %v1205_v5  ;;  %v1120_v11 = vadd.f32 %v1967_v6, %v1855_v3  ;;  %v1857_v12 = vpop.f32.mrf.mxu0 }
 0x155   : > { %v1728_v13 = vpack.c.bf16 %v1237_v10, %v1236_v9  ;;  %v1858_v14 = vadd.f32 %v1857_v12, %v1856_v7  ;;  %v1969_v15 = vpop.f32.mrf.mxu1 }
 0x156   : > { %v1970_v16 = vadd.f32 %v1969_v15, %v1968_v8  ;;  %v1859_v17 = vpop.f32.mrf.mxu0  ;;  %v1206_v19 = vmul.f32 0.2, %v1120_v11  ;;  %vm1174_vm8 = vcmp.gt.f32.partialorder %v1120_v11, 0.0 }
 0x157   : > { %1760 = vst [vmem:[%s2373_s8 + $0x58] sm:$0xff] %v1728_v13   ;;  %v1971_v18 = vpop.f32.mrf.mxu1 }
 0x158   : > { %v1123_v20 = vadd.f32 %v1970_v16, %v1858_v14  ;;  %v1860_v21 = vpop.f32.mrf.mxu0  ;;  %v1238_v28 = vsel %vm1174_vm8, %v1120_v11, %v1206_v19 }
 0x159   : > { %v1861_v22 = vadd.f32 %v1860_v21, %v1859_v17  ;;  %v1972_v23 = vpop.f32.mrf.mxu1 }
 0x15a   : > { %vm1175_vm9 = vcmp.gt.f32.partialorder %v1123_v20, 0.0  ;;  %v1207_v24 = vmul.f32 0.2, %v1123_v20  ;;  %v1973_v25 = vadd.f32 %v1972_v23, %v1971_v18  ;;  %v1862_v26 = vpop.f32.mrf.mxu0 }
 0x15b   : > { %v1974_v27 = vpop.f32.mrf.mxu1 }
 0x15c   : > { %v1239_v29 = vsel %vm1175_vm9, %v1123_v20, %v1207_v24  ;;  %v1128_v30 = vadd.f32 %v1973_v25, %v1861_v22  ;;  %v1863_v31 = vpop.f32.mrf.mxu0 }
 0x15d   : > { %v1733_v32 = vpack.c.bf16 %v1239_v29, %v1238_v28  ;;  %v1864_v33 = vadd.f32 %v1863_v31, %v1862_v26  ;;  %v1975_v34 = vpop.f32.mrf.mxu1 }
 0x15e   : > { %v1976_v35 = vadd.f32 %v1975_v34, %v1974_v27  ;;  %v1865_v36 = vpop.f32.mrf.mxu0  ;;  %v1208_v38 = vmul.f32 0.2, %v1128_v30  ;;  %vm1176_vm10 = vcmp.gt.f32.partialorder %v1128_v30, 0.0 }
 0x15f   : > { %1761 = vst [vmem:[%s2373_s8 + $0x60] sm:$0xff] %v1733_v32   ;;  %v1977_v37 = vpop.f32.mrf.mxu1 }
 0x160   : > { %v1131_v39 = vadd.f32 %v1976_v35, %v1864_v33  ;;  %v1866_v40 = vpop.f32.mrf.mxu0  ;;  %v1240_v47 = vsel %vm1176_vm10, %v1128_v30, %v1208_v38 }
 0x161   : > { %v1867_v41 = vadd.f32 %v1866_v40, %v1865_v36  ;;  %v1978_v42 = vpop.f32.mrf.mxu1 }
 0x162   : > { %vm1177_vm11 = vcmp.gt.f32.partialorder %v1131_v39, 0.0  ;;  %v1209_v43 = vmul.f32 0.2, %v1131_v39  ;;  %v1979_v44 = vadd.f32 %v1978_v42, %v1977_v37  ;;  %v1868_v45 = vpop.f32.mrf.mxu0 }
 0x163   : > { %v1980_v46 = vpop.f32.mrf.mxu1 }
 0x164   : > { %v1241_v48 = vsel %vm1177_vm11, %v1131_v39, %v1209_v43  ;;  %v1136_v49 = vadd.f32 %v1979_v44, %v1867_v41  ;;  %v1869_v50 = vpop.f32.mrf.mxu0 }
 0x165   : > { %v1738_v51 = vpack.c.bf16 %v1241_v48, %v1240_v47  ;;  %v1870_v52 = vadd.f32 %v1869_v50, %v1868_v45  ;;  %v1981_v53 = vpop.f32.mrf.mxu1 }
 0x166   : > { %v1982_v54 = vadd.f32 %v1981_v53, %v1980_v46  ;;  %v1871_v55 = vpop.f32.mrf.mxu0  ;;  %v1210_v57 = vmul.f32 0.2, %v1136_v49  ;;  %vm1178_vm12 = vcmp.gt.f32.partialorder %v1136_v49, 0.0 }
 0x167   : > { %1762 = vst [vmem:[%s2373_s8 + $0x68] sm:$0xff] %v1738_v51   ;;  %v1983_v56 = vpop.f32.mrf.mxu1 }
 0x168   : > { %v1139_v58 = vadd.f32 %v1982_v54, %v1870_v52  ;;  %v1872_v59 = vpop.f32.mrf.mxu0  ;;  %v1242_v2 = vsel %vm1178_vm12, %v1136_v49, %v1210_v57 }
 0x169   : > { %v1873_v60 = vadd.f32 %v1872_v59, %v1871_v55  ;;  %v1984_v61 = vpop.f32.mrf.mxu1 }
 0x16a   : > { %vm1179_vm13 = vcmp.gt.f32.partialorder %v1139_v58, 0.0  ;;  %v1211_v62 = vmul.f32 0.2, %v1139_v58  ;;  %v1985_v63 = vadd.f32 %v1984_v61, %v1983_v56  ;;  %v1874_v0 = vpop.f32.mrf.mxu0 }
 0x16b   : > { %v1986_v1 = vpop.f32.mrf.mxu1 }
 0x16c   : > { %v1243_v3 = vsel %vm1179_vm13, %v1139_v58, %v1211_v62  ;;  %v1144_v4 = vadd.f32 %v1985_v63, %v1873_v60  ;;  %v1875_v5 = vpop.f32.mrf.mxu0 }
 0x16d   : > { %v1743_v6 = vpack.c.bf16 %v1243_v3, %v1242_v2  ;;  %v1876_v7 = vadd.f32 %v1875_v5, %v1874_v0  ;;  %v1987_v8 = vpop.f32.mrf.mxu1 }
 0x16e   : > { %v1988_v9 = vadd.f32 %v1987_v8, %v1986_v1  ;;  %v1212_v10 = vmul.f32 0.2, %v1144_v4  ;;  %vm1180_vm14 = vcmp.gt.f32.partialorder %v1144_v4, 0.0 }
 0x16f   : > { %1763 = vst [vmem:[%s2373_s8 + $0x70] sm:$0xff] %v1743_v6  }
 0x170   : > { %v1147_v11 = vadd.f32 %v1988_v9, %v1876_v7  ;;  %v1244_v13 = vsel %vm1180_vm14, %v1144_v4, %v1212_v10 }
 0x172   : > { %vm1181_vm15 = vcmp.gt.f32.partialorder %v1147_v11, 0.0  ;;  %v1213_v12 = vmul.f32 0.2, %v1147_v11 }
 0x174   : > { %v1245_v14 = vsel %vm1181_vm15, %v1147_v11, %v1213_v12 }
 0x175   : > { %v1748_v15 = vpack.c.bf16 %v1245_v14, %v1244_v13 }
 0x177   : > { %1764 = vst [vmem:[%s2373_s8 + $0x78] sm:$0xff] %v1748_v15  }
 0x178 PF: > { %s12_s11 = sadd.s32 1, %s2163_s11   ;;  %s2403_s9 = smov %s2159_s10 }
 0x179   : > { %p9_p5 = scmp.ge.s32.totalorder %s12_s11, 4   ;;  %s2404_s10 = smov %s2406_s12 }
 0x17b   :  { %11 = sbr.rel (!%p9_p5) target bundleno = 2 (0x2), region = 61 }

// kernel: discriminator_forward.6
= control target key start
LH: loop header
LB: loop body
LE: loop exit
PB: predicated region body
PF: predicated region fallthrough
CT: control target
= control target key end

     0   :  { %s2702_s1 = inlined_call_operand.vmem [shape: bf16[1024,128], index: 1, kind: input, shape index: {}]   ;;  %s2703_s0 = inlined_call_operand.vmem [shape: bf16[128,1024], index: 0, kind: input, shape index: {}]   ;;  %s2704_s2 = inlined_call_operand.vmem [shape: f32[1,128], index: 2, kind: input, shape index: {}]   ;;  %s2705_s3 = inlined_call_operand.vmem [shape: f32[1,128], index: 3, kind: input, shape index: {}]   ;;  %s2706_s4 = inlined_call_operand.vmem [shape: bf16[128,128], index: 4, kind: output, shape index: {}]  }
   0x1   :  { %v2025_v0 = vld [vmem:[%s2702_s1 + $0x78] sm:$0xff]   ;;  %v2029_v4 = vld [vmem:[%s2702_s1 + $0x70] sm:$0xff]   ;;  %v2033_v8 = vld [vmem:[%s2702_s1 + $0x68] sm:$0xff]  }
   0x2   :  { %v2026_v1 = vld [vmem:[%s2702_s1 + $0xf8] sm:$0xff]   ;;  %1769 = vmatprep.subr.bf16.mxu0 %v2025_v0  ;;  %v2030_v5 = vld [vmem:[%s2702_s1 + $0xf0] sm:$0xff]   ;;  %v2034_v9 = vld [vmem:[%s2702_s1 + $0xe8] sm:$0xff]  }
   0x3   :  { %v2027_v2 = vld [vmem:[%s2702_s1 + $0x38] sm:$0xff]   ;;  %1833 = vmatprep.subr.bf16.mxu1 %v2026_v1  ;;  %v2031_v6 = vld [vmem:[%s2702_s1 + $0x30] sm:$0xff]   ;;  %v2035_v10 = vld [vmem:[%s2702_s1 + $0x28] sm:$0xff]  }
   0x4   :  { %v2028_v3 = vld [vmem:[%s2702_s1 + $0xb8] sm:$0xff]   ;;  %1770 = vmatpush3.bf16.msra.mxu0 %v2027_v2  ;;  %v2032_v7 = vld [vmem:[%s2702_s1 + $0xb0] sm:$0xff]   ;;  %v2036_v11 = vld [vmem:[%s2702_s1 + $0xa8] sm:$0xff]  }
   0x5   :  { %1834 = vmatpush3.bf16.msra.mxu1 %v2028_v3  ;;  %1771 = vmatprep.subr.bf16.mxu0 %v2029_v4  ;;  %v2037_v12 = vld [vmem:[%s2702_s1 + $0x60] sm:$0xff]   ;;  %v2041_v16 = vld [vmem:[%s2702_s1 + $0x58] sm:$0xff]   ;;  %v2045_v20 = vld [vmem:[%s2702_s1 + $0x50] sm:$0xff]  }
   0x6   :  { %1835 = vmatprep.subr.bf16.mxu1 %v2030_v5  ;;  %v2038_v13 = vld [vmem:[%s2702_s1 + $0xe0] sm:$0xff]   ;;  %v2042_v17 = vld [vmem:[%s2702_s1 + $0xd8] sm:$0xff]   ;;  %v2046_v21 = vld [vmem:[%s2702_s1 + $0xd0] sm:$0xff]  }
   0x7   :  { %v2039_v14 = vld [vmem:[%s2702_s1 + $0x20] sm:$0xff]   ;;  %v2043_v18 = vld [vmem:[%s2702_s1 + $0x18] sm:$0xff]   ;;  %v2047_v22 = vld [vmem:[%s2702_s1 + $0x10] sm:$0xff]  }
   0x8   :  { %1772 = vmatpush3.bf16.msra.mxu0 %v2031_v6  ;;  %v2040_v15 = vld [vmem:[%s2702_s1 + $0xa0] sm:$0xff]   ;;  %v2044_v19 = vld [vmem:[%s2702_s1 + $0x98] sm:$0xff]   ;;  %v2048_v23 = vld [vmem:[%s2702_s1 + $0x90] sm:$0xff]  }
   0x9   :  { %1836 = vmatpush3.bf16.msra.mxu1 %v2032_v7  ;;  %1773 = vmatprep.subr.bf16.mxu0 %v2033_v8  ;;  %v2049_v24 = vld [vmem:[%s2702_s1 + $0x48] sm:$0xff]   ;;  %v2053_v28 = vld [vmem:[%s2702_s1 + $0x40] sm:$0xff]   ;;  %v2057_v40 = vld [vmem:[%s2702_s1 + $0x178] sm:$0xff]  }
   0xa   :  { %1837 = vmatprep.subr.bf16.mxu1 %v2034_v9  ;;  %v2050_v25 = vld [vmem:[%s2702_s1 + $0xc8] sm:$0xff]   ;;  %v2054_v29 = vld [vmem:[%s2702_s1 + $0xc0] sm:$0xff]   ;;  %v2058_v41 = vld [vmem:[%s2702_s1 + $0x138] sm:$0xff]  }
   0xb   :  { %v2051_v26 = vld [vmem:[%s2702_s1 + $0x8] sm:$0xff]   ;;  %v2055_v30 = vld [vmem:[%s2702_s1] sm:$0xff]   ;;  %v2059_v42 = vld [vmem:[%s2702_s1 + $0x1f8] sm:$0xff]  }
   0xc   :  { %1774 = vmatpush3.bf16.msra.mxu0 %v2035_v10  ;;  %v2052_v27 = vld [vmem:[%s2702_s1 + $0x88] sm:$0xff]   ;;  %v2056_v31 = vld [vmem:[%s2702_s1 + $0x80] sm:$0xff]   ;;  %v2060_v43 = vld [vmem:[%s2702_s1 + $0x1b8] sm:$0xff]  }
   0xd   :  { %1838 = vmatpush3.bf16.msra.mxu1 %v2036_v11  ;;  %1775 = vmatprep.subr.bf16.mxu0 %v2037_v12  ;;  %v18_v32 = vld [vmem:[%s2703_s0] sm:$0xff]  ;;  %v19_v34 = vld [vmem:[%s2703_s0 + $0x8] sm:$0xff]  ;;  %v2061_v50 = vld [vmem:[%s2702_s1 + $0x170] sm:$0xff]  }
   0xe   :  { %1839 = vmatprep.subr.bf16.mxu1 %v2038_v13  ;;  %v22_v33 = vld [vmem:[%s2703_s0 + $0x20] sm:$0xff]  ;;  %v23_v37 = vld [vmem:[%s2703_s0 + $0x28] sm:$0xff]  ;;  %v2062_v52 = vld [vmem:[%s2702_s1 + $0x130] sm:$0xff]  }
   0xf   :  { %v1562_v35 = vcombine.low %v18_v32, %v22_v33  ;;  %v1563_v36 = vcombine.high %v18_v32, %v22_v33  ;;  %v1564_v38 = vcombine.low %v19_v34, %v23_v37  ;;  %v1565_v39 = vcombine.high %v19_v34, %v23_v37  ;;  %v26_v44 = vld [vmem:[%s2703_s0 + $0x40] sm:$0xff]  ;;  %v27_v47 = vld [vmem:[%s2703_s0 + $0x48] sm:$0xff]  ;;  %v2063_v54 = vld [vmem:[%s2702_s1 + $0x1f0] sm:$0xff]  }
  0x10   :  { %1776 = vmatpush3.bf16.msra.mxu0 %v2039_v14  ;;  %v30_v45 = vld [vmem:[%s2703_s0 + $0x60] sm:$0xff]  ;;  %v31_v48 = vld [vmem:[%s2703_s0 + $0x68] sm:$0xff]  ;;  %v2064_v55 = vld [vmem:[%s2702_s1 + $0x1b0] sm:$0xff]  }
  0x11   :  { %1840 = vmatpush3.bf16.msra.mxu1 %v2040_v15  ;;  %1777 = vmatprep.subr.bf16.mxu0 %v2041_v16  ;;  %v1571_v46 = vcombine.high %v26_v44, %v30_v45  ;;  %v1573_v49 = vcombine.high %v27_v47, %v31_v48  ;;  %v1570_v51 = vcombine.low %v26_v44, %v30_v45  ;;  %v34_v56 = vld [vmem:[%s2703_s0 + $0x80] sm:$0xff]  ;;  %v35_v58 = vld [vmem:[%s2703_s0 + $0x88] sm:$0xff]  ;;  %v2079_v32 = vld [vmem:[%s2702_s1 + $0x1d0] sm:$0xff]  }
  0x12   :  { %1841 = vmatprep.subr.bf16.mxu1 %v2042_v17  ;;  %946 = vmatprep.mubr.bf16.mxu0 %v1563_v36  ;;  %v1572_v53 = vcombine.low %v27_v47, %v31_v48  ;;  %v38_v57 = vld [vmem:[%s2703_s0 + $0xa0] sm:$0xff]  ;;  %v39_v59 = vld [vmem:[%s2703_s0 + $0xa8] sm:$0xff]  ;;  %v2080_v33 = vld [vmem:[%s2702_s1 + $0x190] sm:$0xff]  }
  0x13   :  { %1043 = vmatprep.mubr.bf16.mxu1 %v1565_v39  ;;  %v1579_v60 = vcombine.high %v34_v56, %v38_v57  ;;  %v1581_v61 = vcombine.high %v35_v58, %v39_v59  ;;  %v2065_v62 = vld [vmem:[%s2702_s1 + $0x168] sm:$0xff]   ;;  %v1578_v2 = vcombine.low %v34_v56, %v38_v57  ;;  %v42_v3 = vld [vmem:[%s2703_s0 + $0xc0] sm:$0xff]  ;;  %v1580_v6 = vcombine.low %v35_v58, %v39_v59 }
  0x14   :  { %1778 = vmatpush3.bf16.msra.mxu0 %v2043_v18  ;;  %v2066_v63 = vld [vmem:[%s2702_s1 + $0x128] sm:$0xff]   ;;  %v46_v4 = vld [vmem:[%s2703_s0 + $0xe0] sm:$0xff]  ;;  %v2073_v18 = vld [vmem:[%s2702_s1 + $0x158] sm:$0xff]  }
  0x15   :  { %1842 = vmatpush3.bf16.msra.mxu1 %v2044_v19  ;;  %1779 = vmatprep.subr.bf16.mxu0 %v2045_v20  ;;  %v2067_v0 = vld [vmem:[%s2702_s1 + $0x1e8] sm:$0xff]   ;;  %v1587_v7 = vcombine.high %v42_v3, %v46_v4  ;;  %v2069_v10 = vld [vmem:[%s2702_s1 + $0x160] sm:$0xff]   ;;  %v1586_v19 = vcombine.low %v42_v3, %v46_v4  ;;  %v2074_v20 = vld [vmem:[%s2702_s1 + $0x118] sm:$0xff]  }
  0x16   :  { %1843 = vmatprep.subr.bf16.mxu1 %v2046_v21  ;;  %v2068_v1 = vld [vmem:[%s2702_s1 + $0x1a8] sm:$0xff]   ;;  %v2070_v11 = vld [vmem:[%s2702_s1 + $0x120] sm:$0xff]  }
  0x17   :  { %v43_v5 = vld [vmem:[%s2703_s0 + $0xc8] sm:$0xff]  ;;  %v2071_v12 = vld [vmem:[%s2702_s1 + $0x1e0] sm:$0xff]  }
  0x18   :  { %1780 = vmatpush3.bf16.msra.mxu0 %v2047_v22  ;;  %v47_v8 = vld [vmem:[%s2703_s0 + $0xe8] sm:$0xff]  ;;  %v2072_v13 = vld [vmem:[%s2702_s1 + $0x1a0] sm:$0xff]  }
  0x19   :  { %1844 = vmatpush3.bf16.msra.mxu1 %v2048_v23  ;;  %1781 = vmatprep.subr.bf16.mxu0 %v2049_v24  ;;  %v1589_v9 = vcombine.high %v43_v5, %v47_v8  ;;  %v50_v14 = vld [vmem:[%s2703_s0 + $0x100] sm:$0xff]  ;;  %v51_v16 = vld [vmem:[%s2703_s0 + $0x108] sm:$0xff]  ;;  %v1588_v21 = vcombine.low %v43_v5, %v47_v8  ;;  %v2075_v23 = vld [vmem:[%s2702_s1 + $0x1d8] sm:$0xff]  }
  0x1a   :  { %1845 = vmatprep.subr.bf16.mxu1 %v2050_v25  ;;  %v54_v15 = vld [vmem:[%s2703_s0 + $0x120] sm:$0xff]  ;;  %v55_v17 = vld [vmem:[%s2703_s0 + $0x128] sm:$0xff]  ;;  %v2076_v25 = vld [vmem:[%s2702_s1 + $0x198] sm:$0xff]  }
  0x1b   :  { %v1595_v22 = vcombine.high %v50_v14, %v54_v15  ;;  %v1597_v24 = vcombine.high %v51_v16, %v55_v17  ;;  %v1594_v34 = vcombine.low %v50_v14, %v54_v15  ;;  %v2082_v39 = vld [vmem:[%s2702_s1 + $0x108] sm:$0xff]   ;;  %v2086_v48 = vld [vmem:[%s2702_s1 + $0x100] sm:$0xff]   ;;  %v29_v8 = vld [vmem:[%s2703_s0 + $0x58] sm:$0xff] }
  0x1c   :  { %1782 = vmatpush3.bf16.msra.mxu0 %v2051_v26  ;;  %v58_v26 = vld [vmem:[%s2703_s0 + $0x140] sm:$0xff]  ;;  %v67_v44 = vld [vmem:[%s2703_s0 + $0x188] sm:$0xff]  ;;  %v36_v14 = vld [vmem:[%s2703_s0 + $0x90] sm:$0xff] }
  0x1d   :  { %1846 = vmatpush3.bf16.msra.mxu1 %v2052_v27  ;;  %1783 = vmatprep.subr.bf16.mxu0 %v2053_v28  ;;  %v62_v27 = vld [vmem:[%s2703_s0 + $0x160] sm:$0xff]  ;;  %v2077_v28 = vld [vmem:[%s2702_s1 + $0x150] sm:$0xff]   ;;  %v71_v45 = vld [vmem:[%s2703_s0 + $0x1a8] sm:$0xff] }
  0x1e   :  { %1847 = vmatprep.subr.bf16.mxu1 %v2054_v29  ;;  %v59_v29 = vld [vmem:[%s2703_s0 + $0x148] sm:$0xff]  ;;  %v1603_v36 = vcombine.high %v58_v26, %v62_v27  ;;  %v1602_v47 = vcombine.low %v58_v26, %v62_v27  ;;  %v1612_v59 = vcombine.low %v67_v44, %v71_v45  ;;  %v40_v15 = vld [vmem:[%s2703_s0 + $0xb0] sm:$0xff] }
  0x1f   :  { %v75_v56 = vld [vmem:[%s2703_s0 + $0x1c8] sm:$0xff]  ;;  %v1582_v26 = vcombine.low %v36_v14, %v40_v15 }
  0x20   :  { %1784 = vmatpush3.bf16.msra.mxu0 %v2055_v30  ;;  %v63_v30 = vld [vmem:[%s2703_s0 + $0x168] sm:$0xff] }
  0x21   :  { %1848 = vmatpush3.bf16.msra.mxu1 %v2056_v31  ;;  %1897 = vmatprep.subr.bf16.mxu0 %v2057_v40  ;;  %v2078_v31 = vld [vmem:[%s2702_s1 + $0x110] sm:$0xff]   ;;  %v1605_v37 = vcombine.high %v59_v29, %v63_v30  ;;  %v2083_v40 = vld [vmem:[%s2702_s1 + $0x1c8] sm:$0xff]  }
  0x22   :  { %1961 = vmatprep.subr.bf16.mxu1 %v2059_v42  ;;  %v70_v42 = vld [vmem:[%s2703_s0 + $0x1a0] sm:$0xff]  ;;  %v79_v57 = vld [vmem:[%s2703_s0 + $0x1e8] sm:$0xff] }
  0x23   :  { %947 = vmatmul.mubr.bf16.vlgmr.msra.gmra.mxu0 %v1562_v35  ;;  %v1596_v35 = vcombine.low %v51_v16, %v55_v17  ;;  %v1620_v3 = vcombine.low %v75_v56, %v79_v57  ;;  %v37_v16 = vld [vmem:[%s2703_s0 + $0x98] sm:$0xff] }
  0x24   :  { %1044 = vmatmul.mubr.bf16.vlgmr.msra.gmra.mxu1 %v1564_v38  ;;  %1898 = vmatpush3.bf16.msra.mxu0 %v2058_v41  ;;  %v2081_v38 = vld [vmem:[%s2702_s1 + $0x148] sm:$0xff]   ;;  %v66_v41 = vld [vmem:[%s2703_s0 + $0x180] sm:$0xff]  ;;  %v41_v17 = vld [vmem:[%s2703_s0 + $0xb8] sm:$0xff] }
  0x25   :  { %1962 = vmatpush3.bf16.msra.mxu1 %v2060_v43  ;;  %954 = vmatprep.mubr.bf16.mxu0 %v1571_v46  ;;  %v2084_v43 = vld [vmem:[%s2702_s1 + $0x188] sm:$0xff]   ;;  %v2085_v46 = vld [vmem:[%s2702_s1 + $0x140] sm:$0xff]   ;;  %v1610_v58 = vcombine.low %v66_v41, %v70_v42  ;;  %v1584_v27 = vcombine.low %v37_v16, %v41_v17 }
  0x26   :  { %1051 = vmatprep.mubr.bf16.mxu1 %v1573_v49  ;;  %1899 = vmatprep.subr.bf16.mxu0 %v2061_v50  ;;  %v1604_v49 = vcombine.low %v59_v29, %v63_v30  ;;  %v1611_v50 = vcombine.high %v66_v41, %v70_v42  ;;  %v52_v30 = vld [vmem:[%s2703_s0 + $0x110] sm:$0xff]  ;;  %v65_v41 = vld [vmem:[%s2703_s0 + $0x178] sm:$0xff] }
  0x27   :  { %1963 = vmatprep.subr.bf16.mxu1 %v2063_v54  ;;  %v74_v54 = vld [vmem:[%s2703_s0 + $0x1c0] sm:$0xff] }
  0x28   :  { %1900 = vmatpush3.bf16.msra.mxu0 %v2062_v52  ;;  %v1613_v52 = vcombine.high %v67_v44, %v71_v45 }
  0x29   :  { %1964 = vmatpush3.bf16.msra.mxu1 %v2064_v55  ;;  %1901 = vmatprep.subr.bf16.mxu0 %v2065_v62  ;;  %v78_v55 = vld [vmem:[%s2703_s0 + $0x1e0] sm:$0xff]  ;;  %v20_v62 = vld [vmem:[%s2703_s0 + $0x10] sm:$0xff] }
  0x2a   :  { %1965 = vmatprep.subr.bf16.mxu1 %v2067_v0  ;;  %v21_v0 = vld [vmem:[%s2703_s0 + $0x18] sm:$0xff] }
  0x2b   :  { %955 = vmatmul.mubr.bf16.gmra.mxu0 %v1570_v51  ;;  %v2087_v51 = vld [vmem:[%s2702_s1 + $0x1c0] sm:$0xff]  }
  0x2c   :  { %1052 = vmatmul.mubr.bf16.gmra.mxu1 %v1572_v53  ;;  %962 = vmatprep.mubr.bf16.mxu0 %v1579_v60  ;;  %v2088_v53 = vld [vmem:[%s2702_s1 + $0x180] sm:$0xff]   ;;  %v1619_v60 = vcombine.high %v74_v54, %v78_v55 }
  0x2d   :  { %1059 = vmatprep.mubr.bf16.mxu1 %v1581_v61  ;;  %1902 = vmatpush3.bf16.msra.mxu0 %v2066_v63  ;;  %v1621_v61 = vcombine.high %v75_v56, %v79_v57  ;;  %v24_v63 = vld [vmem:[%s2703_s0 + $0x30] sm:$0xff]  ;;  %v77_v56 = vld [vmem:[%s2703_s0 + $0x1d8] sm:$0xff] }
  0x2e   :  { %1966 = vmatpush3.bf16.msra.mxu1 %v2068_v1  ;;  %1903 = vmatprep.subr.bf16.mxu0 %v2069_v10  ;;  %v25_v1 = vld [vmem:[%s2703_s0 + $0x38] sm:$0xff]  ;;  %v1567_v4 = vcombine.high %v20_v62, %v24_v63  ;;  %v1566_v10 = vcombine.low %v20_v62, %v24_v63 }
  0x2f   :  { %1967 = vmatprep.subr.bf16.mxu1 %v2071_v12  ;;  %v1569_v5 = vcombine.high %v21_v0, %v25_v1  ;;  %v81_v57 = vld [vmem:[%s2703_s0 + $0x1f8] sm:$0xff] }
  0x30   :  { %v1624_v63 = vcombine.low %v77_v56, %v81_v57 }
  0x31   :  { %1904 = vmatpush3.bf16.msra.mxu0 %v2070_v11  ;;  %v1568_v11 = vcombine.low %v21_v0, %v25_v1 }
  0x32   :  { %1968 = vmatpush3.bf16.msra.mxu1 %v2072_v13  ;;  %1905 = vmatprep.subr.bf16.mxu0 %v2073_v18 }
  0x33   :  { %963 = vmatmul.mubr.bf16.gmra.mxu0 %v1578_v2  ;;  %1969 = vmatprep.subr.bf16.mxu1 %v2075_v23  ;;  %v1618_v2 = vcombine.low %v74_v54, %v78_v55  ;;  %v48_v23 = vld [vmem:[%s2703_s0 + $0xf0] sm:$0xff] }
  0x34   :  { %1060 = vmatmul.mubr.bf16.gmra.mxu1 %v1580_v6  ;;  %970 = vmatprep.mubr.bf16.mxu0 %v1587_v7  ;;  %v28_v6 = vld [vmem:[%s2703_s0 + $0x50] sm:$0xff] }
  0x35   :  { %1067 = vmatprep.mubr.bf16.mxu1 %v1589_v9  ;;  %1906 = vmatpush3.bf16.msra.mxu0 %v2074_v20  ;;  %v32_v7 = vld [vmem:[%s2703_s0 + $0x70] sm:$0xff]  ;;  %v33_v9 = vld [vmem:[%s2703_s0 + $0x78] sm:$0xff]  ;;  %v1583_v20 = vcombine.high %v36_v14, %v40_v15 }
  0x36   :  { %1970 = vmatpush3.bf16.msra.mxu1 %v2076_v25  ;;  %1907 = vmatprep.subr.bf16.mxu0 %v2077_v28  ;;  %v1575_v12 = vcombine.high %v28_v6, %v32_v7  ;;  %v1577_v13 = vcombine.high %v29_v8, %v33_v9  ;;  %v1574_v18 = vcombine.low %v28_v6, %v32_v7  ;;  %v49_v25 = vld [vmem:[%s2703_s0 + $0xf8] sm:$0xff]  ;;  %v76_v54 = vld [vmem:[%s2703_s0 + $0x1d0] sm:$0xff] }
  0x37   :  { %1971 = vmatprep.subr.bf16.mxu1 %v2079_v32  ;;  %v53_v32 = vld [vmem:[%s2703_s0 + $0x118] sm:$0xff]  ;;  %v80_v55 = vld [vmem:[%s2703_s0 + $0x1f0] sm:$0xff] }
  0x38   :  { %v1622_v62 = vcombine.low %v76_v54, %v80_v55 }
  0x39   :  { %1908 = vmatpush3.bf16.msra.mxu0 %v2078_v31  ;;  %v56_v31 = vld [vmem:[%s2703_s0 + $0x130] sm:$0xff] }
  0x3a   :  { %1972 = vmatpush3.bf16.msra.mxu1 %v2080_v33  ;;  %1909 = vmatprep.subr.bf16.mxu0 %v2081_v38  ;;  %v57_v33 = vld [vmem:[%s2703_s0 + $0x138] sm:$0xff]  ;;  %v60_v38 = vld [vmem:[%s2703_s0 + $0x150] sm:$0xff]  ;;  %v1598_v42 = vcombine.low %v52_v30, %v56_v31 }
  0x3b   :  { %971 = vmatmul.mubr.bf16.gmra.mxu0 %v1586_v19  ;;  %1973 = vmatprep.subr.bf16.mxu1 %v2083_v40  ;;  %v1576_v19 = vcombine.low %v29_v8, %v33_v9  ;;  %v61_v40 = vld [vmem:[%s2703_s0 + $0x158] sm:$0xff] }
  0x3c   :  { %1068 = vmatmul.mubr.bf16.gmra.mxu1 %v1588_v21  ;;  %978 = vmatprep.mubr.bf16.mxu0 %v1595_v22  ;;  %v1585_v21 = vcombine.high %v37_v16, %v41_v17  ;;  %v44_v22 = vld [vmem:[%s2703_s0 + $0xd0] sm:$0xff]  ;;  %v1609_v45 = vcombine.high %v61_v40, %v65_v41 }
  0x3d   :  { %1075 = vmatprep.mubr.bf16.mxu1 %v1597_v24  ;;  %1910 = vmatpush3.bf16.msra.mxu0 %v2082_v39  ;;  %v45_v24 = vld [vmem:[%s2703_s0 + $0xd8] sm:$0xff]  ;;  %v1591_v28 = vcombine.high %v44_v22, %v48_v23  ;;  %v64_v39 = vld [vmem:[%s2703_s0 + $0x170] sm:$0xff] }
  0x3e   :  { %1974 = vmatpush3.bf16.msra.mxu1 %v2084_v43  ;;  %1911 = vmatprep.subr.bf16.mxu0 %v2085_v46  ;;  %v1593_v29 = vcombine.high %v45_v24, %v49_v25  ;;  %v1600_v43 = vcombine.low %v53_v32, %v57_v33  ;;  %v1607_v44 = vcombine.high %v60_v38, %v64_v39  ;;  %v68_v46 = vld [vmem:[%s2703_s0 + $0x190] sm:$0xff] }
  0x3f   :  { %1975 = vmatprep.subr.bf16.mxu1 %v2087_v51  ;;  %v1608_v51 = vcombine.low %v61_v40, %v65_v41 }
  0x41   :  { %1912 = vmatpush3.bf16.msra.mxu0 %v2086_v48  ;;  %v69_v48 = vld [vmem:[%s2703_s0 + $0x198] sm:$0xff] }
  0x42   :  { %1976 = vmatpush3.bf16.msra.mxu1 %v2088_v53 }
  0x43   :  { %979 = vmatmul.mubr.bf16.gmra.mxu0 %v1594_v34  ;;  %v1590_v34 = vcombine.low %v44_v22, %v48_v23 }
  0x44   :  { %1076 = vmatmul.mubr.bf16.gmra.mxu1 %v1596_v35  ;;  %986 = vmatprep.mubr.bf16.mxu0 %v1603_v36  ;;  %v1592_v35 = vcombine.low %v45_v24, %v49_v25  ;;  %v1599_v36 = vcombine.high %v52_v30, %v56_v31 }
  0x45   :  { %1083 = vmatprep.mubr.bf16.mxu1 %v1605_v37  ;;  %v1601_v37 = vcombine.high %v53_v32, %v57_v33 }
  0x4b   :  { %987 = vmatmul.mubr.bf16.gmra.mxu0 %v1602_v47  ;;  %v72_v47 = vld [vmem:[%s2703_s0 + $0x1b0] sm:$0xff] }
  0x4c   :  { %1084 = vmatmul.mubr.bf16.gmra.mxu1 %v1604_v49  ;;  %994 = vmatprep.mubr.bf16.mxu0 %v1611_v50  ;;  %v73_v49 = vld [vmem:[%s2703_s0 + $0x1b8] sm:$0xff]  ;;  %v1606_v50 = vcombine.low %v60_v38, %v64_v39 }
  0x4d   :  { %1091 = vmatprep.mubr.bf16.mxu1 %v1613_v52  ;;  %v1615_v52 = vcombine.high %v68_v46, %v72_v47  ;;  %v1617_v53 = vcombine.high %v69_v48, %v73_v49 }
  0x53   :  { %995 = vmatmul.mubr.bf16.gmra.mxu0 %v1610_v58  ;;  %v1614_v58 = vcombine.low %v68_v46, %v72_v47 }
  0x54   :  { %1092 = vmatmul.mubr.bf16.gmra.mxu1 %v1612_v59  ;;  %1002 = vmatprep.mubr.bf16.mxu0 %v1619_v60  ;;  %v1616_v59 = vcombine.low %v69_v48, %v73_v49  ;;  %v1623_v60 = vcombine.high %v76_v54, %v80_v55 }
  0x55   :  { %1099 = vmatprep.mubr.bf16.mxu1 %v1621_v61  ;;  %v1625_v61 = vcombine.high %v77_v56, %v81_v57 }
  0x5b   :  { %1003 = vmatmul.mubr.bf16.gmra.mxu0 %v1618_v2 }
  0x5c   :  { %1100 = vmatmul.mubr.bf16.gmra.mxu1 %v1620_v3  ;;  %1140 = vmatprep.mubr.bf16.mxu0 %v1567_v4 }
  0x5d   :  { %1237 = vmatprep.mubr.bf16.mxu1 %v1569_v5 }
  0x63   :  { %1141 = vmatmul.mubr.bf16.vlgmr.msra.gmra.mxu0 %v1566_v10 }
  0x64   :  { %1238 = vmatmul.mubr.bf16.vlgmr.msra.gmra.mxu1 %v1568_v11  ;;  %1148 = vmatprep.mubr.bf16.mxu0 %v1575_v12 }
  0x65   :  { %1245 = vmatprep.mubr.bf16.mxu1 %v1577_v13 }
  0x6b   :  { %1149 = vmatmul.mubr.bf16.gmra.mxu0 %v1574_v18 }
  0x6c   :  { %1246 = vmatmul.mubr.bf16.gmra.mxu1 %v1576_v19  ;;  %1156 = vmatprep.mubr.bf16.mxu0 %v1583_v20 }
  0x6d   :  { %1253 = vmatprep.mubr.bf16.mxu1 %v1585_v21 }
  0x73   :  { %1157 = vmatmul.mubr.bf16.gmra.mxu0 %v1582_v26 }
  0x74   :  { %1254 = vmatmul.mubr.bf16.gmra.mxu1 %v1584_v27  ;;  %1164 = vmatprep.mubr.bf16.mxu0 %v1591_v28 }
  0x75   :  { %1261 = vmatprep.mubr.bf16.mxu1 %v1593_v29 }
  0x7b   :  { %1165 = vmatmul.mubr.bf16.gmra.mxu0 %v1590_v34 }
  0x7c   :  { %1262 = vmatmul.mubr.bf16.gmra.mxu1 %v1592_v35  ;;  %1172 = vmatprep.mubr.bf16.mxu0 %v1599_v36 }
  0x7d   :  { %1269 = vmatprep.mubr.bf16.mxu1 %v1601_v37 }
  0x83   :  { %1173 = vmatmul.mubr.bf16.gmra.mxu0 %v1598_v42 }
  0x84   :  { %1270 = vmatmul.mubr.bf16.gmra.mxu1 %v1600_v43  ;;  %1180 = vmatprep.mubr.bf16.mxu0 %v1607_v44 }
  0x85   :  { %1277 = vmatprep.mubr.bf16.mxu1 %v1609_v45 }
  0x8b   :  { %1181 = vmatmul.mubr.bf16.gmra.mxu0 %v1606_v50 }
  0x8c   :  { %1278 = vmatmul.mubr.bf16.gmra.mxu1 %v1608_v51  ;;  %1188 = vmatprep.mubr.bf16.mxu0 %v1615_v52 }
  0x8d   :  { %1285 = vmatprep.mubr.bf16.mxu1 %v1617_v53 }
  0x93   :  { %1189 = vmatmul.mubr.bf16.gmra.mxu0 %v1614_v58 }
  0x94   :  { %1286 = vmatmul.mubr.bf16.gmra.mxu1 %v1616_v59  ;;  %1196 = vmatprep.mubr.bf16.mxu0 %v1623_v60 }
  0x95   :  { %1293 = vmatprep.mubr.bf16.mxu1 %v1625_v61 }
  0x9b   :  { %1197 = vmatmul.mubr.bf16.gmra.mxu0 %v1622_v62 }
  0x9c   :  { %1294 = vmatmul.mubr.bf16.gmra.mxu1 %v1624_v63 }
  0xe3   :  { %v1785_v0 = vpop.f32.mrf.mxu0 }
  0xe4   :  { %v1849_v1 = vpop.f32.mrf.mxu1 }
  0xe5   :  { %v1786_v2 = vpop.f32.mrf.mxu0 }
  0xe6   :  { %v1787_v3 = vadd.f32 %v1786_v2, %v1785_v0  ;;  %v1850_v4 = vpop.f32.mrf.mxu1 }
  0xe7   :  { %v1851_v5 = vadd.f32 %v1850_v4, %v1849_v1  ;;  %v1788_v6 = vpop.f32.mrf.mxu0 }
  0xe8   :  { %v1852_v7 = vpop.f32.mrf.mxu1 }
  0xe9   :  { %v2500_v8 = vadd.f32 %v1851_v5, %v1787_v3  ;;  %v1789_v9 = vpop.f32.mrf.mxu0 }
  0xea   :  { %v1790_v10 = vadd.f32 %v1789_v9, %v1788_v6  ;;  %v1853_v11 = vpop.f32.mrf.mxu1 }
  0xeb   :  { %v1854_v12 = vadd.f32 %v1853_v11, %v1852_v7  ;;  %v1791_v13 = vpop.f32.mrf.mxu0 }
  0xec   :  { %v1855_v14 = vpop.f32.mrf.mxu1 }
  0xed   :  { %v2502_v15 = vadd.f32 %v1854_v12, %v1790_v10  ;;  %v1792_v16 = vpop.f32.mrf.mxu0 }
  0xee   :  { %v1793_v17 = vadd.f32 %v1792_v16, %v1791_v13  ;;  %v1856_v18 = vpop.f32.mrf.mxu1 }
  0xef   :  { %v1857_v19 = vadd.f32 %v1856_v18, %v1855_v14  ;;  %v1794_v20 = vpop.f32.mrf.mxu0 }
  0xf0   :  { %v1858_v21 = vpop.f32.mrf.mxu1 }
  0xf1   :  { %v2504_v22 = vadd.f32 %v1857_v19, %v1793_v17  ;;  %v1795_v23 = vpop.f32.mrf.mxu0 }
  0xf2   :  { %v1796_v24 = vadd.f32 %v1795_v23, %v1794_v20  ;;  %v1859_v25 = vpop.f32.mrf.mxu1 }
  0xf3   :  { %v1860_v26 = vadd.f32 %v1859_v25, %v1858_v21  ;;  %v1797_v27 = vpop.f32.mrf.mxu0 }
  0xf4   :  { %v1861_v28 = vpop.f32.mrf.mxu1 }
  0xf5   :  { %v2506_v29 = vadd.f32 %v1860_v26, %v1796_v24  ;;  %v1798_v30 = vpop.f32.mrf.mxu0 }
  0xf6   :  { %v1799_v31 = vadd.f32 %v1798_v30, %v1797_v27  ;;  %v1862_v32 = vpop.f32.mrf.mxu1 }
  0xf7   :  { %v1863_v33 = vadd.f32 %v1862_v32, %v1861_v28  ;;  %v1800_v34 = vpop.f32.mrf.mxu0 }
  0xf8   :  { %v1864_v35 = vpop.f32.mrf.mxu1 }
  0xf9   :  { %v2508_v36 = vadd.f32 %v1863_v33, %v1799_v31  ;;  %v1801_v37 = vpop.f32.mrf.mxu0 }
  0xfa   :  { %v1802_v38 = vadd.f32 %v1801_v37, %v1800_v34  ;;  %v1865_v39 = vpop.f32.mrf.mxu1 }
  0xfb   :  { %v1866_v40 = vadd.f32 %v1865_v39, %v1864_v35  ;;  %v1803_v41 = vpop.f32.mrf.mxu0 }
  0xfc   :  { %v1867_v42 = vpop.f32.mrf.mxu1 }
  0xfd   :  { %v2510_v43 = vadd.f32 %v1866_v40, %v1802_v38  ;;  %v1804_v44 = vpop.f32.mrf.mxu0 }
  0xfe   :  { %v1805_v45 = vadd.f32 %v1804_v44, %v1803_v41  ;;  %v1868_v46 = vpop.f32.mrf.mxu1 }
  0xff   :  { %v1869_v47 = vadd.f32 %v1868_v46, %v1867_v42  ;;  %v1806_v48 = vpop.f32.mrf.mxu0 }
 0x100   :  { %v1870_v49 = vpop.f32.mrf.mxu1 }
 0x101   :  { %v2512_v50 = vadd.f32 %v1869_v47, %v1805_v45  ;;  %v1807_v51 = vpop.f32.mrf.mxu0 }
 0x102   :  { %v1808_v52 = vadd.f32 %v1807_v51, %v1806_v48  ;;  %v1871_v53 = vpop.f32.mrf.mxu1 }
 0x103   :  { %v1872_v54 = vadd.f32 %v1871_v53, %v1870_v49  ;;  %v1809_v55 = vpop.f32.mrf.mxu0 }
 0x104   :  { %v1873_v56 = vpop.f32.mrf.mxu1 }
 0x105   :  { %v2514_v57 = vadd.f32 %v1872_v54, %v1808_v52  ;;  %v1810_v58 = vpop.f32.mrf.mxu0 }
 0x106   :  { %v1811_v59 = vadd.f32 %v1810_v58, %v1809_v55  ;;  %v1874_v60 = vpop.f32.mrf.mxu1 }
 0x107   :  { %v1875_v61 = vadd.f32 %v1874_v60, %v1873_v56  ;;  %v1812_v62 = vpop.f32.mrf.mxu0 }
 0x108   :  { %v1876_v63 = vpop.f32.mrf.mxu1 }
 0x109   :  { %v2516_v0 = vadd.f32 %v1875_v61, %v1811_v59  ;;  %v1813_v1 = vpop.f32.mrf.mxu0 }
 0x10a   :  { %v1814_v2 = vadd.f32 %v1813_v1, %v1812_v62  ;;  %v1877_v3 = vpop.f32.mrf.mxu1 }
 0x10b   :  { %v1878_v4 = vadd.f32 %v1877_v3, %v1876_v63  ;;  %v1815_v5 = vpop.f32.mrf.mxu0 }
 0x10c   :  { %v1879_v6 = vpop.f32.mrf.mxu1 }
 0x10d   :  { %v2518_v7 = vadd.f32 %v1878_v4, %v1814_v2  ;;  %v1816_v9 = vpop.f32.mrf.mxu0 }
 0x10e   :  { %v1817_v10 = vadd.f32 %v1816_v9, %v1815_v5  ;;  %v1880_v11 = vpop.f32.mrf.mxu1 }
 0x10f   :  { %v1881_v12 = vadd.f32 %v1880_v11, %v1879_v6  ;;  %v1818_v13 = vpop.f32.mrf.mxu0 }
 0x110   :  { %v1882_v14 = vpop.f32.mrf.mxu1 }
 0x111   :  { %v2520_v16 = vadd.f32 %v1881_v12, %v1817_v10  ;;  %v1819_v17 = vpop.f32.mrf.mxu0 }
 0x112   :  { %v1820_v18 = vadd.f32 %v1819_v17, %v1818_v13  ;;  %v1883_v19 = vpop.f32.mrf.mxu1 }
 0x113   :  { %v1884_v20 = vadd.f32 %v1883_v19, %v1882_v14  ;;  %v1821_v21 = vpop.f32.mrf.mxu0 }
 0x114   :  { %v1885_v23 = vpop.f32.mrf.mxu1 }
 0x115   :  { %v2522_v24 = vadd.f32 %v1884_v20, %v1820_v18  ;;  %v1822_v25 = vpop.f32.mrf.mxu0 }
 0x116   :  { %v1823_v26 = vadd.f32 %v1822_v25, %v1821_v21  ;;  %v1886_v27 = vpop.f32.mrf.mxu1 }
 0x117   :  { %v1887_v28 = vadd.f32 %v1886_v27, %v1885_v23  ;;  %v1824_v30 = vpop.f32.mrf.mxu0 }
 0x118   :  { %v1888_v31 = vpop.f32.mrf.mxu1 }
 0x119   :  { %v2524_v32 = vadd.f32 %v1887_v28, %v1823_v26  ;;  %v1825_v33 = vpop.f32.mrf.mxu0 }
 0x11a   :  { %v1826_v34 = vadd.f32 %v1825_v33, %v1824_v30  ;;  %v1889_v35 = vpop.f32.mrf.mxu1 }
 0x11b   :  { %v1890_v37 = vadd.f32 %v1889_v35, %v1888_v31  ;;  %v1827_v38 = vpop.f32.mrf.mxu0 }
 0x11c   :  { %v1891_v39 = vpop.f32.mrf.mxu1 }
 0x11d   :  { %v2526_v40 = vadd.f32 %v1890_v37, %v1826_v34  ;;  %v1828_v41 = vpop.f32.mrf.mxu0 }
 0x11e   :  { %v1829_v42 = vadd.f32 %v1828_v41, %v1827_v38  ;;  %v1892_v44 = vpop.f32.mrf.mxu1 }
 0x11f   :  { %v1893_v45 = vadd.f32 %v1892_v44, %v1891_v39  ;;  %v2528_v46 = vpop.f32.mrf.mxu0 }
 0x120   :  { %v2530_v47 = vpop.f32.mrf.mxu1 }
 0x121   :  { %v2532_v48 = vadd.f32 %v1893_v45, %v1829_v42  ;;  %v2534_v49 = vpop.f32.mrf.mxu0 }
 0x122   :  { %v2536_v51 = vpop.f32.mrf.mxu1 }
 0x123   :  { %v1913_v52 = vpop.f32.mrf.mxu0 }
 0x124   :  { %v1977_v53 = vpop.f32.mrf.mxu1 }
 0x125   :  { %v1914_v54 = vpop.f32.mrf.mxu0 }
 0x126   :  { %v1978_v55 = vpop.f32.mrf.mxu1  ;;  %v1915_v26 = vadd.f32 %v1914_v54, %v1913_v52 }
 0x127   :  { %v1916_v56 = vpop.f32.mrf.mxu0  ;;  %v1979_v45 = vadd.f32 %v1978_v55, %v1977_v53 }
 0x128   :  { %v1980_v58 = vpop.f32.mrf.mxu1  ;;  %v1143_v37 = vadd.f32 %v1915_v26, %v2500_v8 }
 0x129   :  { %v1917_v59 = vpop.f32.mrf.mxu0 }
 0x12a   :  { %v1981_v60 = vpop.f32.mrf.mxu1  ;;  %v1918_v21 = vadd.f32 %v1917_v59, %v1916_v56 }
 0x12b   :  { %v1919_v61 = vpop.f32.mrf.mxu0  ;;  %v1982_v38 = vadd.f32 %v1981_v60, %v1980_v58 }
 0x12c   :  { %v1983_v62 = vpop.f32.mrf.mxu1  ;;  %v1146_v31 = vadd.f32 %v1918_v21, %v2502_v15 }
 0x12d   :  { %v1920_v63 = vpop.f32.mrf.mxu0 }
 0x12e   :  { %v1984_v1 = vpop.f32.mrf.mxu1  ;;  %v1921_v27 = vadd.f32 %v1920_v63, %v1919_v61  ;;  %v2541_v56 = vadd.f32 %v1982_v38, %v1146_v31  ;;  %v2544_v63 = vadd.f32 %v1979_v45, %v1143_v37 }
 0x12f   :  { %v1922_v2 = vpop.f32.mrf.mxu0  ;;  %v1985_v52 = vadd.f32 %v1984_v1, %v1983_v62 }
 0x130   :  { %v1986_v3 = vpop.f32.mrf.mxu1  ;;  %v1151_v39 = vadd.f32 %v1921_v27, %v2504_v22  ;;  %v1302_v53 = vadd.f32 %v2541_v56, %v2544_v63 }
 0x131   :  { %v1923_v4 = vpop.f32.mrf.mxu0 }
 0x132   :  { %v1987_v5 = vpop.f32.mrf.mxu1  ;;  %v1924_v34 = vadd.f32 %v1923_v4, %v1922_v2  ;;  %v2546_v2 = vadd.f32 %v1985_v52, %v1151_v39 }
 0x133   :  { %v1925_v6 = vpop.f32.mrf.mxu0  ;;  %v1988_v58 = vadd.f32 %v1987_v5, %v1986_v3 }
 0x134   :  { %v1989_v9 = vpop.f32.mrf.mxu1  ;;  %v1154_v59 = vadd.f32 %v1924_v34, %v2506_v29 }
 0x135   :  { %v1926_v10 = vpop.f32.mrf.mxu0 }
 0x136   :  { %v1990_v11 = vpop.f32.mrf.mxu1  ;;  %v1927_v42 = vadd.f32 %v1926_v10, %v1925_v6  ;;  %v2551_v62 = vadd.f32 %v1988_v58, %v1154_v59 }
 0x137   :  { %v1928_v12 = vpop.f32.mrf.mxu0  ;;  %v1991_v1 = vadd.f32 %v1990_v11, %v1989_v9 }
 0x138   :  { %v1992_v13 = vpop.f32.mrf.mxu1  ;;  %v1159_v22 = vadd.f32 %v1927_v42, %v2508_v36 }
 0x139   :  { %v1929_v14 = vpop.f32.mrf.mxu0 }
 0x13a   :  { %v1993_v17 = vpop.f32.mrf.mxu1  ;;  %v1930_v61 = vadd.f32 %v1929_v14, %v1928_v12  ;;  %v1303_v12 = vadd.f32 %v1302_v53, %v2546_v2  ;;  %v2555_v21 = vadd.f32 %v1991_v1, %v1159_v22 }
 0x13b   :  { %v1931_v18 = vpop.f32.mrf.mxu0  ;;  %v1994_v3 = vadd.f32 %v1993_v17, %v1992_v13 }
 0x13c   :  { %v1995_v19 = vpop.f32.mrf.mxu1  ;;  %v1162_v29 = vadd.f32 %v1930_v61, %v2510_v43  ;;  %v1304_v26 = vadd.f32 %v1303_v12, %v2551_v62 }
 0x13d   :  { %v1932_v20 = vpop.f32.mrf.mxu0 }
 0x13e   :  { %v1996_v23 = vpop.f32.mrf.mxu1  ;;  %v1933_v60 = vadd.f32 %v1932_v20, %v1931_v18  ;;  %v2559_v27 = vadd.f32 %v1994_v3, %v1162_v29  ;;  %v1305_v31 = vadd.f32 %v1304_v26, %v2555_v21  ;;  %v1832_v3 = vadd.f32 %v2534_v49, %v2528_v46 }
 0x13f   :  { %v1934_v25 = vpop.f32.mrf.mxu0  ;;  %v1997_v9 = vadd.f32 %v1996_v23, %v1995_v19 }
 0x140   :  { %v1998_v28 = vpop.f32.mrf.mxu1  ;;  %v1167_v36 = vadd.f32 %v1933_v60, %v2512_v50  ;;  %v1306_v38 = vadd.f32 %v1305_v31, %v2559_v27 }
 0x141   :  { %v1935_v30 = vpop.f32.mrf.mxu0 }
 0x142   :  { %v1999_v33 = vpop.f32.mrf.mxu1  ;;  %v1936_v6 = vadd.f32 %v1935_v30, %v1934_v25  ;;  %v2563_v34 = vadd.f32 %v1997_v9, %v1167_v36  ;;  %v1896_v36 = vadd.f32 %v2536_v51, %v2530_v47 }
 0x143   :  { %v1937_v35 = vpop.f32.mrf.mxu0  ;;  %v2000_v13 = vadd.f32 %v1999_v33, %v1998_v28 }
 0x144   :  { %v2001_v41 = vpop.f32.mrf.mxu1  ;;  %v1170_v43 = vadd.f32 %v1936_v6, %v2514_v57  ;;  %v1307_v45 = vadd.f32 %v1306_v38, %v2563_v34  ;;  %v1105_v31 = vadd.f32 %v1896_v36, %v1832_v3 }
 0x145   :  { %v1938_v44 = vpop.f32.mrf.mxu0 }
 0x146   :  { %v2002_v54 = vpop.f32.mrf.mxu1  ;;  %v1939_v5 = vadd.f32 %v1938_v44, %v1937_v35  ;;  %v2567_v39 = vadd.f32 %v2000_v13, %v1170_v43 }
 0x147   :  { %v1940_v15 = vpop.f32.mrf.mxu0  ;;  %v2003_v19 = vadd.f32 %v2002_v54, %v2001_v41 }
 0x148   :  { %v2004_v8 = vpop.f32.mrf.mxu1  ;;  %v1175_v50 = vadd.f32 %v1939_v5, %v2516_v0 }
 0x149   :  { %v1941_v4 = vpop.f32.mrf.mxu0 }
 0x14a   :  { %v2005_v55 = vpop.f32.mrf.mxu1  ;;  %v1942_v25 = vadd.f32 %v1941_v4, %v1940_v15  ;;  %v2571_v52 = vadd.f32 %v2003_v19, %v1175_v50  ;;  %v1308_v15 = vadd.f32 %v1307_v45, %v2567_v39 }
 0x14b   :  { %v1943_v10 = vpop.f32.mrf.mxu0  ;;  %v2006_v33 = vadd.f32 %v2005_v55, %v2004_v8 }
 0x14c   :  { %v2007_v14 = vpop.f32.mrf.mxu1  ;;  %v1178_v57 = vadd.f32 %v1942_v25, %v2518_v7  ;;  %v1309_v60 = vadd.f32 %v1308_v15, %v2571_v52 }
 0x14d   :  { %v1944_v18 = vpop.f32.mrf.mxu0 }
 0x14e   :  { %v2008_v20 = vpop.f32.mrf.mxu1  ;;  %v1945_v35 = vadd.f32 %v1944_v18, %v1943_v10  ;;  %v2575_v22 = vadd.f32 %v2006_v33, %v1178_v57 }
 0x14f   :  { %v1946_v11 = vpop.f32.mrf.mxu0  ;;  %v2009_v41 = vadd.f32 %v2008_v20, %v2007_v14 }
 0x150   :  { %v2010_v30 = vpop.f32.mrf.mxu1  ;;  %v1183_v0 = vadd.f32 %v1945_v35, %v2520_v16  ;;  %v1310_v6 = vadd.f32 %v1309_v60, %v2575_v22 }
 0x151   :  { %v1947_v17 = vpop.f32.mrf.mxu0 }
 0x152   :  { %v2011_v37 = vpop.f32.mrf.mxu1  ;;  %v1948_v42 = vadd.f32 %v1947_v17, %v1946_v11  ;;  %v2579_v53 = vadd.f32 %v2009_v41, %v1183_v0 }
 0x153   :  { %v1949_v23 = vpop.f32.mrf.mxu0  ;;  %v2012_v1 = vadd.f32 %v2011_v37, %v2010_v30 }
 0x154   :  { %v2013_v44 = vpop.f32.mrf.mxu1  ;;  %v1186_v7 = vadd.f32 %v1948_v42, %v2522_v24 }
 0x155   :  { %v1950_v28 = vpop.f32.mrf.mxu0 }
 0x156   :  { %v1951_v59 = vadd.f32 %v1950_v28, %v1949_v23  ;;  %v2014_v61 = vpop.f32.mrf.mxu1  ;;  %v2583_v10 = vadd.f32 %v2012_v1, %v1186_v7 }
 0x157   :  { %v1952_v58 = vpop.f32.mrf.mxu0  ;;  %v2015_v12 = vadd.f32 %v2014_v61, %v2013_v44 }
 0x158   :  { %v2016_v54 = vpop.f32.mrf.mxu1  ;;  %v1191_v8 = vadd.f32 %v1951_v59, %v2524_v32  ;;  %v1311_v32 = vadd.f32 %v1310_v6, %v2579_v53 }
 0x159   :  { %v1953_v4 = vpop.f32.mrf.mxu0 }
 0x15a   :  { %v1954_v16 = vadd.f32 %v1953_v4, %v1952_v58  ;;  %v2017_v55 = vpop.f32.mrf.mxu1  ;;  %v2591_v18 = vadd.f32 %v2015_v12, %v1191_v8  ;;  %v1312_v11 = vadd.f32 %v1311_v32, %v2583_v10 }
 0x15b   :  { %v1955_v29 = vpop.f32.mrf.mxu0  ;;  %v2018_v20 = vadd.f32 %v2017_v55, %v2016_v54 }
 0x15c   :  { %v1194_v14 = vadd.f32 %v1954_v16, %v2526_v40  ;;  %v2019_v24 = vpop.f32.mrf.mxu1  ;;  %v1313_v47 = vadd.f32 %v1312_v11, %v2591_v18 }
 0x15d   :  { %v1956_v5 = vpop.f32.mrf.mxu0 }
 0x15e   :  { %v1957_v26 = vadd.f32 %v1956_v5, %v1955_v29  ;;  %v2020_v9 = vpop.f32.mrf.mxu1  ;;  %v2594_v25 = vadd.f32 %v2018_v20, %v1194_v14 }
 0x15f   :  { %v1958_v43 = vpop.f32.mrf.mxu0  ;;  %v2021_v30 = vadd.f32 %v2020_v9, %v2019_v24 }
 0x160   :  { %v1199_v40 = vadd.f32 %v1957_v26, %v2532_v48  ;;  %v2022_v46 = vpop.f32.mrf.mxu1  ;;  %v1314_v17 = vadd.f32 %v1313_v47, %v2594_v25 }
 0x161   :  { %v1959_v49 = vpop.f32.mrf.mxu0 }
 0x162   :  { %v2598_v51 = vadd.f32 %v2021_v30, %v1199_v40  ;;  %v1960_v13 = vadd.f32 %v1959_v49, %v1958_v43  ;;  %v2023_v50 = vpop.f32.mrf.mxu1 }
 0x163   :  { %v2024_v37 = vadd.f32 %v2023_v50, %v2022_v46 }
 0x164   :  { %v1202_v35 = vadd.f32 %v1960_v13, %v1105_v31  ;;  %v1315_v38 = vadd.f32 %v1314_v17, %v2598_v51 }
 0x166   :  { %v2602_v19 = vadd.f32 %v2024_v37, %v1202_v35 }
 0x168   :  { %v1316_v48 = vadd.f32 %v1315_v38, %v2602_v19 }
 0x16a   :  { %v1317_v23 = vrot.slane %v1316_v48, 4 }
 0x16c   :  { %v1318_v57 = vadd.f32 %v1317_v23, %v1316_v48 }
 0x16e   :  { %v1319_v42 = vrot.slane %v1318_v57, 2 }
 0x170   :  { %v1320_v44 = vadd.f32 %v1319_v42, %v1318_v57 }
 0x172   :  { %v1321_v45 = vrot.slane %v1320_v44, 1 }
 0x174   :  { %v1322_v28 = vadd.f32 %v1321_v45, %v1320_v44 }
 0x176   :  { %v2605_v33 = vmul.f32 0.0078125, %v1322_v28 }
 0x178   :  { %v1325_v0 = vsub.f32 %v2544_v63, %v2605_v33  ;;  %v1326_v59 = vsub.f32 %v2541_v56, %v2605_v33  ;;  %v1327_v61 = vsub.f32 %v2546_v2, %v2605_v33  ;;  %v1328_v41 = vsub.f32 %v2551_v62, %v2605_v33 }
 0x179   :  { %v1329_v7 = vsub.f32 %v2555_v21, %v2605_v33  ;;  %v1330_v4 = vsub.f32 %v2559_v27, %v2605_v33  ;;  %v1331_v16 = vsub.f32 %v2563_v34, %v2605_v33  ;;  %v1332_v6 = vsub.f32 %v2567_v39, %v2605_v33 }
 0x17a   :  { %v1341_v15 = vmul.f32 %v1325_v0, %v1325_v0  ;;  %v1342_v58 = vmul.f32 %v1326_v59, %v1326_v59  ;;  %v1343_v54 = vmul.f32 %v1327_v61, %v1327_v61  ;;  %v1344_v1 = vmul.f32 %v1328_v41, %v1328_v41 }
 0x17b   :  { %v1345_v55 = vmul.f32 %v1329_v7, %v1329_v7  ;;  %v1346_v12 = vmul.f32 %v1330_v4, %v1330_v4  ;;  %v1333_v24 = vsub.f32 %v2571_v52, %v2605_v33  ;;  %v1347_v3 = vmul.f32 %v1331_v16, %v1331_v16 }
 0x17c   :  { %v1357_v60 = vadd.f32 %v1342_v58, %v1341_v15  ;;  %v1334_v5 = vsub.f32 %v2575_v22, %v2605_v33  ;;  %v1348_v32 = vmul.f32 %v1332_v6, %v1332_v6  ;;  %v1335_v26 = vsub.f32 %v2579_v53, %v2605_v33 }
 0x17d   :  { %v1349_v9 = vmul.f32 %v1333_v24, %v1333_v24  ;;  %v1336_v11 = vsub.f32 %v2583_v10, %v2605_v33  ;;  %v1337_v46 = vsub.f32 %v2591_v18, %v2605_v33  ;;  %v1338_v47 = vsub.f32 %v2594_v25, %v2605_v33 }
 0x17e   :  { %v1358_v8 = vadd.f32 %v1357_v60, %v1343_v54  ;;  %v1350_v40 = vmul.f32 %v1334_v5, %v1334_v5  ;;  %v1351_v49 = vmul.f32 %v1335_v26, %v1335_v26  ;;  %v1339_v17 = vsub.f32 %v2598_v51, %v2605_v33 }
 0x17f   :  { %v1352_v13 = vmul.f32 %v1336_v11, %v1336_v11  ;;  %v1353_v35 = vmul.f32 %v1337_v46, %v1337_v46  ;;  %v1340_v38 = vsub.f32 %v2602_v19, %v2605_v33  ;;  %v1354_v48 = vmul.f32 %v1338_v47, %v1338_v47 }
 0x180   :  { %v1359_v29 = vadd.f32 %v1358_v8, %v1344_v1  ;;  %v1355_v57 = vmul.f32 %v1339_v17, %v1339_v17  ;;  %v1387_v60 = vlaneseq  ;;  %v1379_v1 = vld [vmem:[%s2704_s2] sm:$0x1] }
 0x181   :  { %v1356_v44 = vmul.f32 %v1340_v38, %v1340_v38 }
 0x182   :  { %v1360_v14 = vadd.f32 %v1359_v29, %v1345_v55  ;;  %v1388_v4 = vshrl.u32 %v1387_v60, 7  ;;  %v1383_v29 = vld [vmem:[%s2705_s3] sm:$0x1] }
 0x184   :  { %v1361_v36 = vadd.f32 %v1360_v14, %v1346_v12  ;;  %v1389_v8 = vsub.s32 0, %v1388_v4 }
 0x186   :  { %v1362_v20 = vadd.f32 %v1361_v36, %v1347_v3 }
 0x188   :  { %v1363_v43 = vadd.f32 %v1362_v20, %v1348_v32 }
 0x18a   :  { %v1364_v30 = vadd.f32 %v1363_v43, %v1349_v9 }
 0x18c   :  { %v1365_v31 = vadd.f32 %v1364_v30, %v1350_v40 }
 0x18e   :  { %v1366_v50 = vadd.f32 %v1365_v31, %v1351_v49 }
 0x190   :  { %v1367_v37 = vadd.f32 %v1366_v50, %v1352_v13 }
 0x192   :  { %v1368_v23 = vadd.f32 %v1367_v37, %v1353_v35 }
 0x194   :  { %v1369_v42 = vadd.f32 %v1368_v23, %v1354_v48 }
 0x196   :  { %v1370_v45 = vadd.f32 %v1369_v42, %v1355_v57 }
 0x198   :  { %v1371_v28 = vadd.f32 %v1370_v45, %v1356_v44 }
 0x19a   :  { %v1372_v0 = vrot.slane %v1371_v28, 4 }
 0x19c   :  { %v1373_v59 = vadd.f32 %v1372_v0, %v1371_v28 }
 0x19e   :  { %v1374_v61 = vrot.slane %v1373_v59, 2 }
 0x1a0   :  { %v1375_v15 = vadd.f32 %v1374_v61, %v1373_v59 }
 0x1a2   :  { %v1376_v58 = vrot.slane %v1375_v15, 1 }
 0x1a4   :  { %v1377_v41 = vadd.f32 %v1376_v58, %v1375_v15 }
 0x1a6   :  { %v1378_v7 = vmul.f32 0.0078125, %v1377_v41 }
 0x1a8   :  { %v1380_v54 = vadd.f32 1e-05, %v1378_v7 }
 0x1aa   :  { %2089 = vrsqrt.f32 %v1380_v54 }
 0x1b7   :  { %v2090_v16 = vpop.eup %2089 }
 0x1b8   :  { %v1382_v55 = vmul.f32 %v2090_v16, %v1379_v1 }
 0x1ba   :  { %v1384_v6 = vmul.f32 %v1382_v55, %v2605_v33  ;;  %v1390_v12 = vrot.slane %v1382_v55, %v1389_v8 }
 0x1bc   :  { %v1385_v14 = vsub.f32 %v1383_v29, %v1384_v6  ;;  %v1392_v24 = vmul.f32 %v1390_v12, %v2544_v63  ;;  %v1393_v3 = vmul.f32 %v1390_v12, %v2541_v56  ;;  %v1394_v36 = vmul.f32 %v1390_v12, %v2546_v2 }
 0x1bd   :  { %v1395_v5 = vmul.f32 %v1390_v12, %v2551_v62  ;;  %v1396_v32 = vmul.f32 %v1390_v12, %v2555_v21  ;;  %v1397_v20 = vmul.f32 %v1390_v12, %v2559_v27  ;;  %v1398_v26 = vmul.f32 %v1390_v12, %v2563_v34 }
 0x1be   :  { %v1399_v9 = vmul.f32 %v1390_v12, %v2567_v39  ;;  %v1400_v33 = vmul.f32 %v1390_v12, %v2571_v52  ;;  %v1401_v43 = vmul.f32 %v1390_v12, %v2575_v22  ;;  %v1402_v63 = vmul.f32 %v1390_v12, %v2579_v53 }
 0x1bf   :  { %v1403_v56 = vmul.f32 %v1390_v12, %v2583_v10  ;;  %v1412_v11 = vrot.slane %v1385_v14, %v1389_v8  ;;  %v1404_v2 = vmul.f32 %v1390_v12, %v2591_v18  ;;  %v1405_v62 = vmul.f32 %v1390_v12, %v2594_v25 }
 0x1c0   :  { %v1406_v21 = vmul.f32 %v1390_v12, %v2598_v51  ;;  %v1407_v27 = vmul.f32 %v1390_v12, %v2602_v19 }
 0x1c1   :  { %v1414_v34 = vadd.f32 %v1412_v11, %v1392_v24  ;;  %v1415_v40 = vadd.f32 %v1412_v11, %v1393_v3  ;;  %v1416_v39 = vadd.f32 %v1412_v11, %v1394_v36  ;;  %v1417_v30 = vadd.f32 %v1412_v11, %v1395_v5 }
 0x1c2   :  { %v1418_v52 = vadd.f32 %v1412_v11, %v1396_v32  ;;  %v1419_v46 = vadd.f32 %v1412_v11, %v1397_v20  ;;  %v1420_v22 = vadd.f32 %v1412_v11, %v1398_v26  ;;  %v1421_v49 = vadd.f32 %v1412_v11, %v1399_v9 }
 0x1c3   :  { %v1422_v53 = vadd.f32 %v1412_v11, %v1400_v33  ;;  %v1423_v31 = vadd.f32 %v1412_v11, %v1401_v43  ;;  %v1424_v10 = vadd.f32 %v1412_v11, %v1402_v63  ;;  %v1425_v47 = vadd.f32 %v1412_v11, %v1403_v56 }
 0x1c4   :  { %v1426_v13 = vadd.f32 %v1412_v11, %v1404_v2  ;;  %v1427_v18 = vadd.f32 %v1412_v11, %v1405_v62  ;;  %v1428_v50 = vadd.f32 %v1412_v11, %v1406_v21  ;;  %v1429_v25 = vadd.f32 %v1412_v11, %v1407_v27 }
 0x1c5   :  { %vm1430_vm0 = vcmp.gt.f32.partialorder %v1414_v34, 0.0  ;;  %vm1431_vm1 = vcmp.gt.f32.partialorder %v1415_v40, 0.0  ;;  %vm1432_vm2 = vcmp.gt.f32.partialorder %v1416_v39, 0.0  ;;  %vm1433_vm3 = vcmp.gt.f32.partialorder %v1417_v30, 0.0 }
 0x1c6   :  { %vm1434_vm4 = vcmp.gt.f32.partialorder %v1418_v52, 0.0  ;;  %vm1435_vm5 = vcmp.gt.f32.partialorder %v1419_v46, 0.0  ;;  %vm1436_vm6 = vcmp.gt.f32.partialorder %v1420_v22, 0.0  ;;  %vm1437_vm7 = vcmp.gt.f32.partialorder %v1421_v49, 0.0 }
 0x1c7   :  { %vm1438_vm8 = vcmp.gt.f32.partialorder %v1422_v53, 0.0  ;;  %vm1439_vm9 = vcmp.gt.f32.partialorder %v1423_v31, 0.0  ;;  %vm1440_vm10 = vcmp.gt.f32.partialorder %v1424_v10, 0.0  ;;  %vm1441_vm11 = vcmp.gt.f32.partialorder %v1425_v47, 0.0 }
 0x1c8   :  { %vm1442_vm12 = vcmp.gt.f32.partialorder %v1426_v13, 0.0  ;;  %vm1443_vm13 = vcmp.gt.f32.partialorder %v1427_v18, 0.0  ;;  %vm1444_vm14 = vcmp.gt.f32.partialorder %v1428_v50, 0.0  ;;  %vm1445_vm15 = vcmp.gt.f32.partialorder %v1429_v25, 0.0 }
 0x1c9   :  { %v1446_v51 = vmul.f32 0.2, %v1414_v34  ;;  %v1447_v19 = vmul.f32 0.2, %v1415_v40  ;;  %v1448_v17 = vmul.f32 0.2, %v1416_v39 }
 0x1ca   :  { %v1449_v35 = vmul.f32 0.2, %v1417_v30  ;;  %v1450_v37 = vmul.f32 0.2, %v1418_v52  ;;  %v1451_v38 = vmul.f32 0.2, %v1419_v46 }
 0x1cb   :  { %v1452_v48 = vmul.f32 0.2, %v1420_v22  ;;  %v1453_v23 = vmul.f32 0.2, %v1421_v49  ;;  %v1454_v57 = vmul.f32 0.2, %v1422_v53  ;;  %v1462_v42 = vsel %vm1430_vm0, %v1414_v34, %v1446_v51 }
 0x1cc   :  { %v1455_v44 = vmul.f32 0.2, %v1423_v31  ;;  %v1456_v45 = vmul.f32 0.2, %v1424_v10  ;;  %v1457_v28 = vmul.f32 0.2, %v1425_v47  ;;  %v1463_v0 = vsel %vm1431_vm1, %v1415_v40, %v1447_v19 }
 0x1cd   :  { %v1458_v59 = vmul.f32 0.2, %v1426_v13  ;;  %v1459_v61 = vmul.f32 0.2, %v1427_v18  ;;  %v1460_v15 = vmul.f32 0.2, %v1428_v50  ;;  %v1464_v58 = vsel %vm1432_vm2, %v1416_v39, %v1448_v17 }
 0x1ce   :  { %v1461_v41 = vmul.f32 0.2, %v1429_v25  ;;  %v1465_v7 = vsel %vm1433_vm3, %v1417_v30, %v1449_v35  ;;  %v1466_v54 = vsel %vm1434_vm4, %v1418_v52, %v1450_v37  ;;  %v1467_v60 = vsel %vm1435_vm5, %v1419_v46, %v1451_v38 }
 0x1cf   :  { %v1468_v4 = vsel %vm1436_vm6, %v1420_v22, %v1452_v48  ;;  %v1469_v1 = vsel %vm1437_vm7, %v1421_v49, %v1453_v23  ;;  %v1470_v8 = vsel %vm1438_vm8, %v1422_v53, %v1454_v57  ;;  %v1471_v16 = vsel %vm1439_vm9, %v1423_v31, %v1455_v44 }
 0x1d0   :  { %v1472_v55 = vsel %vm1440_vm10, %v1424_v10, %v1456_v45  ;;  %v1473_v29 = vsel %vm1441_vm11, %v1425_v47, %v1457_v28  ;;  %v1474_v6 = vsel %vm1442_vm12, %v1426_v13, %v1458_v59  ;;  %v1475_v12 = vsel %vm1443_vm13, %v1427_v18, %v1459_v61 }
 0x1d1   :  { %v1476_v14 = vsel %vm1444_vm14, %v1428_v50, %v1460_v15  ;;  %v1477_v24 = vsel %vm1445_vm15, %v1429_v25, %v1461_v41  ;;  %v1725_v3 = vpack.c.bf16 %v1463_v0, %v1462_v42  ;;  %v1730_v36 = vpack.c.bf16 %v1465_v7, %v1464_v58 }
 0x1d2   :  { %v1735_v5 = vpack.c.bf16 %v1467_v60, %v1466_v54  ;;  %v1740_v32 = vpack.c.bf16 %v1469_v1, %v1468_v4  ;;  %v1745_v20 = vpack.c.bf16 %v1471_v16, %v1470_v8  ;;  %v1750_v26 = vpack.c.bf16 %v1473_v29, %v1472_v55 }
 0x1d3   :  { %1726 = vst [vmem:[%s2706_s4] sm:$0xff] %v1725_v3   ;;  %1762 = vst [vmem:[%s2706_s4 + $0x8] sm:$0xff] %v1730_v36   ;;  %v1755_v9 = vpack.c.bf16 %v1475_v12, %v1474_v6  ;;  %v1760_v33 = vpack.c.bf16 %v1477_v24, %v1476_v14 }
 0x1d4   :  { %1763 = vst [vmem:[%s2706_s4 + $0x10] sm:$0xff] %v1735_v5   ;;  %1764 = vst [vmem:[%s2706_s4 + $0x18] sm:$0xff] %v1740_v32  }
 0x1d5   :  { %1765 = vst [vmem:[%s2706_s4 + $0x20] sm:$0xff] %v1745_v20   ;;  %1766 = vst [vmem:[%s2706_s4 + $0x28] sm:$0xff] %v1750_v26  }
 0x1d6   :  { %1767 = vst [vmem:[%s2706_s4 + $0x30] sm:$0xff] %v1755_v9   ;;  %1768 = vst [vmem:[%s2706_s4 + $0x38] sm:$0xff] %v1760_v33  }

// kernel: discriminator_forward.7
= control target key start
LH: loop header
LB: loop body
LE: loop exit
PB: predicated region body
PF: predicated region fallthrough
CT: control target
= control target key end

     0   :  { %s3735_s15 = smov 0   ;;  %s3737_s16 = smov 0   ;;  %s4565_s0 = inlined_call_operand.vmem [shape: bf16[32,2048], index: 0, kind: input, shape index: {}]   ;;  %s4566_s1 = inlined_call_operand.vmem [shape: bf16[2048,256], index: 1, kind: input, shape index: {}]   ;;  %s4567_s2 = inlined_call_operand.vmem [shape: f32[1,256], index: 2, kind: input, shape index: {}]   ;;  %s4568_s3 = inlined_call_operand.vmem [shape: f32[1,256], index: 3, kind: input, shape index: {}]   ;;  %s4569_s4 = inlined_call_operand.vmem [shape: bf16[32,256], index: 4, kind: output, shape index: {}]  }
   0x1   :  { %s3739_s17 = smov 0  }
   0x2 LB: > { %s3751_s18 = sadd.s32 4294967295, %s3708_s17   ;;  %s3754_s19 = sadd.s32 1, %s3708_s17   ;;  %s3708_s17 = sphi %s3739_s17, %s4573_s17   ;;  %s3704_s16 = sphi %s3737_s16, %s4572_s16   ;;  %s3700_s15 = sphi %s3735_s15, %s4571_s15  }
   0x3   : > { %s39_s20 = ssub.s32 %s3708_s17, %s3754_s19  ;;  %s42_s21 = sadd.s32 1, %s3704_s16 }
   0x4   : > { %p40_p0 = scmp.eq.s32.totalorder %s39_s20, 0  ;;  %p49_p1 = scmp.ne.s32.totalorder %s3704_s16, %s3700_s15 }
   0x5   : > { %p50_p2 = scmp.eq.s32.totalorder %s3708_s17, 0  ;;  %p131_p3 = scmp.eq.s32.totalorder %s3751_s18, 1 }
   0x6   : > { %s3764_s22 = scalar_select %p40_p0, %s3704_s16, %s42_s21  }
   0x7   : > { %p51_p4 = por %p50_p2, %p49_p1  ;;  %p3766_p5 = por %p131_p3, %p49_p1 }
   0x8   : > { %p3119_p6 = scmp.ge.s32.totalorder %s3708_s17, 2 }
   0xa   : > { %156 = sbr.rel (%p3119_p6) target bundleno = 189 (0xbd), region = 20 }
   0xf   : > { %159 = sbr.rel (!%p51_p4) target bundleno = 189 (0xbd), region = 24  ;;  %s161_s24 = sand.u32 (%p51_p4), 1, %s3704_s16  }
  0x10   : > { %s3121_s25 = sshll.u32 (%p51_p4), %s3708_s17, 2  ;;  %s3120_s26 = sshll.u32 (%p51_p4), %s161_s24, 10 }
  0x11   : > { %s3776_s29 = scalar_lea.vmem (%p51_p4), %s4566_s1, %s3121_s25  ;;  %s3780_s30 = scalar_lea.vmem (%p51_p4), [#allocation2], %s3120_s26 }
  0x12   : > { %v182_v0 = vld [vmem:[%s3776_s29] sm:$0xf] (%p51_p4)  ;;  %v184_v1 = vld [vmem:[%s3776_s29 + $0x8] sm:$0xf] (%p51_p4)  ;;  %v186_v2 = vld [vmem:[%s3776_s29 + $0x10] sm:$0xf] (%p51_p4) }
  0x13   : > { %183 = vst [vmem:[%s3780_s30] sm:$0xf] (%p51_p4), %v182_v0  ;;  %185 = vst [vmem:[%s3780_s30 + $0x4] sm:$0xf] (%p51_p4), %v184_v1  ;;  %v188_v3 = vld [vmem:[%s3776_s29 + $0x18] sm:$0xf] (%p51_p4) }
  0x14   : > { %v190_v4 = vld [vmem:[%s3776_s29 + $0x20] sm:$0xf]  ;;  %187 = vst [vmem:[%s3780_s30 + $0x8] sm:$0xf] %v186_v2  ;;  %189 = vst [vmem:[%s3780_s30 + $0xc] sm:$0xf] %v188_v3 }
  0x15   : > { %191 = vst [vmem:[%s3780_s30 + $0x10] sm:$0xf] %v190_v4  ;;  %v192_v5 = vld [vmem:[%s3776_s29 + $0x28] sm:$0xf]  ;;  %v194_v6 = vld [vmem:[%s3776_s29 + $0x30] sm:$0xf] }
  0x16   : > { %v196_v7 = vld [vmem:[%s3776_s29 + $0x38] sm:$0xf]  ;;  %193 = vst [vmem:[%s3780_s30 + $0x14] sm:$0xf] %v192_v5  ;;  %195 = vst [vmem:[%s3780_s30 + $0x18] sm:$0xf] %v194_v6 }
  0x17   : > { %197 = vst [vmem:[%s3780_s30 + $0x1c] sm:$0xf] %v196_v7  ;;  %v198_v8 = vld [vmem:[%s3776_s29 + $0x40] sm:$0xf]  ;;  %v200_v9 = vld [vmem:[%s3776_s29 + $0x48] sm:$0xf] }
  0x18   : > { %v202_v10 = vld [vmem:[%s3776_s29 + $0x50] sm:$0xf]  ;;  %199 = vst [vmem:[%s3780_s30 + $0x20] sm:$0xf] %v198_v8  ;;  %201 = vst [vmem:[%s3780_s30 + $0x24] sm:$0xf] %v200_v9 }
  0x19   : > { %203 = vst [vmem:[%s3780_s30 + $0x28] sm:$0xf] %v202_v10  ;;  %v204_v11 = vld [vmem:[%s3776_s29 + $0x58] sm:$0xf]  ;;  %v206_v12 = vld [vmem:[%s3776_s29 + $0x60] sm:$0xf] }
  0x1a   : > { %v208_v13 = vld [vmem:[%s3776_s29 + $0x68] sm:$0xf]  ;;  %205 = vst [vmem:[%s3780_s30 + $0x2c] sm:$0xf] %v204_v11  ;;  %207 = vst [vmem:[%s3780_s30 + $0x30] sm:$0xf] %v206_v12 }
  0x1b   : > { %209 = vst [vmem:[%s3780_s30 + $0x34] sm:$0xf] %v208_v13  ;;  %v210_v14 = vld [vmem:[%s3776_s29 + $0x70] sm:$0xf]  ;;  %v212_v15 = vld [vmem:[%s3776_s29 + $0x78] sm:$0xf] }
  0x1c   : > { %v214_v16 = vld [vmem:[%s3776_s29 + $0x80] sm:$0xf]  ;;  %211 = vst [vmem:[%s3780_s30 + $0x38] sm:$0xf] %v210_v14  ;;  %213 = vst [vmem:[%s3780_s30 + $0x3c] sm:$0xf] %v212_v15 }
  0x1d   : > { %215 = vst [vmem:[%s3780_s30 + $0x40] sm:$0xf] %v214_v16  ;;  %v216_v17 = vld [vmem:[%s3776_s29 + $0x88] sm:$0xf]  ;;  %v218_v18 = vld [vmem:[%s3776_s29 + $0x90] sm:$0xf] }
  0x1e   : > { %v220_v19 = vld [vmem:[%s3776_s29 + $0x98] sm:$0xf]  ;;  %217 = vst [vmem:[%s3780_s30 + $0x44] sm:$0xf] %v216_v17  ;;  %219 = vst [vmem:[%s3780_s30 + $0x48] sm:$0xf] %v218_v18 }
  0x1f   : > { %221 = vst [vmem:[%s3780_s30 + $0x4c] sm:$0xf] %v220_v19  ;;  %v222_v20 = vld [vmem:[%s3776_s29 + $0xa0] sm:$0xf]  ;;  %v224_v21 = vld [vmem:[%s3776_s29 + $0xa8] sm:$0xf] }
  0x20   : > { %v226_v22 = vld [vmem:[%s3776_s29 + $0xb0] sm:$0xf]  ;;  %223 = vst [vmem:[%s3780_s30 + $0x50] sm:$0xf] %v222_v20  ;;  %225 = vst [vmem:[%s3780_s30 + $0x54] sm:$0xf] %v224_v21 }
  0x21   : > { %227 = vst [vmem:[%s3780_s30 + $0x58] sm:$0xf] %v226_v22  ;;  %v228_v23 = vld [vmem:[%s3776_s29 + $0xb8] sm:$0xf]  ;;  %v230_v24 = vld [vmem:[%s3776_s29 + $0xc0] sm:$0xf] }
  0x22   : > { %v232_v25 = vld [vmem:[%s3776_s29 + $0xc8] sm:$0xf]  ;;  %229 = vst [vmem:[%s3780_s30 + $0x5c] sm:$0xf] %v228_v23  ;;  %231 = vst [vmem:[%s3780_s30 + $0x60] sm:$0xf] %v230_v24 }
  0x23   : > { %233 = vst [vmem:[%s3780_s30 + $0x64] sm:$0xf] %v232_v25  ;;  %v234_v26 = vld [vmem:[%s3776_s29 + $0xd0] sm:$0xf]  ;;  %v236_v27 = vld [vmem:[%s3776_s29 + $0xd8] sm:$0xf] }
  0x24   : > { %v238_v28 = vld [vmem:[%s3776_s29 + $0xe0] sm:$0xf]  ;;  %235 = vst [vmem:[%s3780_s30 + $0x68] sm:$0xf] %v234_v26  ;;  %237 = vst [vmem:[%s3780_s30 + $0x6c] sm:$0xf] %v236_v27 }
  0x25   : > { %239 = vst [vmem:[%s3780_s30 + $0x70] sm:$0xf] %v238_v28  ;;  %v240_v29 = vld [vmem:[%s3776_s29 + $0xe8] sm:$0xf]  ;;  %v242_v30 = vld [vmem:[%s3776_s29 + $0xf0] sm:$0xf] }
  0x26   : > { %v244_v31 = vld [vmem:[%s3776_s29 + $0xf8] sm:$0xf]  ;;  %241 = vst [vmem:[%s3780_s30 + $0x74] sm:$0xf] %v240_v29  ;;  %243 = vst [vmem:[%s3780_s30 + $0x78] sm:$0xf] %v242_v30 }
  0x27   : > { %245 = vst [vmem:[%s3780_s30 + $0x7c] sm:$0xf] %v244_v31  ;;  %v246_v32 = vld [vmem:[%s3776_s29 + $0x100] sm:$0xf]  ;;  %v248_v33 = vld [vmem:[%s3776_s29 + $0x108] sm:$0xf] }
  0x28   : > { %v250_v34 = vld [vmem:[%s3776_s29 + $0x110] sm:$0xf]  ;;  %247 = vst [vmem:[%s3780_s30 + $0x80] sm:$0xf] %v246_v32  ;;  %249 = vst [vmem:[%s3780_s30 + $0x84] sm:$0xf] %v248_v33 }
  0x29   : > { %251 = vst [vmem:[%s3780_s30 + $0x88] sm:$0xf] %v250_v34  ;;  %v252_v35 = vld [vmem:[%s3776_s29 + $0x118] sm:$0xf]  ;;  %v254_v36 = vld [vmem:[%s3776_s29 + $0x120] sm:$0xf] }
  0x2a   : > { %v256_v37 = vld [vmem:[%s3776_s29 + $0x128] sm:$0xf]  ;;  %253 = vst [vmem:[%s3780_s30 + $0x8c] sm:$0xf] %v252_v35  ;;  %255 = vst [vmem:[%s3780_s30 + $0x90] sm:$0xf] %v254_v36 }
  0x2b   : > { %257 = vst [vmem:[%s3780_s30 + $0x94] sm:$0xf] %v256_v37  ;;  %v258_v38 = vld [vmem:[%s3776_s29 + $0x130] sm:$0xf]  ;;  %v260_v39 = vld [vmem:[%s3776_s29 + $0x138] sm:$0xf] }
  0x2c   : > { %v262_v40 = vld [vmem:[%s3776_s29 + $0x140] sm:$0xf]  ;;  %259 = vst [vmem:[%s3780_s30 + $0x98] sm:$0xf] %v258_v38  ;;  %261 = vst [vmem:[%s3780_s30 + $0x9c] sm:$0xf] %v260_v39 }
  0x2d   : > { %263 = vst [vmem:[%s3780_s30 + $0xa0] sm:$0xf] %v262_v40  ;;  %v264_v41 = vld [vmem:[%s3776_s29 + $0x148] sm:$0xf]  ;;  %v266_v42 = vld [vmem:[%s3776_s29 + $0x150] sm:$0xf] }
  0x2e   : > { %v268_v43 = vld [vmem:[%s3776_s29 + $0x158] sm:$0xf]  ;;  %265 = vst [vmem:[%s3780_s30 + $0xa4] sm:$0xf] %v264_v41  ;;  %267 = vst [vmem:[%s3780_s30 + $0xa8] sm:$0xf] %v266_v42 }
  0x2f   : > { %269 = vst [vmem:[%s3780_s30 + $0xac] sm:$0xf] %v268_v43  ;;  %v270_v44 = vld [vmem:[%s3776_s29 + $0x160] sm:$0xf]  ;;  %v272_v45 = vld [vmem:[%s3776_s29 + $0x168] sm:$0xf] }
  0x30   : > { %v274_v46 = vld [vmem:[%s3776_s29 + $0x170] sm:$0xf]  ;;  %271 = vst [vmem:[%s3780_s30 + $0xb0] sm:$0xf] %v270_v44  ;;  %273 = vst [vmem:[%s3780_s30 + $0xb4] sm:$0xf] %v272_v45 }
  0x31   : > { %275 = vst [vmem:[%s3780_s30 + $0xb8] sm:$0xf] %v274_v46  ;;  %v276_v47 = vld [vmem:[%s3776_s29 + $0x178] sm:$0xf]  ;;  %v278_v48 = vld [vmem:[%s3776_s29 + $0x180] sm:$0xf] }
  0x32   : > { %v280_v49 = vld [vmem:[%s3776_s29 + $0x188] sm:$0xf]  ;;  %277 = vst [vmem:[%s3780_s30 + $0xbc] sm:$0xf] %v276_v47  ;;  %279 = vst [vmem:[%s3780_s30 + $0xc0] sm:$0xf] %v278_v48 }
  0x33   : > { %281 = vst [vmem:[%s3780_s30 + $0xc4] sm:$0xf] %v280_v49  ;;  %v282_v50 = vld [vmem:[%s3776_s29 + $0x190] sm:$0xf]  ;;  %v284_v51 = vld [vmem:[%s3776_s29 + $0x198] sm:$0xf] }
  0x34   : > { %v286_v52 = vld [vmem:[%s3776_s29 + $0x1a0] sm:$0xf]  ;;  %283 = vst [vmem:[%s3780_s30 + $0xc8] sm:$0xf] %v282_v50  ;;  %285 = vst [vmem:[%s3780_s30 + $0xcc] sm:$0xf] %v284_v51 }
  0x35   : > { %287 = vst [vmem:[%s3780_s30 + $0xd0] sm:$0xf] %v286_v52  ;;  %v288_v53 = vld [vmem:[%s3776_s29 + $0x1a8] sm:$0xf]  ;;  %v290_v54 = vld [vmem:[%s3776_s29 + $0x1b0] sm:$0xf] }
  0x36   : > { %v292_v55 = vld [vmem:[%s3776_s29 + $0x1b8] sm:$0xf]  ;;  %289 = vst [vmem:[%s3780_s30 + $0xd4] sm:$0xf] %v288_v53  ;;  %291 = vst [vmem:[%s3780_s30 + $0xd8] sm:$0xf] %v290_v54 }
  0x37   : > { %293 = vst [vmem:[%s3780_s30 + $0xdc] sm:$0xf] %v292_v55  ;;  %v294_v56 = vld [vmem:[%s3776_s29 + $0x1c0] sm:$0xf]  ;;  %v296_v57 = vld [vmem:[%s3776_s29 + $0x1c8] sm:$0xf] }
  0x38   : > { %v298_v58 = vld [vmem:[%s3776_s29 + $0x1d0] sm:$0xf]  ;;  %295 = vst [vmem:[%s3780_s30 + $0xe0] sm:$0xf] %v294_v56  ;;  %297 = vst [vmem:[%s3780_s30 + $0xe4] sm:$0xf] %v296_v57 }
  0x39   : > { %299 = vst [vmem:[%s3780_s30 + $0xe8] sm:$0xf] %v298_v58  ;;  %v300_v59 = vld [vmem:[%s3776_s29 + $0x1d8] sm:$0xf]  ;;  %v302_v60 = vld [vmem:[%s3776_s29 + $0x1e0] sm:$0xf] }
  0x3a   : > { %v304_v61 = vld [vmem:[%s3776_s29 + $0x1e8] sm:$0xf]  ;;  %301 = vst [vmem:[%s3780_s30 + $0xec] sm:$0xf] %v300_v59  ;;  %303 = vst [vmem:[%s3780_s30 + $0xf0] sm:$0xf] %v302_v60 }
  0x3b   : > { %305 = vst [vmem:[%s3780_s30 + $0xf4] sm:$0xf] %v304_v61  ;;  %v306_v62 = vld [vmem:[%s3776_s29 + $0x1f0] sm:$0xf]  ;;  %v308_v63 = vld [vmem:[%s3776_s29 + $0x1f8] sm:$0xf] }
  0x3c   : > { %v310_v0 = vld [vmem:[%s3776_s29 + $0x200] sm:$0xf]  ;;  %307 = vst [vmem:[%s3780_s30 + $0xf8] sm:$0xf] %v306_v62  ;;  %309 = vst [vmem:[%s3780_s30 + $0xfc] sm:$0xf] %v308_v63 }
  0x3d   : > { %311 = vst [vmem:[%s3780_s30 + $0x100] sm:$0xf] %v310_v0  ;;  %v312_v1 = vld [vmem:[%s3776_s29 + $0x208] sm:$0xf]  ;;  %v314_v2 = vld [vmem:[%s3776_s29 + $0x210] sm:$0xf] }
  0x3e   : > { %v316_v3 = vld [vmem:[%s3776_s29 + $0x218] sm:$0xf]  ;;  %313 = vst [vmem:[%s3780_s30 + $0x104] sm:$0xf] %v312_v1  ;;  %315 = vst [vmem:[%s3780_s30 + $0x108] sm:$0xf] %v314_v2 }
  0x3f   : > { %317 = vst [vmem:[%s3780_s30 + $0x10c] sm:$0xf] %v316_v3  ;;  %v318_v4 = vld [vmem:[%s3776_s29 + $0x220] sm:$0xf]  ;;  %v320_v5 = vld [vmem:[%s3776_s29 + $0x228] sm:$0xf] }
  0x40   : > { %v322_v6 = vld [vmem:[%s3776_s29 + $0x230] sm:$0xf]  ;;  %319 = vst [vmem:[%s3780_s30 + $0x110] sm:$0xf] %v318_v4  ;;  %321 = vst [vmem:[%s3780_s30 + $0x114] sm:$0xf] %v320_v5 }
  0x41   : > { %323 = vst [vmem:[%s3780_s30 + $0x118] sm:$0xf] %v322_v6  ;;  %v324_v7 = vld [vmem:[%s3776_s29 + $0x238] sm:$0xf]  ;;  %v326_v8 = vld [vmem:[%s3776_s29 + $0x240] sm:$0xf] }
  0x42   : > { %v328_v9 = vld [vmem:[%s3776_s29 + $0x248] sm:$0xf]  ;;  %325 = vst [vmem:[%s3780_s30 + $0x11c] sm:$0xf] %v324_v7  ;;  %327 = vst [vmem:[%s3780_s30 + $0x120] sm:$0xf] %v326_v8 }
  0x43   : > { %329 = vst [vmem:[%s3780_s30 + $0x124] sm:$0xf] %v328_v9  ;;  %v330_v10 = vld [vmem:[%s3776_s29 + $0x250] sm:$0xf]  ;;  %v332_v11 = vld [vmem:[%s3776_s29 + $0x258] sm:$0xf] }
  0x44   : > { %v334_v12 = vld [vmem:[%s3776_s29 + $0x260] sm:$0xf]  ;;  %331 = vst [vmem:[%s3780_s30 + $0x128] sm:$0xf] %v330_v10  ;;  %333 = vst [vmem:[%s3780_s30 + $0x12c] sm:$0xf] %v332_v11 }
  0x45   : > { %335 = vst [vmem:[%s3780_s30 + $0x130] sm:$0xf] %v334_v12  ;;  %v336_v13 = vld [vmem:[%s3776_s29 + $0x268] sm:$0xf]  ;;  %v338_v14 = vld [vmem:[%s3776_s29 + $0x270] sm:$0xf] }
  0x46   : > { %v340_v15 = vld [vmem:[%s3776_s29 + $0x278] sm:$0xf]  ;;  %337 = vst [vmem:[%s3780_s30 + $0x134] sm:$0xf] %v336_v13  ;;  %339 = vst [vmem:[%s3780_s30 + $0x138] sm:$0xf] %v338_v14 }
  0x47   : > { %341 = vst [vmem:[%s3780_s30 + $0x13c] sm:$0xf] %v340_v15  ;;  %v342_v16 = vld [vmem:[%s3776_s29 + $0x280] sm:$0xf]  ;;  %v344_v17 = vld [vmem:[%s3776_s29 + $0x288] sm:$0xf] }
  0x48   : > { %v346_v18 = vld [vmem:[%s3776_s29 + $0x290] sm:$0xf]  ;;  %343 = vst [vmem:[%s3780_s30 + $0x140] sm:$0xf] %v342_v16  ;;  %345 = vst [vmem:[%s3780_s30 + $0x144] sm:$0xf] %v344_v17 }
  0x49   : > { %347 = vst [vmem:[%s3780_s30 + $0x148] sm:$0xf] %v346_v18  ;;  %v348_v19 = vld [vmem:[%s3776_s29 + $0x298] sm:$0xf]  ;;  %v350_v20 = vld [vmem:[%s3776_s29 + $0x2a0] sm:$0xf] }
  0x4a   : > { %v352_v21 = vld [vmem:[%s3776_s29 + $0x2a8] sm:$0xf]  ;;  %349 = vst [vmem:[%s3780_s30 + $0x14c] sm:$0xf] %v348_v19  ;;  %351 = vst [vmem:[%s3780_s30 + $0x150] sm:$0xf] %v350_v20 }
  0x4b   : > { %353 = vst [vmem:[%s3780_s30 + $0x154] sm:$0xf] %v352_v21  ;;  %v354_v22 = vld [vmem:[%s3776_s29 + $0x2b0] sm:$0xf]  ;;  %v356_v23 = vld [vmem:[%s3776_s29 + $0x2b8] sm:$0xf] }
  0x4c   : > { %v358_v24 = vld [vmem:[%s3776_s29 + $0x2c0] sm:$0xf]  ;;  %355 = vst [vmem:[%s3780_s30 + $0x158] sm:$0xf] %v354_v22  ;;  %357 = vst [vmem:[%s3780_s30 + $0x15c] sm:$0xf] %v356_v23 }
  0x4d   : > { %359 = vst [vmem:[%s3780_s30 + $0x160] sm:$0xf] %v358_v24  ;;  %v360_v25 = vld [vmem:[%s3776_s29 + $0x2c8] sm:$0xf]  ;;  %v362_v26 = vld [vmem:[%s3776_s29 + $0x2d0] sm:$0xf] }
  0x4e   : > { %v364_v27 = vld [vmem:[%s3776_s29 + $0x2d8] sm:$0xf]  ;;  %361 = vst [vmem:[%s3780_s30 + $0x164] sm:$0xf] %v360_v25  ;;  %363 = vst [vmem:[%s3780_s30 + $0x168] sm:$0xf] %v362_v26 }
  0x4f   : > { %365 = vst [vmem:[%s3780_s30 + $0x16c] sm:$0xf] %v364_v27  ;;  %v366_v28 = vld [vmem:[%s3776_s29 + $0x2e0] sm:$0xf]  ;;  %v368_v29 = vld [vmem:[%s3776_s29 + $0x2e8] sm:$0xf] }
  0x50   : > { %v370_v30 = vld [vmem:[%s3776_s29 + $0x2f0] sm:$0xf]  ;;  %367 = vst [vmem:[%s3780_s30 + $0x170] sm:$0xf] %v366_v28  ;;  %369 = vst [vmem:[%s3780_s30 + $0x174] sm:$0xf] %v368_v29 }
  0x51   : > { %371 = vst [vmem:[%s3780_s30 + $0x178] sm:$0xf] %v370_v30  ;;  %v372_v31 = vld [vmem:[%s3776_s29 + $0x2f8] sm:$0xf]  ;;  %v374_v32 = vld [vmem:[%s3776_s29 + $0x300] sm:$0xf] }
  0x52   : > { %v376_v33 = vld [vmem:[%s3776_s29 + $0x308] sm:$0xf]  ;;  %373 = vst [vmem:[%s3780_s30 + $0x17c] sm:$0xf] %v372_v31  ;;  %375 = vst [vmem:[%s3780_s30 + $0x180] sm:$0xf] %v374_v32 }
  0x53   : > { %377 = vst [vmem:[%s3780_s30 + $0x184] sm:$0xf] %v376_v33  ;;  %v378_v34 = vld [vmem:[%s3776_s29 + $0x310] sm:$0xf]  ;;  %v380_v35 = vld [vmem:[%s3776_s29 + $0x318] sm:$0xf] }
  0x54   : > { %v382_v36 = vld [vmem:[%s3776_s29 + $0x320] sm:$0xf]  ;;  %379 = vst [vmem:[%s3780_s30 + $0x188] sm:$0xf] %v378_v34  ;;  %381 = vst [vmem:[%s3780_s30 + $0x18c] sm:$0xf] %v380_v35 }
  0x55   : > { %383 = vst [vmem:[%s3780_s30 + $0x190] sm:$0xf] %v382_v36  ;;  %v384_v37 = vld [vmem:[%s3776_s29 + $0x328] sm:$0xf]  ;;  %v386_v38 = vld [vmem:[%s3776_s29 + $0x330] sm:$0xf] }
  0x56   : > { %v388_v39 = vld [vmem:[%s3776_s29 + $0x338] sm:$0xf]  ;;  %385 = vst [vmem:[%s3780_s30 + $0x194] sm:$0xf] %v384_v37  ;;  %387 = vst [vmem:[%s3780_s30 + $0x198] sm:$0xf] %v386_v38 }
  0x57   : > { %389 = vst [vmem:[%s3780_s30 + $0x19c] sm:$0xf] %v388_v39  ;;  %v390_v40 = vld [vmem:[%s3776_s29 + $0x340] sm:$0xf]  ;;  %v392_v41 = vld [vmem:[%s3776_s29 + $0x348] sm:$0xf] }
  0x58   : > { %v394_v42 = vld [vmem:[%s3776_s29 + $0x350] sm:$0xf]  ;;  %391 = vst [vmem:[%s3780_s30 + $0x1a0] sm:$0xf] %v390_v40  ;;  %393 = vst [vmem:[%s3780_s30 + $0x1a4] sm:$0xf] %v392_v41 }
  0x59   : > { %395 = vst [vmem:[%s3780_s30 + $0x1a8] sm:$0xf] %v394_v42  ;;  %v396_v43 = vld [vmem:[%s3776_s29 + $0x358] sm:$0xf]  ;;  %v398_v44 = vld [vmem:[%s3776_s29 + $0x360] sm:$0xf] }
  0x5a   : > { %v400_v45 = vld [vmem:[%s3776_s29 + $0x368] sm:$0xf]  ;;  %397 = vst [vmem:[%s3780_s30 + $0x1ac] sm:$0xf] %v396_v43  ;;  %399 = vst [vmem:[%s3780_s30 + $0x1b0] sm:$0xf] %v398_v44 }
  0x5b   : > { %401 = vst [vmem:[%s3780_s30 + $0x1b4] sm:$0xf] %v400_v45  ;;  %v402_v46 = vld [vmem:[%s3776_s29 + $0x370] sm:$0xf]  ;;  %v404_v47 = vld [vmem:[%s3776_s29 + $0x378] sm:$0xf] }
  0x5c   : > { %v406_v48 = vld [vmem:[%s3776_s29 + $0x380] sm:$0xf]  ;;  %403 = vst [vmem:[%s3780_s30 + $0x1b8] sm:$0xf] %v402_v46  ;;  %405 = vst [vmem:[%s3780_s30 + $0x1bc] sm:$0xf] %v404_v47 }
  0x5d   : > { %407 = vst [vmem:[%s3780_s30 + $0x1c0] sm:$0xf] %v406_v48  ;;  %v408_v49 = vld [vmem:[%s3776_s29 + $0x388] sm:$0xf]  ;;  %v410_v50 = vld [vmem:[%s3776_s29 + $0x390] sm:$0xf] }
  0x5e   : > { %v412_v51 = vld [vmem:[%s3776_s29 + $0x398] sm:$0xf]  ;;  %409 = vst [vmem:[%s3780_s30 + $0x1c4] sm:$0xf] %v408_v49  ;;  %411 = vst [vmem:[%s3780_s30 + $0x1c8] sm:$0xf] %v410_v50 }
  0x5f   : > { %413 = vst [vmem:[%s3780_s30 + $0x1cc] sm:$0xf] %v412_v51  ;;  %v414_v52 = vld [vmem:[%s3776_s29 + $0x3a0] sm:$0xf]  ;;  %v416_v53 = vld [vmem:[%s3776_s29 + $0x3a8] sm:$0xf] }
  0x60   : > { %v418_v54 = vld [vmem:[%s3776_s29 + $0x3b0] sm:$0xf]  ;;  %415 = vst [vmem:[%s3780_s30 + $0x1d0] sm:$0xf] %v414_v52  ;;  %417 = vst [vmem:[%s3780_s30 + $0x1d4] sm:$0xf] %v416_v53 }
  0x61   : > { %419 = vst [vmem:[%s3780_s30 + $0x1d8] sm:$0xf] %v418_v54  ;;  %v420_v55 = vld [vmem:[%s3776_s29 + $0x3b8] sm:$0xf]  ;;  %v422_v56 = vld [vmem:[%s3776_s29 + $0x3c0] sm:$0xf] }
  0x62   : > { %v424_v57 = vld [vmem:[%s3776_s29 + $0x3c8] sm:$0xf]  ;;  %421 = vst [vmem:[%s3780_s30 + $0x1dc] sm:$0xf] %v420_v55  ;;  %423 = vst [vmem:[%s3780_s30 + $0x1e0] sm:$0xf] %v422_v56 }
  0x63   : > { %425 = vst [vmem:[%s3780_s30 + $0x1e4] sm:$0xf] %v424_v57  ;;  %v426_v58 = vld [vmem:[%s3776_s29 + $0x3d0] sm:$0xf]  ;;  %v428_v59 = vld [vmem:[%s3776_s29 + $0x3d8] sm:$0xf] }
  0x64   : > { %v430_v60 = vld [vmem:[%s3776_s29 + $0x3e0] sm:$0xf]  ;;  %427 = vst [vmem:[%s3780_s30 + $0x1e8] sm:$0xf] %v426_v58  ;;  %429 = vst [vmem:[%s3780_s30 + $0x1ec] sm:$0xf] %v428_v59 }
  0x65   : > { %431 = vst [vmem:[%s3780_s30 + $0x1f0] sm:$0xf] %v430_v60  ;;  %v432_v61 = vld [vmem:[%s3776_s29 + $0x3e8] sm:$0xf]  ;;  %v434_v62 = vld [vmem:[%s3776_s29 + $0x3f0] sm:$0xf] }
  0x66   : > { %v436_v63 = vld [vmem:[%s3776_s29 + $0x3f8] sm:$0xf]  ;;  %433 = vst [vmem:[%s3780_s30 + $0x1f4] sm:$0xf] %v432_v61  ;;  %435 = vst [vmem:[%s3780_s30 + $0x1f8] sm:$0xf] %v434_v62 }
  0x67   : > { %437 = vst [vmem:[%s3780_s30 + $0x1fc] sm:$0xf] %v436_v63  ;;  %v438_v0 = vld [vmem:[%s3776_s29 + $0x400] sm:$0xf]  ;;  %v440_v1 = vld [vmem:[%s3776_s29 + $0x408] sm:$0xf] }
  0x68   : > { %v442_v2 = vld [vmem:[%s3776_s29 + $0x410] sm:$0xf]  ;;  %439 = vst [vmem:[%s3780_s30 + $0x200] sm:$0xf] %v438_v0  ;;  %441 = vst [vmem:[%s3780_s30 + $0x204] sm:$0xf] %v440_v1 }
  0x69   : > { %443 = vst [vmem:[%s3780_s30 + $0x208] sm:$0xf] %v442_v2  ;;  %v444_v3 = vld [vmem:[%s3776_s29 + $0x418] sm:$0xf]  ;;  %v446_v4 = vld [vmem:[%s3776_s29 + $0x420] sm:$0xf] }
  0x6a   : > { %v448_v5 = vld [vmem:[%s3776_s29 + $0x428] sm:$0xf]  ;;  %445 = vst [vmem:[%s3780_s30 + $0x20c] sm:$0xf] %v444_v3  ;;  %447 = vst [vmem:[%s3780_s30 + $0x210] sm:$0xf] %v446_v4 }
  0x6b   : > { %449 = vst [vmem:[%s3780_s30 + $0x214] sm:$0xf] %v448_v5  ;;  %v450_v6 = vld [vmem:[%s3776_s29 + $0x430] sm:$0xf]  ;;  %v452_v7 = vld [vmem:[%s3776_s29 + $0x438] sm:$0xf] }
  0x6c   : > { %v454_v8 = vld [vmem:[%s3776_s29 + $0x440] sm:$0xf]  ;;  %451 = vst [vmem:[%s3780_s30 + $0x218] sm:$0xf] %v450_v6  ;;  %453 = vst [vmem:[%s3780_s30 + $0x21c] sm:$0xf] %v452_v7 }
  0x6d   : > { %455 = vst [vmem:[%s3780_s30 + $0x220] sm:$0xf] %v454_v8  ;;  %v456_v9 = vld [vmem:[%s3776_s29 + $0x448] sm:$0xf]  ;;  %v458_v10 = vld [vmem:[%s3776_s29 + $0x450] sm:$0xf] }
  0x6e   : > { %v460_v11 = vld [vmem:[%s3776_s29 + $0x458] sm:$0xf]  ;;  %457 = vst [vmem:[%s3780_s30 + $0x224] sm:$0xf] %v456_v9  ;;  %459 = vst [vmem:[%s3780_s30 + $0x228] sm:$0xf] %v458_v10 }
  0x6f   : > { %461 = vst [vmem:[%s3780_s30 + $0x22c] sm:$0xf] %v460_v11  ;;  %v462_v12 = vld [vmem:[%s3776_s29 + $0x460] sm:$0xf]  ;;  %v464_v13 = vld [vmem:[%s3776_s29 + $0x468] sm:$0xf] }
  0x70   : > { %v466_v14 = vld [vmem:[%s3776_s29 + $0x470] sm:$0xf]  ;;  %463 = vst [vmem:[%s3780_s30 + $0x230] sm:$0xf] %v462_v12  ;;  %465 = vst [vmem:[%s3780_s30 + $0x234] sm:$0xf] %v464_v13 }
  0x71   : > { %467 = vst [vmem:[%s3780_s30 + $0x238] sm:$0xf] %v466_v14  ;;  %v468_v15 = vld [vmem:[%s3776_s29 + $0x478] sm:$0xf]  ;;  %v470_v16 = vld [vmem:[%s3776_s29 + $0x480] sm:$0xf] }
  0x72   : > { %v472_v17 = vld [vmem:[%s3776_s29 + $0x488] sm:$0xf]  ;;  %469 = vst [vmem:[%s3780_s30 + $0x23c] sm:$0xf] %v468_v15  ;;  %471 = vst [vmem:[%s3780_s30 + $0x240] sm:$0xf] %v470_v16 }
  0x73   : > { %473 = vst [vmem:[%s3780_s30 + $0x244] sm:$0xf] %v472_v17  ;;  %v474_v18 = vld [vmem:[%s3776_s29 + $0x490] sm:$0xf]  ;;  %v476_v19 = vld [vmem:[%s3776_s29 + $0x498] sm:$0xf] }
  0x74   : > { %v478_v20 = vld [vmem:[%s3776_s29 + $0x4a0] sm:$0xf]  ;;  %475 = vst [vmem:[%s3780_s30 + $0x248] sm:$0xf] %v474_v18  ;;  %477 = vst [vmem:[%s3780_s30 + $0x24c] sm:$0xf] %v476_v19 }
  0x75   : > { %479 = vst [vmem:[%s3780_s30 + $0x250] sm:$0xf] %v478_v20  ;;  %v480_v21 = vld [vmem:[%s3776_s29 + $0x4a8] sm:$0xf]  ;;  %v482_v22 = vld [vmem:[%s3776_s29 + $0x4b0] sm:$0xf] }
  0x76   : > { %v484_v23 = vld [vmem:[%s3776_s29 + $0x4b8] sm:$0xf]  ;;  %481 = vst [vmem:[%s3780_s30 + $0x254] sm:$0xf] %v480_v21  ;;  %483 = vst [vmem:[%s3780_s30 + $0x258] sm:$0xf] %v482_v22 }
  0x77   : > { %485 = vst [vmem:[%s3780_s30 + $0x25c] sm:$0xf] %v484_v23  ;;  %v486_v24 = vld [vmem:[%s3776_s29 + $0x4c0] sm:$0xf]  ;;  %v488_v25 = vld [vmem:[%s3776_s29 + $0x4c8] sm:$0xf] }
  0x78   : > { %v490_v26 = vld [vmem:[%s3776_s29 + $0x4d0] sm:$0xf]  ;;  %487 = vst [vmem:[%s3780_s30 + $0x260] sm:$0xf] %v486_v24  ;;  %489 = vst [vmem:[%s3780_s30 + $0x264] sm:$0xf] %v488_v25 }
  0x79   : > { %491 = vst [vmem:[%s3780_s30 + $0x268] sm:$0xf] %v490_v26  ;;  %v492_v27 = vld [vmem:[%s3776_s29 + $0x4d8] sm:$0xf]  ;;  %v494_v28 = vld [vmem:[%s3776_s29 + $0x4e0] sm:$0xf] }
  0x7a   : > { %v496_v29 = vld [vmem:[%s3776_s29 + $0x4e8] sm:$0xf]  ;;  %493 = vst [vmem:[%s3780_s30 + $0x26c] sm:$0xf] %v492_v27  ;;  %495 = vst [vmem:[%s3780_s30 + $0x270] sm:$0xf] %v494_v28 }
  0x7b   : > { %497 = vst [vmem:[%s3780_s30 + $0x274] sm:$0xf] %v496_v29  ;;  %v498_v30 = vld [vmem:[%s3776_s29 + $0x4f0] sm:$0xf]  ;;  %v500_v31 = vld [vmem:[%s3776_s29 + $0x4f8] sm:$0xf] }
  0x7c   : > { %v502_v32 = vld [vmem:[%s3776_s29 + $0x500] sm:$0xf]  ;;  %499 = vst [vmem:[%s3780_s30 + $0x278] sm:$0xf] %v498_v30  ;;  %501 = vst [vmem:[%s3780_s30 + $0x27c] sm:$0xf] %v500_v31 }
  0x7d   : > { %503 = vst [vmem:[%s3780_s30 + $0x280] sm:$0xf] %v502_v32  ;;  %v504_v33 = vld [vmem:[%s3776_s29 + $0x508] sm:$0xf]  ;;  %v506_v34 = vld [vmem:[%s3776_s29 + $0x510] sm:$0xf] }
  0x7e   : > { %v508_v35 = vld [vmem:[%s3776_s29 + $0x518] sm:$0xf]  ;;  %505 = vst [vmem:[%s3780_s30 + $0x284] sm:$0xf] %v504_v33  ;;  %507 = vst [vmem:[%s3780_s30 + $0x288] sm:$0xf] %v506_v34 }
  0x7f   : > { %509 = vst [vmem:[%s3780_s30 + $0x28c] sm:$0xf] %v508_v35  ;;  %v510_v36 = vld [vmem:[%s3776_s29 + $0x520] sm:$0xf]  ;;  %v512_v37 = vld [vmem:[%s3776_s29 + $0x528] sm:$0xf] }
  0x80   : > { %v514_v38 = vld [vmem:[%s3776_s29 + $0x530] sm:$0xf]  ;;  %511 = vst [vmem:[%s3780_s30 + $0x290] sm:$0xf] %v510_v36  ;;  %513 = vst [vmem:[%s3780_s30 + $0x294] sm:$0xf] %v512_v37 }
  0x81   : > { %515 = vst [vmem:[%s3780_s30 + $0x298] sm:$0xf] %v514_v38  ;;  %v516_v39 = vld [vmem:[%s3776_s29 + $0x538] sm:$0xf]  ;;  %v518_v40 = vld [vmem:[%s3776_s29 + $0x540] sm:$0xf] }
  0x82   : > { %v520_v41 = vld [vmem:[%s3776_s29 + $0x548] sm:$0xf]  ;;  %517 = vst [vmem:[%s3780_s30 + $0x29c] sm:$0xf] %v516_v39  ;;  %519 = vst [vmem:[%s3780_s30 + $0x2a0] sm:$0xf] %v518_v40 }
  0x83   : > { %521 = vst [vmem:[%s3780_s30 + $0x2a4] sm:$0xf] %v520_v41  ;;  %v522_v42 = vld [vmem:[%s3776_s29 + $0x550] sm:$0xf]  ;;  %v524_v43 = vld [vmem:[%s3776_s29 + $0x558] sm:$0xf] }
  0x84   : > { %v526_v44 = vld [vmem:[%s3776_s29 + $0x560] sm:$0xf]  ;;  %523 = vst [vmem:[%s3780_s30 + $0x2a8] sm:$0xf] %v522_v42  ;;  %525 = vst [vmem:[%s3780_s30 + $0x2ac] sm:$0xf] %v524_v43 }
  0x85   : > { %527 = vst [vmem:[%s3780_s30 + $0x2b0] sm:$0xf] %v526_v44  ;;  %v528_v45 = vld [vmem:[%s3776_s29 + $0x568] sm:$0xf]  ;;  %v530_v46 = vld [vmem:[%s3776_s29 + $0x570] sm:$0xf] }
  0x86   : > { %v532_v47 = vld [vmem:[%s3776_s29 + $0x578] sm:$0xf]  ;;  %529 = vst [vmem:[%s3780_s30 + $0x2b4] sm:$0xf] %v528_v45  ;;  %531 = vst [vmem:[%s3780_s30 + $0x2b8] sm:$0xf] %v530_v46 }
  0x87   : > { %533 = vst [vmem:[%s3780_s30 + $0x2bc] sm:$0xf] %v532_v47  ;;  %v534_v48 = vld [vmem:[%s3776_s29 + $0x580] sm:$0xf]  ;;  %v536_v49 = vld [vmem:[%s3776_s29 + $0x588] sm:$0xf] }
  0x88   : > { %v538_v50 = vld [vmem:[%s3776_s29 + $0x590] sm:$0xf]  ;;  %535 = vst [vmem:[%s3780_s30 + $0x2c0] sm:$0xf] %v534_v48  ;;  %537 = vst [vmem:[%s3780_s30 + $0x2c4] sm:$0xf] %v536_v49 }
  0x89   : > { %539 = vst [vmem:[%s3780_s30 + $0x2c8] sm:$0xf] %v538_v50  ;;  %v540_v51 = vld [vmem:[%s3776_s29 + $0x598] sm:$0xf]  ;;  %v542_v52 = vld [vmem:[%s3776_s29 + $0x5a0] sm:$0xf] }
  0x8a   : > { %v544_v53 = vld [vmem:[%s3776_s29 + $0x5a8] sm:$0xf]  ;;  %541 = vst [vmem:[%s3780_s30 + $0x2cc] sm:$0xf] %v540_v51  ;;  %543 = vst [vmem:[%s3780_s30 + $0x2d0] sm:$0xf] %v542_v52 }
  0x8b   : > { %545 = vst [vmem:[%s3780_s30 + $0x2d4] sm:$0xf] %v544_v53  ;;  %v546_v54 = vld [vmem:[%s3776_s29 + $0x5b0] sm:$0xf]  ;;  %v548_v55 = vld [vmem:[%s3776_s29 + $0x5b8] sm:$0xf] }
  0x8c   : > { %v550_v56 = vld [vmem:[%s3776_s29 + $0x5c0] sm:$0xf]  ;;  %547 = vst [vmem:[%s3780_s30 + $0x2d8] sm:$0xf] %v546_v54  ;;  %549 = vst [vmem:[%s3780_s30 + $0x2dc] sm:$0xf] %v548_v55 }
  0x8d   : > { %551 = vst [vmem:[%s3780_s30 + $0x2e0] sm:$0xf] %v550_v56  ;;  %v552_v57 = vld [vmem:[%s3776_s29 + $0x5c8] sm:$0xf]  ;;  %v554_v58 = vld [vmem:[%s3776_s29 + $0x5d0] sm:$0xf] }
  0x8e   : > { %v556_v59 = vld [vmem:[%s3776_s29 + $0x5d8] sm:$0xf]  ;;  %553 = vst [vmem:[%s3780_s30 + $0x2e4] sm:$0xf] %v552_v57  ;;  %555 = vst [vmem:[%s3780_s30 + $0x2e8] sm:$0xf] %v554_v58 }
  0x8f   : > { %557 = vst [vmem:[%s3780_s30 + $0x2ec] sm:$0xf] %v556_v59  ;;  %v558_v60 = vld [vmem:[%s3776_s29 + $0x5e0] sm:$0xf]  ;;  %v560_v61 = vld [vmem:[%s3776_s29 + $0x5e8] sm:$0xf] }
  0x90   : > { %v562_v62 = vld [vmem:[%s3776_s29 + $0x5f0] sm:$0xf]  ;;  %559 = vst [vmem:[%s3780_s30 + $0x2f0] sm:$0xf] %v558_v60  ;;  %561 = vst [vmem:[%s3780_s30 + $0x2f4] sm:$0xf] %v560_v61 }
  0x91   : > { %563 = vst [vmem:[%s3780_s30 + $0x2f8] sm:$0xf] %v562_v62  ;;  %v564_v63 = vld [vmem:[%s3776_s29 + $0x5f8] sm:$0xf]  ;;  %v566_v0 = vld [vmem:[%s3776_s29 + $0x600] sm:$0xf] }
  0x92   : > { %v568_v1 = vld [vmem:[%s3776_s29 + $0x608] sm:$0xf]  ;;  %565 = vst [vmem:[%s3780_s30 + $0x2fc] sm:$0xf] %v564_v63  ;;  %567 = vst [vmem:[%s3780_s30 + $0x300] sm:$0xf] %v566_v0 }
  0x93   : > { %569 = vst [vmem:[%s3780_s30 + $0x304] sm:$0xf] %v568_v1  ;;  %v570_v2 = vld [vmem:[%s3776_s29 + $0x610] sm:$0xf]  ;;  %v572_v3 = vld [vmem:[%s3776_s29 + $0x618] sm:$0xf] }
  0x94   : > { %v574_v4 = vld [vmem:[%s3776_s29 + $0x620] sm:$0xf]  ;;  %571 = vst [vmem:[%s3780_s30 + $0x308] sm:$0xf] %v570_v2  ;;  %573 = vst [vmem:[%s3780_s30 + $0x30c] sm:$0xf] %v572_v3 }
  0x95   : > { %575 = vst [vmem:[%s3780_s30 + $0x310] sm:$0xf] %v574_v4  ;;  %v576_v5 = vld [vmem:[%s3776_s29 + $0x628] sm:$0xf]  ;;  %v578_v6 = vld [vmem:[%s3776_s29 + $0x630] sm:$0xf] }
  0x96   : > { %v580_v7 = vld [vmem:[%s3776_s29 + $0x638] sm:$0xf]  ;;  %577 = vst [vmem:[%s3780_s30 + $0x314] sm:$0xf] %v576_v5  ;;  %579 = vst [vmem:[%s3780_s30 + $0x318] sm:$0xf] %v578_v6 }
  0x97   : > { %581 = vst [vmem:[%s3780_s30 + $0x31c] sm:$0xf] %v580_v7  ;;  %v582_v8 = vld [vmem:[%s3776_s29 + $0x640] sm:$0xf]  ;;  %v584_v9 = vld [vmem:[%s3776_s29 + $0x648] sm:$0xf] }
  0x98   : > { %v586_v10 = vld [vmem:[%s3776_s29 + $0x650] sm:$0xf]  ;;  %583 = vst [vmem:[%s3780_s30 + $0x320] sm:$0xf] %v582_v8  ;;  %585 = vst [vmem:[%s3780_s30 + $0x324] sm:$0xf] %v584_v9 }
  0x99   : > { %587 = vst [vmem:[%s3780_s30 + $0x328] sm:$0xf] %v586_v10  ;;  %v588_v11 = vld [vmem:[%s3776_s29 + $0x658] sm:$0xf]  ;;  %v590_v12 = vld [vmem:[%s3776_s29 + $0x660] sm:$0xf] }
  0x9a   : > { %v592_v13 = vld [vmem:[%s3776_s29 + $0x668] sm:$0xf]  ;;  %589 = vst [vmem:[%s3780_s30 + $0x32c] sm:$0xf] %v588_v11  ;;  %591 = vst [vmem:[%s3780_s30 + $0x330] sm:$0xf] %v590_v12 }
  0x9b   : > { %593 = vst [vmem:[%s3780_s30 + $0x334] sm:$0xf] %v592_v13  ;;  %v594_v14 = vld [vmem:[%s3776_s29 + $0x670] sm:$0xf]  ;;  %v596_v15 = vld [vmem:[%s3776_s29 + $0x678] sm:$0xf] }
  0x9c   : > { %v598_v16 = vld [vmem:[%s3776_s29 + $0x680] sm:$0xf]  ;;  %595 = vst [vmem:[%s3780_s30 + $0x338] sm:$0xf] %v594_v14  ;;  %597 = vst [vmem:[%s3780_s30 + $0x33c] sm:$0xf] %v596_v15 }
  0x9d   : > { %599 = vst [vmem:[%s3780_s30 + $0x340] sm:$0xf] %v598_v16  ;;  %v600_v17 = vld [vmem:[%s3776_s29 + $0x688] sm:$0xf]  ;;  %v602_v18 = vld [vmem:[%s3776_s29 + $0x690] sm:$0xf] }
  0x9e   : > { %v604_v19 = vld [vmem:[%s3776_s29 + $0x698] sm:$0xf]  ;;  %601 = vst [vmem:[%s3780_s30 + $0x344] sm:$0xf] %v600_v17  ;;  %603 = vst [vmem:[%s3780_s30 + $0x348] sm:$0xf] %v602_v18 }
  0x9f   : > { %605 = vst [vmem:[%s3780_s30 + $0x34c] sm:$0xf] %v604_v19  ;;  %v606_v20 = vld [vmem:[%s3776_s29 + $0x6a0] sm:$0xf]  ;;  %v608_v21 = vld [vmem:[%s3776_s29 + $0x6a8] sm:$0xf] }
  0xa0   : > { %v610_v22 = vld [vmem:[%s3776_s29 + $0x6b0] sm:$0xf]  ;;  %607 = vst [vmem:[%s3780_s30 + $0x350] sm:$0xf] %v606_v20  ;;  %609 = vst [vmem:[%s3780_s30 + $0x354] sm:$0xf] %v608_v21 }
  0xa1   : > { %611 = vst [vmem:[%s3780_s30 + $0x358] sm:$0xf] %v610_v22  ;;  %v612_v23 = vld [vmem:[%s3776_s29 + $0x6b8] sm:$0xf]  ;;  %v614_v24 = vld [vmem:[%s3776_s29 + $0x6c0] sm:$0xf] }
  0xa2   : > { %v616_v25 = vld [vmem:[%s3776_s29 + $0x6c8] sm:$0xf]  ;;  %613 = vst [vmem:[%s3780_s30 + $0x35c] sm:$0xf] %v612_v23  ;;  %615 = vst [vmem:[%s3780_s30 + $0x360] sm:$0xf] %v614_v24 }
  0xa3   : > { %617 = vst [vmem:[%s3780_s30 + $0x364] sm:$0xf] %v616_v25  ;;  %v618_v26 = vld [vmem:[%s3776_s29 + $0x6d0] sm:$0xf]  ;;  %v620_v27 = vld [vmem:[%s3776_s29 + $0x6d8] sm:$0xf] }
  0xa4   : > { %v622_v28 = vld [vmem:[%s3776_s29 + $0x6e0] sm:$0xf]  ;;  %619 = vst [vmem:[%s3780_s30 + $0x368] sm:$0xf] %v618_v26  ;;  %621 = vst [vmem:[%s3780_s30 + $0x36c] sm:$0xf] %v620_v27 }
  0xa5   : > { %623 = vst [vmem:[%s3780_s30 + $0x370] sm:$0xf] %v622_v28  ;;  %v624_v29 = vld [vmem:[%s3776_s29 + $0x6e8] sm:$0xf]  ;;  %v626_v30 = vld [vmem:[%s3776_s29 + $0x6f0] sm:$0xf] }
  0xa6   : > { %v628_v31 = vld [vmem:[%s3776_s29 + $0x6f8] sm:$0xf]  ;;  %625 = vst [vmem:[%s3780_s30 + $0x374] sm:$0xf] %v624_v29  ;;  %627 = vst [vmem:[%s3780_s30 + $0x378] sm:$0xf] %v626_v30 }
  0xa7   : > { %629 = vst [vmem:[%s3780_s30 + $0x37c] sm:$0xf] %v628_v31  ;;  %v630_v32 = vld [vmem:[%s3776_s29 + $0x700] sm:$0xf]  ;;  %v632_v33 = vld [vmem:[%s3776_s29 + $0x708] sm:$0xf] }
  0xa8   : > { %v634_v34 = vld [vmem:[%s3776_s29 + $0x710] sm:$0xf]  ;;  %631 = vst [vmem:[%s3780_s30 + $0x380] sm:$0xf] %v630_v32  ;;  %633 = vst [vmem:[%s3780_s30 + $0x384] sm:$0xf] %v632_v33 }
  0xa9   : > { %635 = vst [vmem:[%s3780_s30 + $0x388] sm:$0xf] %v634_v34  ;;  %v636_v35 = vld [vmem:[%s3776_s29 + $0x718] sm:$0xf]  ;;  %v638_v36 = vld [vmem:[%s3776_s29 + $0x720] sm:$0xf] }
  0xaa   : > { %v640_v37 = vld [vmem:[%s3776_s29 + $0x728] sm:$0xf]  ;;  %637 = vst [vmem:[%s3780_s30 + $0x38c] sm:$0xf] %v636_v35  ;;  %639 = vst [vmem:[%s3780_s30 + $0x390] sm:$0xf] %v638_v36 }
  0xab   : > { %641 = vst [vmem:[%s3780_s30 + $0x394] sm:$0xf] %v640_v37  ;;  %v642_v38 = vld [vmem:[%s3776_s29 + $0x730] sm:$0xf]  ;;  %v644_v39 = vld [vmem:[%s3776_s29 + $0x738] sm:$0xf] }
  0xac   : > { %v646_v40 = vld [vmem:[%s3776_s29 + $0x740] sm:$0xf]  ;;  %643 = vst [vmem:[%s3780_s30 + $0x398] sm:$0xf] %v642_v38  ;;  %645 = vst [vmem:[%s3780_s30 + $0x39c] sm:$0xf] %v644_v39 }
  0xad   : > { %647 = vst [vmem:[%s3780_s30 + $0x3a0] sm:$0xf] %v646_v40  ;;  %v648_v41 = vld [vmem:[%s3776_s29 + $0x748] sm:$0xf]  ;;  %v650_v42 = vld [vmem:[%s3776_s29 + $0x750] sm:$0xf] }
  0xae   : > { %v652_v43 = vld [vmem:[%s3776_s29 + $0x758] sm:$0xf]  ;;  %649 = vst [vmem:[%s3780_s30 + $0x3a4] sm:$0xf] %v648_v41  ;;  %651 = vst [vmem:[%s3780_s30 + $0x3a8] sm:$0xf] %v650_v42 }
  0xaf   : > { %653 = vst [vmem:[%s3780_s30 + $0x3ac] sm:$0xf] %v652_v43  ;;  %v654_v44 = vld [vmem:[%s3776_s29 + $0x760] sm:$0xf]  ;;  %v656_v45 = vld [vmem:[%s3776_s29 + $0x768] sm:$0xf] }
  0xb0   : > { %v658_v46 = vld [vmem:[%s3776_s29 + $0x770] sm:$0xf]  ;;  %655 = vst [vmem:[%s3780_s30 + $0x3b0] sm:$0xf] %v654_v44  ;;  %657 = vst [vmem:[%s3780_s30 + $0x3b4] sm:$0xf] %v656_v45 }
  0xb1   : > { %659 = vst [vmem:[%s3780_s30 + $0x3b8] sm:$0xf] %v658_v46  ;;  %v660_v47 = vld [vmem:[%s3776_s29 + $0x778] sm:$0xf]  ;;  %v662_v48 = vld [vmem:[%s3776_s29 + $0x780] sm:$0xf] }
  0xb2   : > { %v664_v49 = vld [vmem:[%s3776_s29 + $0x788] sm:$0xf]  ;;  %661 = vst [vmem:[%s3780_s30 + $0x3bc] sm:$0xf] %v660_v47  ;;  %663 = vst [vmem:[%s3780_s30 + $0x3c0] sm:$0xf] %v662_v48 }
  0xb3   : > { %665 = vst [vmem:[%s3780_s30 + $0x3c4] sm:$0xf] %v664_v49  ;;  %v666_v50 = vld [vmem:[%s3776_s29 + $0x790] sm:$0xf]  ;;  %v668_v51 = vld [vmem:[%s3776_s29 + $0x798] sm:$0xf] }
  0xb4   : > { %v670_v52 = vld [vmem:[%s3776_s29 + $0x7a0] sm:$0xf]  ;;  %667 = vst [vmem:[%s3780_s30 + $0x3c8] sm:$0xf] %v666_v50  ;;  %669 = vst [vmem:[%s3780_s30 + $0x3cc] sm:$0xf] %v668_v51 }
  0xb5   : > { %671 = vst [vmem:[%s3780_s30 + $0x3d0] sm:$0xf] %v670_v52  ;;  %v672_v53 = vld [vmem:[%s3776_s29 + $0x7a8] sm:$0xf]  ;;  %v674_v54 = vld [vmem:[%s3776_s29 + $0x7b0] sm:$0xf] }
  0xb6   : > { %v676_v55 = vld [vmem:[%s3776_s29 + $0x7b8] sm:$0xf]  ;;  %673 = vst [vmem:[%s3780_s30 + $0x3d4] sm:$0xf] %v672_v53  ;;  %675 = vst [vmem:[%s3780_s30 + $0x3d8] sm:$0xf] %v674_v54 }
  0xb7   : > { %677 = vst [vmem:[%s3780_s30 + $0x3dc] sm:$0xf] %v676_v55  ;;  %v678_v56 = vld [vmem:[%s3776_s29 + $0x7c0] sm:$0xf]  ;;  %v680_v57 = vld [vmem:[%s3776_s29 + $0x7c8] sm:$0xf] }
  0xb8   : > { %v682_v58 = vld [vmem:[%s3776_s29 + $0x7d0] sm:$0xf]  ;;  %679 = vst [vmem:[%s3780_s30 + $0x3e0] sm:$0xf] %v678_v56  ;;  %681 = vst [vmem:[%s3780_s30 + $0x3e4] sm:$0xf] %v680_v57 }
  0xb9   : > { %683 = vst [vmem:[%s3780_s30 + $0x3e8] sm:$0xf] %v682_v58  ;;  %v684_v59 = vld [vmem:[%s3776_s29 + $0x7d8] sm:$0xf]  ;;  %v686_v60 = vld [vmem:[%s3776_s29 + $0x7e0] sm:$0xf] }
  0xba   : > { %v688_v61 = vld [vmem:[%s3776_s29 + $0x7e8] sm:$0xf]  ;;  %685 = vst [vmem:[%s3780_s30 + $0x3ec] sm:$0xf] %v684_v59  ;;  %687 = vst [vmem:[%s3780_s30 + $0x3f0] sm:$0xf] %v686_v60 }
  0xbb   : > { %689 = vst [vmem:[%s3780_s30 + $0x3f4] sm:$0xf] %v688_v61  ;;  %v690_v62 = vld [vmem:[%s3776_s29 + $0x7f0] sm:$0xf]  ;;  %v692_v63 = vld [vmem:[%s3776_s29 + $0x7f8] sm:$0xf] }
  0xbc   : > { %691 = vst [vmem:[%s3780_s30 + $0x3f8] sm:$0xf] %v690_v62  ;;  %693 = vst [vmem:[%s3780_s30 + $0x3fc] sm:$0xf] %v692_v63 }
  0xbd PF: > { %p3122_p7 = scmp.ge.s32.totalorder %s3708_s17, 1  ;;  %p1240_p8 = scmp.lt.s32.totalorder %s3708_s17, 3 }
  0xbf   : > { %p1241_p9 = pnand %p3122_p7, %p1240_p8 }
  0xc0   : > { %s1247_s5 = sand.u32 (!%p1241_p9), 1, %s3700_s15   ;;  %p1277_p10 = scmp.lt.s32.totalorder (!%p1241_p9), %s3751_s18, 1 }
  0xc1   : > { %1244 = sbr.rel (%p1241_p9) target bundleno = 624 (0x270), region = 73  ;;  %s3123_s12 = sshll.u32 (!%p1241_p9), %s1247_s5, 10 }
  0xc2   : > { %s4321_s17 = scalar_lea.vmem (!%p1241_p9), [#allocation2], %s3123_s12  ;;  %s3124_s30 = sshll.u32 (!%p1241_p9), %s1247_s5, 4 }
  0xc3   : > { %s1276_s6 = scalar_lea.vmem (!%p1241_p9), [#allocation3], %s3124_s30 }
  0xc6   : > { %v4298_v0 = vld [vmem:[%s4565_s0] sm:$0xff]  ;;  %v4308_v2 = vld [vmem:[%s4565_s0 + $0x8] sm:$0xff]  ;;  %v3556_v6 = vld [vmem:[%s4321_s17 + $0x78] sm:$0xff]   ;;  %s1278_s21 = scalar_select %p1277_p10, %s3751_s18, 1 }
  0xc7   : > { %v4303_v1 = vld [vmem:[%s4565_s0 + $0x40] sm:$0xff]  ;;  %v4317_v4 = vld [vmem:[%s4565_s0 + $0x48] sm:$0xff]  ;;  %v3557_v7 = vld [vmem:[%s4321_s17 + $0xf8] sm:$0xff]   ;;  %3308 = vmatprep.subr.bf16.mxu0 %v3556_v6  ;;  %s3290_s15 = sshll.u32 (%p3766_p5), %s3751_s18, 2 }
  0xc8   : > { %v3126_v3 = vcombine.high %v4298_v0, %v4303_v1  ;;  %v3128_v5 = vcombine.high %v4308_v2, %v4317_v4  ;;  %v3558_v8 = vld [vmem:[%s4321_s17 + $0x38] sm:$0xff]   ;;  %3336 = vmatprep.subr.bf16.mxu1 %v3557_v7  ;;  %v3560_v10 = vld [vmem:[%s4321_s17 + $0x70] sm:$0xff]   ;;  %v3564_v14 = vld [vmem:[%s4321_s17 + $0x68] sm:$0xff]   ;;  %v3125_v42 = vcombine.low %v4298_v0, %v4303_v1  ;;  %v3127_v43 = vcombine.low %v4308_v2, %v4317_v4  ;;  %s1279_s26 = scalar_lea.vmem %s4567_s2, %s1278_s21  ;;  %s1282_s29 = scalar_lea.vmem %s4568_s3, %s1278_s21 }
  0xc9   : > { %v3559_v9 = vld [vmem:[%s4321_s17 + $0xb8] sm:$0xff]   ;;  %3309 = vmatpush3.bf16.msra.mxu0 %v3558_v8  ;;  %v3561_v11 = vld [vmem:[%s4321_s17 + $0xf0] sm:$0xff]   ;;  %v3565_v15 = vld [vmem:[%s4321_s17 + $0xe8] sm:$0xff]   ;;  %s2988_s8 = scalar_lea.vmem (%p3766_p5), %s4569_s4, %s3290_s15 }
  0xca   : > { %2532 = vmatprep.mubr.bf16.mxu0 %v3126_v3  ;;  %2581 = vmatprep.mubr.bf16.mxu1 %v3128_v5  ;;  %v3562_v12 = vld [vmem:[%s4321_s17 + $0x30] sm:$0xff]   ;;  %v3566_v16 = vld [vmem:[%s4321_s17 + $0x28] sm:$0xff]   ;;  %v3568_v18 = vld [vmem:[%s4321_s17 + $0x60] sm:$0xff]  }
  0xcb   : > { %3337 = vmatpush3.bf16.msra.mxu1 %v3559_v9  ;;  %3310 = vmatprep.subr.bf16.mxu0 %v3560_v10  ;;  %v3563_v13 = vld [vmem:[%s4321_s17 + $0xb0] sm:$0xff]   ;;  %v3567_v17 = vld [vmem:[%s4321_s17 + $0xa8] sm:$0xff]   ;;  %v3569_v19 = vld [vmem:[%s4321_s17 + $0xe0] sm:$0xff]  }
  0xcc   : > { %3338 = vmatprep.subr.bf16.mxu1 %v3561_v11  ;;  %v3570_v20 = vld [vmem:[%s4321_s17 + $0x20] sm:$0xff]   ;;  %v3572_v22 = vld [vmem:[%s4321_s17 + $0x58] sm:$0xff]   ;;  %v3576_v26 = vld [vmem:[%s4321_s17 + $0x50] sm:$0xff]  }
  0xcd   : > { %3311 = vmatpush3.bf16.msra.mxu0 %v3562_v12  ;;  %v3571_v21 = vld [vmem:[%s4321_s17 + $0xa0] sm:$0xff]   ;;  %v3573_v23 = vld [vmem:[%s4321_s17 + $0xd8] sm:$0xff]   ;;  %v3577_v27 = vld [vmem:[%s4321_s17 + $0xd0] sm:$0xff]  }
  0xce   : > { %3312 = vmatprep.subr.bf16.mxu0 %v3564_v14  ;;  %v3574_v24 = vld [vmem:[%s4321_s17 + $0x18] sm:$0xff]   ;;  %v3578_v28 = vld [vmem:[%s4321_s17 + $0x10] sm:$0xff]   ;;  %v3580_v30 = vld [vmem:[%s4321_s17 + $0x48] sm:$0xff]  }
  0xcf   : > { %3339 = vmatpush3.bf16.msra.mxu1 %v3563_v13  ;;  %v3575_v25 = vld [vmem:[%s4321_s17 + $0x98] sm:$0xff]   ;;  %v3579_v29 = vld [vmem:[%s4321_s17 + $0x90] sm:$0xff]   ;;  %v3581_v31 = vld [vmem:[%s4321_s17 + $0xc8] sm:$0xff]  }
  0xd0   : > { %3340 = vmatprep.subr.bf16.mxu1 %v3565_v15  ;;  %v3582_v32 = vld [vmem:[%s4321_s17 + $0x8] sm:$0xff]   ;;  %v3584_v34 = vld [vmem:[%s4321_s17 + $0x40] sm:$0xff]   ;;  %v3588_v44 = vld [vmem:[%s4321_s17 + $0x178] sm:$0xff]  }
  0xd1   : > { %3313 = vmatpush3.bf16.msra.mxu0 %v3566_v16  ;;  %v3583_v33 = vld [vmem:[%s4321_s17 + $0x88] sm:$0xff]   ;;  %v1300_v35 = vld [vmem:[%s4565_s0 + $0x80] sm:$0xff]  ;;  %v3589_v45 = vld [vmem:[%s4321_s17 + $0x1f8] sm:$0xff]  }
  0xd2   : > { %3314 = vmatprep.subr.bf16.mxu0 %v3568_v18  ;;  %v1308_v36 = vld [vmem:[%s4565_s0 + $0xc0] sm:$0xff]  ;;  %v1301_v38 = vld [vmem:[%s4565_s0 + $0x88] sm:$0xff]  ;;  %v3590_v47 = vld [vmem:[%s4321_s17 + $0x138] sm:$0xff]  }
  0xd3   : > { %3341 = vmatpush3.bf16.msra.mxu1 %v3567_v17  ;;  %v3585_v37 = vld [vmem:[%s4321_s17 + $0xc0] sm:$0xff]   ;;  %v1309_v39 = vld [vmem:[%s4565_s0 + $0xc8] sm:$0xff]  ;;  %v3142_v46 = vcombine.high %v1300_v35, %v1308_v36  ;;  %v3591_v49 = vld [vmem:[%s4321_s17 + $0x1b8] sm:$0xff]   ;;  %v3141_v54 = vcombine.low %v1300_v35, %v1308_v36 }
  0xd4   : > { %3342 = vmatprep.subr.bf16.mxu1 %v3569_v19  ;;  %v3586_v40 = vld [vmem:[%s4321_s17] sm:$0xff]   ;;  %v3144_v48 = vcombine.high %v1301_v38, %v1309_v39  ;;  %v3592_v50 = vld [vmem:[%s4321_s17 + $0x170] sm:$0xff]   ;;  %v3596_v55 = vld [vmem:[%s4321_s17 + $0x168] sm:$0xff]   ;;  %v3143_v56 = vcombine.low %v1301_v38, %v1309_v39 }
  0xd5   : > { %3315 = vmatpush3.bf16.msra.mxu0 %v3570_v20  ;;  %v3587_v41 = vld [vmem:[%s4321_s17 + $0x80] sm:$0xff]   ;;  %v3593_v51 = vld [vmem:[%s4321_s17 + $0x1f0] sm:$0xff]   ;;  %v3597_v57 = vld [vmem:[%s4321_s17 + $0x1e8] sm:$0xff]  }
  0xd6   : > { %3316 = vmatprep.subr.bf16.mxu0 %v3572_v22  ;;  %v3594_v52 = vld [vmem:[%s4321_s17 + $0x130] sm:$0xff]   ;;  %v3598_v58 = vld [vmem:[%s4321_s17 + $0x128] sm:$0xff]   ;;  %v3600_v60 = vld [vmem:[%s4321_s17 + $0x160] sm:$0xff]  }
  0xd7   : > { %3343 = vmatpush3.bf16.msra.mxu1 %v3571_v21  ;;  %v3595_v53 = vld [vmem:[%s4321_s17 + $0x1b0] sm:$0xff]   ;;  %v3599_v59 = vld [vmem:[%s4321_s17 + $0x1a8] sm:$0xff]   ;;  %v3601_v61 = vld [vmem:[%s4321_s17 + $0x1e0] sm:$0xff]  }
  0xd8   : > { %3344 = vmatprep.subr.bf16.mxu1 %v3573_v23  ;;  %v3602_v62 = vld [vmem:[%s4321_s17 + $0x120] sm:$0xff]   ;;  %v3604_v0 = vld [vmem:[%s4321_s17 + $0x158] sm:$0xff]   ;;  %v3608_v4 = vld [vmem:[%s4321_s17 + $0x150] sm:$0xff]  }
  0xd9   : > { %3317 = vmatpush3.bf16.msra.mxu0 %v3574_v24  ;;  %v3603_v63 = vld [vmem:[%s4321_s17 + $0x1a0] sm:$0xff]   ;;  %v3605_v1 = vld [vmem:[%s4321_s17 + $0x1d8] sm:$0xff]   ;;  %v3609_v5 = vld [vmem:[%s4321_s17 + $0x1d0] sm:$0xff]  }
  0xda   : > { %3318 = vmatprep.subr.bf16.mxu0 %v3576_v26  ;;  %v3606_v2 = vld [vmem:[%s4321_s17 + $0x118] sm:$0xff]   ;;  %v3610_v6 = vld [vmem:[%s4321_s17 + $0x110] sm:$0xff]   ;;  %v3612_v8 = vld [vmem:[%s4321_s17 + $0x148] sm:$0xff]  }
  0xdb   : > { %3345 = vmatpush3.bf16.msra.mxu1 %v3575_v25  ;;  %v3607_v3 = vld [vmem:[%s4321_s17 + $0x198] sm:$0xff]   ;;  %v3611_v7 = vld [vmem:[%s4321_s17 + $0x190] sm:$0xff]   ;;  %v3613_v9 = vld [vmem:[%s4321_s17 + $0x1c8] sm:$0xff]  }
  0xdc   : > { %3346 = vmatprep.subr.bf16.mxu1 %v3577_v27  ;;  %v3614_v10 = vld [vmem:[%s4321_s17 + $0x108] sm:$0xff]   ;;  %v3616_v12 = vld [vmem:[%s4321_s17 + $0x140] sm:$0xff]   ;;  %v1286_v13 = vld [vmem:[%s4565_s0 + $0x10] sm:$0xff] }
  0xdd   : > { %3319 = vmatpush3.bf16.msra.mxu0 %v3578_v28  ;;  %v3615_v11 = vld [vmem:[%s4321_s17 + $0x188] sm:$0xff]   ;;  %v3617_v14 = vld [vmem:[%s4321_s17 + $0x1c0] sm:$0xff]   ;;  %v1294_v17 = vld [vmem:[%s4565_s0 + $0x50] sm:$0xff] }
  0xde   : > { %3320 = vmatprep.subr.bf16.mxu0 %v3580_v30  ;;  %v3618_v15 = vld [vmem:[%s4321_s17 + $0x100] sm:$0xff]   ;;  %v1287_v18 = vld [vmem:[%s4565_s0 + $0x18] sm:$0xff]  ;;  %v3129_v20 = vcombine.low %v1286_v13, %v1294_v17  ;;  %v3130_v21 = vcombine.high %v1286_v13, %v1294_v17  ;;  %v3624_v28 = vld [vmem:[%s4321_s17 + $0x270] sm:$0xff]  }
  0xdf   : > { %3347 = vmatpush3.bf16.msra.mxu1 %v3579_v29  ;;  %v3619_v16 = vld [vmem:[%s4321_s17 + $0x180] sm:$0xff]   ;;  %v1295_v19 = vld [vmem:[%s4565_s0 + $0x58] sm:$0xff]  ;;  %v3625_v29 = vld [vmem:[%s4321_s17 + $0x2f0] sm:$0xff]  }
  0xe0   : > { %3348 = vmatprep.subr.bf16.mxu1 %v3581_v31  ;;  %v3131_v22 = vcombine.low %v1287_v18, %v1295_v19  ;;  %v3132_v23 = vcombine.high %v1287_v18, %v1295_v19  ;;  %v3620_v24 = vld [vmem:[%s4321_s17 + $0x278] sm:$0xff]   ;;  %v3626_v30 = vld [vmem:[%s4321_s17 + $0x230] sm:$0xff]   ;;  %v3628_v36 = vld [vmem:[%s4321_s17 + $0x268] sm:$0xff]  }
  0xe1   : > { %3321 = vmatpush3.bf16.msra.mxu0 %v3582_v32  ;;  %v3621_v25 = vld [vmem:[%s4321_s17 + $0x2f8] sm:$0xff]   ;;  %v3627_v31 = vld [vmem:[%s4321_s17 + $0x2b0] sm:$0xff]   ;;  %v1312_v17 = vld [vmem:[%s4565_s0 + $0xe0] sm:$0xff] }
  0xe2   : > { %3322 = vmatprep.subr.bf16.mxu0 %v3584_v34  ;;  %v3622_v26 = vld [vmem:[%s4321_s17 + $0x238] sm:$0xff]   ;;  %v1302_v32 = vld [vmem:[%s4565_s0 + $0x90] sm:$0xff] }
  0xe3   : > { %3349 = vmatpush3.bf16.msra.mxu1 %v3583_v33  ;;  %v3623_v27 = vld [vmem:[%s4321_s17 + $0x2b8] sm:$0xff]   ;;  %v1310_v33 = vld [vmem:[%s4565_s0 + $0xd0] sm:$0xff] }
  0xe4   : > { %3350 = vmatprep.subr.bf16.mxu1 %v3585_v37  ;;  %v3146_v34 = vcombine.high %v1302_v32, %v1310_v33  ;;  %v3145_v35 = vcombine.low %v1302_v32, %v1310_v33  ;;  %v3629_v37 = vld [vmem:[%s4321_s17 + $0x2e8] sm:$0xff]   ;;  %v1303_v38 = vld [vmem:[%s4565_s0 + $0x98] sm:$0xff]  ;;  %v3657_v13 = vld [vmem:[%s4321_s17 + $0x3f0] sm:$0xff]  }
  0xe5   : > { %3323 = vmatpush3.bf16.msra.mxu0 %v3586_v40  ;;  %v1311_v39 = vld [vmem:[%s4565_s0 + $0xd8] sm:$0xff] }
  0xe6   : > { %3364 = vmatprep.subr.bf16.mxu0 %v3588_v44  ;;  %v3148_v40 = vcombine.high %v1303_v38, %v1311_v39  ;;  %v3632_v44 = vld [vmem:[%s4321_s17 + $0x260] sm:$0xff]   ;;  %v3668_v32 = vld [vmem:[%s4321_s17 + $0x358] sm:$0xff]  }
  0xe7   : > { %3351 = vmatpush3.bf16.msra.mxu1 %v3587_v41  ;;  %v3630_v41 = vld [vmem:[%s4321_s17 + $0x228] sm:$0xff]   ;;  %v3669_v33 = vld [vmem:[%s4321_s17 + $0x3d8] sm:$0xff]  }
  0xe8   : > { %2533 = vmatmul.mubr.bf16.vlgmr.msra.gmra.mxu0 %v3125_v42  ;;  %3392 = vmatprep.subr.bf16.mxu1 %v3589_v45  ;;  %v3147_v42 = vcombine.low %v1303_v38, %v1311_v39  ;;  %v3633_v45 = vld [vmem:[%s4321_s17 + $0x2e0] sm:$0xff]   ;;  %v3674_v38 = vld [vmem:[%s4321_s17 + $0x310] sm:$0xff]  }
  0xe9   : > { %3365 = vmatpush3.bf16.msra.mxu0 %v3590_v47  ;;  %2540 = vmatprep.mubr.bf16.mxu0 %v3142_v46  ;;  %v3634_v46 = vld [vmem:[%s4321_s17 + $0x220] sm:$0xff]   ;;  %v3675_v39 = vld [vmem:[%s4321_s17 + $0x390] sm:$0xff]  }
  0xea   : > { %2582 = vmatmul.mubr.bf16.vlgmr.msra.gmra.mxu1 %v3127_v43  ;;  %3366 = vmatprep.subr.bf16.mxu0 %v3592_v50  ;;  %v3631_v43 = vld [vmem:[%s4321_s17 + $0x2a8] sm:$0xff]   ;;  %v3635_v47 = vld [vmem:[%s4321_s17 + $0x2a0] sm:$0xff]   ;;  %v3638_v50 = vld [vmem:[%s4321_s17 + $0x218] sm:$0xff]  }
  0xeb   : > { %3393 = vmatpush3.bf16.msra.mxu1 %v3591_v49  ;;  %2589 = vmatprep.mubr.bf16.mxu1 %v3144_v48  ;;  %v3636_v48 = vld [vmem:[%s4321_s17 + $0x258] sm:$0xff]  }
  0xec   : > { %3394 = vmatprep.subr.bf16.mxu1 %v3593_v51  ;;  %v3637_v49 = vld [vmem:[%s4321_s17 + $0x2d8] sm:$0xff]  }
  0xed   : > { %3367 = vmatpush3.bf16.msra.mxu0 %v3594_v52  ;;  %v3639_v51 = vld [vmem:[%s4321_s17 + $0x298] sm:$0xff]   ;;  %v3640_v52 = vld [vmem:[%s4321_s17 + $0x250] sm:$0xff]  }
  0xee   : > { %3368 = vmatprep.subr.bf16.mxu0 %v3596_v55  ;;  %v3643_v55 = vld [vmem:[%s4321_s17 + $0x290] sm:$0xff]  }
  0xef   : > { %3395 = vmatpush3.bf16.msra.mxu1 %v3595_v53  ;;  %v3641_v53 = vld [vmem:[%s4321_s17 + $0x2d0] sm:$0xff]  }
  0xf0   : > { %3396 = vmatprep.subr.bf16.mxu1 %v3597_v57  ;;  %2541 = vmatmul.mubr.bf16.gmra.mxu0 %v3141_v54  ;;  %v3642_v54 = vld [vmem:[%s4321_s17 + $0x210] sm:$0xff]   ;;  %v3645_v57 = vld [vmem:[%s4321_s17 + $0x2c8] sm:$0xff]  }
  0xf1   : > { %3369 = vmatpush3.bf16.msra.mxu0 %v3598_v58  ;;  %2630 = vmatprep.mubr.bf16.mxu0 %v3130_v21  ;;  %v3646_v58 = vld [vmem:[%s4321_s17 + $0x208] sm:$0xff]  }
  0xf2   : > { %2590 = vmatmul.mubr.bf16.gmra.mxu1 %v3143_v56  ;;  %3370 = vmatprep.subr.bf16.mxu0 %v3600_v60  ;;  %v3644_v56 = vld [vmem:[%s4321_s17 + $0x248] sm:$0xff]   ;;  %v3648_v60 = vld [vmem:[%s4321_s17 + $0x240] sm:$0xff]  }
  0xf3   : > { %3397 = vmatpush3.bf16.msra.mxu1 %v3599_v59  ;;  %2679 = vmatprep.mubr.bf16.mxu1 %v3132_v23  ;;  %v3647_v59 = vld [vmem:[%s4321_s17 + $0x288] sm:$0xff]  }
  0xf4   : > { %3398 = vmatprep.subr.bf16.mxu1 %v3601_v61  ;;  %v3649_v61 = vld [vmem:[%s4321_s17 + $0x2c0] sm:$0xff]   ;;  %v3661_v21 = vld [vmem:[%s4321_s17 + $0x3e8] sm:$0xff]  }
  0xf5   : > { %3371 = vmatpush3.bf16.msra.mxu0 %v3602_v62  ;;  %v3650_v62 = vld [vmem:[%s4321_s17 + $0x200] sm:$0xff]   ;;  %v1313_v23 = vld [vmem:[%s4565_s0 + $0xe8] sm:$0xff] }
  0xf6   : > { %3372 = vmatprep.subr.bf16.mxu0 %v3604_v0  ;;  %v1288_v0 = vld [vmem:[%s4565_s0 + $0x20] sm:$0xff] }
  0xf7   : > { %3399 = vmatpush3.bf16.msra.mxu1 %v3603_v63  ;;  %v3651_v63 = vld [vmem:[%s4321_s17 + $0x280] sm:$0xff]  }
  0xf8   : > { %3400 = vmatprep.subr.bf16.mxu1 %v3605_v1  ;;  %v1296_v1 = vld [vmem:[%s4565_s0 + $0x60] sm:$0xff] }
  0xf9   : > { %3373 = vmatpush3.bf16.msra.mxu0 %v3606_v2  ;;  %v3133_v2 = vcombine.low %v1288_v0, %v1296_v1 }
  0xfa   : > { %3374 = vmatprep.subr.bf16.mxu0 %v3608_v4  ;;  %v1289_v4 = vld [vmem:[%s4565_s0 + $0x28] sm:$0xff] }
  0xfb   : > { %3401 = vmatpush3.bf16.msra.mxu1 %v3607_v3  ;;  %v3134_v3 = vcombine.high %v1288_v0, %v1296_v1 }
  0xfc   : > { %3402 = vmatprep.subr.bf16.mxu1 %v3609_v5  ;;  %v1297_v5 = vld [vmem:[%s4565_s0 + $0x68] sm:$0xff] }
  0xfd   : > { %3375 = vmatpush3.bf16.msra.mxu0 %v3610_v6  ;;  %v3135_v6 = vcombine.low %v1289_v4, %v1297_v5 }
  0xfe   : > { %3376 = vmatprep.subr.bf16.mxu0 %v3612_v8  ;;  %v3652_v8 = vld [vmem:[%s4321_s17 + $0x378] sm:$0xff]  }
  0xff   : > { %3403 = vmatpush3.bf16.msra.mxu1 %v3611_v7  ;;  %v3136_v7 = vcombine.high %v1289_v4, %v1297_v5 }
 0x100   : > { %3404 = vmatprep.subr.bf16.mxu1 %v3613_v9  ;;  %v3653_v9 = vld [vmem:[%s4321_s17 + $0x3f8] sm:$0xff]  }
 0x101   : > { %3377 = vmatpush3.bf16.msra.mxu0 %v3614_v10  ;;  %v3654_v10 = vld [vmem:[%s4321_s17 + $0x338] sm:$0xff]  }
 0x102   : > { %3378 = vmatprep.subr.bf16.mxu0 %v3616_v12  ;;  %v3656_v12 = vld [vmem:[%s4321_s17 + $0x370] sm:$0xff]  }
 0x103   : > { %3405 = vmatpush3.bf16.msra.mxu1 %v3615_v11  ;;  %v3655_v11 = vld [vmem:[%s4321_s17 + $0x3b8] sm:$0xff]  }
 0x104   : > { %3406 = vmatprep.subr.bf16.mxu1 %v3617_v14  ;;  %v3658_v14 = vld [vmem:[%s4321_s17 + $0x330] sm:$0xff]  }
 0x105   : > { %3379 = vmatpush3.bf16.msra.mxu0 %v3618_v15  ;;  %v3659_v15 = vld [vmem:[%s4321_s17 + $0x3b0] sm:$0xff]  }
 0x106   : > { %3420 = vmatprep.subr.bf16.mxu0 %v3620_v24 }
 0x107   : > { %3407 = vmatpush3.bf16.msra.mxu1 %v3619_v16  ;;  %v1304_v16 = vld [vmem:[%s4565_s0 + $0xa0] sm:$0xff] }
 0x108   : > { %2631 = vmatmul.mubr.bf16.vlgmr.msra.gmra.mxu0 %v3129_v20  ;;  %3448 = vmatprep.subr.bf16.mxu1 %v3621_v25  ;;  %v3150_v18 = vcombine.high %v1304_v16, %v1312_v17  ;;  %v3149_v19 = vcombine.low %v1304_v16, %v1312_v17  ;;  %v3660_v20 = vld [vmem:[%s4321_s17 + $0x368] sm:$0xff]  }
 0x109   : > { %3421 = vmatpush3.bf16.msra.mxu0 %v3622_v26  ;;  %2638 = vmatprep.mubr.bf16.mxu0 %v3146_v34  ;;  %v3662_v25 = vld [vmem:[%s4321_s17 + $0x328] sm:$0xff]   ;;  %v3670_v34 = vld [vmem:[%s4321_s17 + $0x318] sm:$0xff]  }
 0x10a   : > { %2680 = vmatmul.mubr.bf16.vlgmr.msra.gmra.mxu1 %v3131_v22  ;;  %3422 = vmatprep.subr.bf16.mxu0 %v3624_v28  ;;  %v1305_v22 = vld [vmem:[%s4565_s0 + $0xa8] sm:$0xff]  ;;  %v3664_v28 = vld [vmem:[%s4321_s17 + $0x360] sm:$0xff]  }
 0x10b   : > { %3449 = vmatpush3.bf16.msra.mxu1 %v3623_v27  ;;  %2687 = vmatprep.mubr.bf16.mxu1 %v3148_v40  ;;  %v3152_v24 = vcombine.high %v1305_v22, %v1313_v23  ;;  %v3151_v26 = vcombine.low %v1305_v22, %v1313_v23  ;;  %v3663_v27 = vld [vmem:[%s4321_s17 + $0x3a8] sm:$0xff]  }
 0x10c   : > { %3450 = vmatprep.subr.bf16.mxu1 %v3625_v29  ;;  %v3665_v29 = vld [vmem:[%s4321_s17 + $0x3e0] sm:$0xff]   ;;  %v3676_v40 = vld [vmem:[%s4321_s17 + $0x348] sm:$0xff]  }
 0x10d   : > { %3423 = vmatpush3.bf16.msra.mxu0 %v3626_v30  ;;  %v3666_v30 = vld [vmem:[%s4321_s17 + $0x320] sm:$0xff]  }
 0x10e   : > { %3424 = vmatprep.subr.bf16.mxu0 %v3628_v36  ;;  %v3672_v36 = vld [vmem:[%s4321_s17 + $0x350] sm:$0xff]  }
 0x10f   : > { %3451 = vmatpush3.bf16.msra.mxu1 %v3627_v31  ;;  %v3667_v31 = vld [vmem:[%s4321_s17 + $0x3a0] sm:$0xff]  }
 0x110   : > { %2639 = vmatmul.mubr.bf16.gmra.mxu0 %v3145_v35  ;;  %3452 = vmatprep.subr.bf16.mxu1 %v3629_v37  ;;  %v3671_v35 = vld [vmem:[%s4321_s17 + $0x398] sm:$0xff]   ;;  %v3673_v37 = vld [vmem:[%s4321_s17 + $0x3d0] sm:$0xff]  }
 0x111   : > { %3425 = vmatpush3.bf16.msra.mxu0 %v3630_v41  ;;  %2728 = vmatprep.mubr.bf16.mxu0 %v3134_v3  ;;  %v3677_v41 = vld [vmem:[%s4321_s17 + $0x3c8] sm:$0xff]  }
 0x112   : > { %2688 = vmatmul.mubr.bf16.gmra.mxu1 %v3147_v42  ;;  %3426 = vmatprep.subr.bf16.mxu0 %v3632_v44  ;;  %v3678_v42 = vld [vmem:[%s4321_s17 + $0x308] sm:$0xff]   ;;  %v3680_v44 = vld [vmem:[%s4321_s17 + $0x340] sm:$0xff]  }
 0x113   : > { %3453 = vmatpush3.bf16.msra.mxu1 %v3631_v43  ;;  %2777 = vmatprep.mubr.bf16.mxu1 %v3136_v7  ;;  %v3679_v43 = vld [vmem:[%s4321_s17 + $0x388] sm:$0xff]  }
 0x114   : > { %3454 = vmatprep.subr.bf16.mxu1 %v3633_v45  ;;  %v3681_v45 = vld [vmem:[%s4321_s17 + $0x3c0] sm:$0xff]  }
 0x115   : > { %3427 = vmatpush3.bf16.msra.mxu0 %v3634_v46  ;;  %v3682_v46 = vld [vmem:[%s4321_s17 + $0x300] sm:$0xff]  }
 0x116   : > { %3428 = vmatprep.subr.bf16.mxu0 %v3636_v48  ;;  %v1290_v48 = vld [vmem:[%s4565_s0 + $0x30] sm:$0xff] }
 0x117   : > { %3455 = vmatpush3.bf16.msra.mxu1 %v3635_v47  ;;  %v3683_v47 = vld [vmem:[%s4321_s17 + $0x380] sm:$0xff]  }
 0x118   : > { %3456 = vmatprep.subr.bf16.mxu1 %v3637_v49  ;;  %v1298_v49 = vld [vmem:[%s4565_s0 + $0x70] sm:$0xff] }
 0x119   : > { %3429 = vmatpush3.bf16.msra.mxu0 %v3638_v50  ;;  %v1291_v50 = vld [vmem:[%s4565_s0 + $0x38] sm:$0xff] }
 0x11a   : > { %3430 = vmatprep.subr.bf16.mxu0 %v3640_v52  ;;  %v3138_v52 = vcombine.high %v1290_v48, %v1298_v49 }
 0x11b   : > { %3457 = vmatpush3.bf16.msra.mxu1 %v3639_v51  ;;  %v3137_v51 = vcombine.low %v1290_v48, %v1298_v49 }
 0x11c   : > { %3458 = vmatprep.subr.bf16.mxu1 %v3641_v53  ;;  %v1299_v53 = vld [vmem:[%s4565_s0 + $0x78] sm:$0xff] }
 0x11d   : > { %3431 = vmatpush3.bf16.msra.mxu0 %v3642_v54  ;;  %v1306_v54 = vld [vmem:[%s4565_s0 + $0xb0] sm:$0xff] }
 0x11e   : > { %3432 = vmatprep.subr.bf16.mxu0 %v3644_v56  ;;  %v3139_v56 = vcombine.low %v1291_v50, %v1299_v53 }
 0x11f   : > { %3459 = vmatpush3.bf16.msra.mxu1 %v3643_v55  ;;  %v1314_v55 = vld [vmem:[%s4565_s0 + $0xf0] sm:$0xff] }
 0x120   : > { %3460 = vmatprep.subr.bf16.mxu1 %v3645_v57  ;;  %v3140_v57 = vcombine.high %v1291_v50, %v1299_v53 }
 0x121   : > { %3433 = vmatpush3.bf16.msra.mxu0 %v3646_v58  ;;  %v3154_v58 = vcombine.high %v1306_v54, %v1314_v55 }
 0x122   : > { %3434 = vmatprep.subr.bf16.mxu0 %v3648_v60  ;;  %v1315_v60 = vld [vmem:[%s4565_s0 + $0xf8] sm:$0xff] }
 0x123   : > { %3461 = vmatpush3.bf16.msra.mxu1 %v3647_v59  ;;  %v1307_v59 = vld [vmem:[%s4565_s0 + $0xb8] sm:$0xff] }
 0x124   : > { %3462 = vmatprep.subr.bf16.mxu1 %v3649_v61  ;;  %v3156_v61 = vcombine.high %v1307_v59, %v1315_v60 }
 0x125   : > { %3435 = vmatpush3.bf16.msra.mxu0 %v3650_v62  ;;  %v3153_v62 = vcombine.low %v1306_v54, %v1314_v55 }
 0x126   : > { %3476 = vmatprep.subr.bf16.mxu0 %v3652_v8 }
 0x127   : > { %3463 = vmatpush3.bf16.msra.mxu1 %v3651_v63  ;;  %v3155_v63 = vcombine.low %v1307_v59, %v1315_v60 }
 0x128   : > { %2729 = vmatmul.mubr.bf16.vlgmr.msra.gmra.mxu0 %v3133_v2  ;;  %3504 = vmatprep.subr.bf16.mxu1 %v3653_v9 }
 0x129   : > { %3477 = vmatpush3.bf16.msra.mxu0 %v3654_v10  ;;  %2736 = vmatprep.mubr.bf16.mxu0 %v3150_v18 }
 0x12a   : > { %2778 = vmatmul.mubr.bf16.vlgmr.msra.gmra.mxu1 %v3135_v6  ;;  %3478 = vmatprep.subr.bf16.mxu0 %v3656_v12 }
 0x12b   : > { %3505 = vmatpush3.bf16.msra.mxu1 %v3655_v11  ;;  %2785 = vmatprep.mubr.bf16.mxu1 %v3152_v24 }
 0x12c   : > { %3506 = vmatprep.subr.bf16.mxu1 %v3657_v13 }
 0x12d   : > { %3479 = vmatpush3.bf16.msra.mxu0 %v3658_v14 }
 0x12e   : > { %3480 = vmatprep.subr.bf16.mxu0 %v3660_v20 }
 0x12f   : > { %3507 = vmatpush3.bf16.msra.mxu1 %v3659_v15 }
 0x130   : > { %2737 = vmatmul.mubr.bf16.gmra.mxu0 %v3149_v19  ;;  %3508 = vmatprep.subr.bf16.mxu1 %v3661_v21 }
 0x131   : > { %3481 = vmatpush3.bf16.msra.mxu0 %v3662_v25  ;;  %2826 = vmatprep.mubr.bf16.mxu0 %v3138_v52 }
 0x132   : > { %2786 = vmatmul.mubr.bf16.gmra.mxu1 %v3151_v26  ;;  %3482 = vmatprep.subr.bf16.mxu0 %v3664_v28 }
 0x133   : > { %3509 = vmatpush3.bf16.msra.mxu1 %v3663_v27  ;;  %2875 = vmatprep.mubr.bf16.mxu1 %v3140_v57 }
 0x134   : > { %3510 = vmatprep.subr.bf16.mxu1 %v3665_v29 }
 0x135   : > { %3483 = vmatpush3.bf16.msra.mxu0 %v3666_v30 }
 0x136   : > { %3484 = vmatprep.subr.bf16.mxu0 %v3668_v32 }
 0x137   : > { %3511 = vmatpush3.bf16.msra.mxu1 %v3667_v31 }
 0x138   : > { %3512 = vmatprep.subr.bf16.mxu1 %v3669_v33 }
 0x139   : > { %3485 = vmatpush3.bf16.msra.mxu0 %v3670_v34 }
 0x13a   : > { %3486 = vmatprep.subr.bf16.mxu0 %v3672_v36 }
 0x13b   : > { %3513 = vmatpush3.bf16.msra.mxu1 %v3671_v35 }
 0x13c   : > { %3514 = vmatprep.subr.bf16.mxu1 %v3673_v37 }
 0x13d   : > { %3487 = vmatpush3.bf16.msra.mxu0 %v3674_v38 }
 0x13e   : > { %3488 = vmatprep.subr.bf16.mxu0 %v3676_v40 }
 0x13f   : > { %3515 = vmatpush3.bf16.msra.mxu1 %v3675_v39 }
 0x140   : > { %3516 = vmatprep.subr.bf16.mxu1 %v3677_v41 }
 0x141   : > { %3489 = vmatpush3.bf16.msra.mxu0 %v3678_v42 }
 0x142   : > { %3490 = vmatprep.subr.bf16.mxu0 %v3680_v44 }
 0x143   : > { %3517 = vmatpush3.bf16.msra.mxu1 %v3679_v43 }
 0x144   : > { %3518 = vmatprep.subr.bf16.mxu1 %v3681_v45 }
 0x145   : > { %3491 = vmatpush3.bf16.msra.mxu0 %v3682_v46 }
 0x147   : > { %3519 = vmatpush3.bf16.msra.mxu1 %v3683_v47 }
 0x148   : > { %2827 = vmatmul.mubr.bf16.vlgmr.msra.gmra.mxu0 %v3137_v51 }
 0x149   : > { %2834 = vmatprep.mubr.bf16.mxu0 %v3154_v58 }
 0x14a   : > { %2876 = vmatmul.mubr.bf16.vlgmr.msra.gmra.mxu1 %v3139_v56 }
 0x14b   : > { %2883 = vmatprep.mubr.bf16.mxu1 %v3156_v61 }
 0x150   : > { %2835 = vmatmul.mubr.bf16.gmra.mxu0 %v3153_v62 }
 0x152   : > { %2884 = vmatmul.mubr.bf16.gmra.mxu1 %v3155_v63 }
 0x1a8   : > { %v3324_v0 = vpop.f32.mrf.mxu0 }
 0x1aa   : > { %v3325_v1 = vpop.f32.mrf.mxu0  ;;  %v3352_v2 = vpop.f32.mrf.mxu1 }
 0x1ab   : > { %v3326_v46 = vadd.f32 %v3325_v1, %v3324_v0 }
 0x1ac   : > { %v3327_v3 = vpop.f32.mrf.mxu0  ;;  %v3353_v4 = vpop.f32.mrf.mxu1 }
 0x1ad   : > { %v3354_v47 = vadd.f32 %v3353_v4, %v3352_v2 }
 0x1ae   : > { %v3328_v5 = vpop.f32.mrf.mxu0  ;;  %v3355_v6 = vpop.f32.mrf.mxu1 }
 0x1af   : > { %v3329_v43 = vadd.f32 %v3328_v5, %v3327_v3  ;;  %v2584_v56 = vadd.f32 %v3354_v47, %v3326_v46 }
 0x1b0   : > { %v3330_v7 = vpop.f32.mrf.mxu0  ;;  %v3356_v8 = vpop.f32.mrf.mxu1 }
 0x1b1   : > { %v3357_v44 = vadd.f32 %v3356_v8, %v3355_v6 }
 0x1b2   : > { %v3331_v9 = vpop.f32.mrf.mxu0  ;;  %v3358_v10 = vpop.f32.mrf.mxu1 }
 0x1b3   : > { %v3332_v49 = vadd.f32 %v3331_v9, %v3330_v7  ;;  %v2587_v52 = vadd.f32 %v3357_v44, %v3329_v43 }
 0x1b4   : > { %v3333_v11 = vpop.f32.mrf.mxu0  ;;  %v3359_v12 = vpop.f32.mrf.mxu1 }
 0x1b5   : > { %v3360_v50 = vadd.f32 %v3359_v12, %v3358_v10 }
 0x1b6   : > { %v3334_v13 = vpop.f32.mrf.mxu0  ;;  %v3361_v14 = vpop.f32.mrf.mxu1 }
 0x1b7   : > { %v2592_v58 = vadd.f32 %v3360_v50, %v3332_v49  ;;  %v3335_v59 = vadd.f32 %v3334_v13, %v3333_v11 }
 0x1b8   : > { %v3362_v16 = vpop.f32.mrf.mxu1 }
 0x1b9   : > { %v3363_v60 = vadd.f32 %v3362_v16, %v3361_v14 }
 0x1bb   : > { %v2595_v10 = vadd.f32 %v3363_v60, %v3335_v59 }
 0x1c8   : > { %v3380_v15 = vpop.f32.mrf.mxu0 }
 0x1ca   : > { %v3381_v17 = vpop.f32.mrf.mxu0  ;;  %v3408_v18 = vpop.f32.mrf.mxu1 }
 0x1cb   : > { %v3382_v53 = vadd.f32 %v3381_v17, %v3380_v15 }
 0x1cc   : > { %v3383_v19 = vpop.f32.mrf.mxu0  ;;  %v3409_v20 = vpop.f32.mrf.mxu1 }
 0x1cd   : > { %v2633_v62 = vadd.f32 %v3382_v53, %v2584_v56  ;;  %v3410_v63 = vadd.f32 %v3409_v20, %v3408_v18 }
 0x1ce   : > { %v3384_v21 = vpop.f32.mrf.mxu0  ;;  %v3411_v22 = vpop.f32.mrf.mxu1 }
 0x1cf   : > { %v3385_v48 = vadd.f32 %v3384_v21, %v3383_v19  ;;  %v2682_v17 = vadd.f32 %v3410_v63, %v2633_v62 }
 0x1d0   : > { %v3386_v23 = vpop.f32.mrf.mxu0  ;;  %v3412_v24 = vpop.f32.mrf.mxu1 }
 0x1d1   : > { %v2636_v57 = vadd.f32 %v3385_v48, %v2587_v52  ;;  %v3413_v3 = vadd.f32 %v3412_v24, %v3411_v22 }
 0x1d2   : > { %v3414_v25 = vpop.f32.mrf.mxu1  ;;  %v3387_v26 = vpop.f32.mrf.mxu0 }
 0x1d3   : > { %v3388_v55 = vadd.f32 %v3387_v26, %v3386_v23  ;;  %v2685_v7 = vadd.f32 %v3413_v3, %v2636_v57 }
 0x1d4   : > { %v3415_v27 = vpop.f32.mrf.mxu1  ;;  %v3389_v28 = vpop.f32.mrf.mxu0 }
 0x1d5   : > { %v2641_v1 = vadd.f32 %v3388_v55, %v2592_v58  ;;  %v3416_v2 = vadd.f32 %v3415_v27, %v3414_v25 }
 0x1d6   : > { %v3417_v29 = vpop.f32.mrf.mxu1  ;;  %v3390_v30 = vpop.f32.mrf.mxu0 }
 0x1d7   : > { %v3391_v4 = vadd.f32 %v3390_v30, %v3389_v28  ;;  %v2690_v13 = vadd.f32 %v3416_v2, %v2641_v1 }
 0x1d8   : > { %v3418_v32 = vpop.f32.mrf.mxu1 }
 0x1d9   : > { %v2644_v14 = vadd.f32 %v3391_v4, %v2595_v10  ;;  %v3419_v16 = vadd.f32 %v3418_v32, %v3417_v29 }
 0x1e8   : > { %v3436_v31 = vpop.f32.mrf.mxu0 }
 0x1ea   : > { %v3464_v33 = vpop.f32.mrf.mxu1  ;;  %v3437_v34 = vpop.f32.mrf.mxu0 }
 0x1eb   : > { %v3438_v8 = vadd.f32 %v3437_v34, %v3436_v31 }
 0x1ec   : > { %v3465_v35 = vpop.f32.mrf.mxu1  ;;  %v3439_v36 = vpop.f32.mrf.mxu0 }
 0x1ed   : > { %v2731_v20 = vadd.f32 %v3438_v8, %v2682_v17  ;;  %v3466_v21 = vadd.f32 %v3465_v35, %v3464_v33 }
 0x1ee   : > { %v3467_v37 = vpop.f32.mrf.mxu1  ;;  %v3440_v38 = vpop.f32.mrf.mxu0 }
 0x1ef   : > { %v3441_v5 = vadd.f32 %v3440_v38, %v3439_v36  ;;  %v2693_v36 = vadd.f32 %v3419_v16, %v2644_v14 }
 0x1f0   : > { %v3468_v39 = vpop.f32.mrf.mxu1  ;;  %v3442_v40 = vpop.f32.mrf.mxu0 }
 0x1f1   : > { %v2734_v19 = vadd.f32 %v3441_v5, %v2685_v7  ;;  %v3469_v22 = vadd.f32 %v3468_v39, %v3467_v37 }
 0x1f2   : > { %v3470_v41 = vpop.f32.mrf.mxu1  ;;  %v3443_v42 = vpop.f32.mrf.mxu0 }
 0x1f3   : > { %v3444_v12 = vadd.f32 %v3443_v42, %v3442_v40  ;;  %v2783_v28 = vadd.f32 %v3469_v22, %v2734_v19  ;;  %v2780_v40 = vadd.f32 %v3466_v21, %v2731_v20 }
 0x1f4   : > { %v3471_v45 = vpop.f32.mrf.mxu1  ;;  %v3445_v51 = vpop.f32.mrf.mxu0 }
 0x1f5   : > { %v2739_v24 = vadd.f32 %v3444_v12, %v2690_v13  ;;  %v3472_v25 = vadd.f32 %v3471_v45, %v3470_v41 }
 0x1f6   : > { %v3473_v54 = vpop.f32.mrf.mxu1  ;;  %v3446_v61 = vpop.f32.mrf.mxu0 }
 0x1f7   : > { %v3447_v26 = vadd.f32 %v3446_v61, %v3445_v51  ;;  %v2788_v44 = vadd.f32 %v3472_v25, %v2739_v24  ;;  %v2929_v25 = vlaneseq }
 0x1f8   : > { %v3474_v0 = vpop.f32.mrf.mxu1 }
 0x1f9   : > { %v2742_v29 = vadd.f32 %v3447_v26, %v2693_v36  ;;  %v3475_v46 = vadd.f32 %v3474_v0, %v3473_v54  ;;  %v2930_v26 = vshrl.u32 %v2929_v25, 7 }
 0x1fb   : > { %v2791_v52 = vadd.f32 %v3475_v46, %v2742_v29 }
 0x208   : > { %v3492_v6 = vpop.f32.mrf.mxu0 }
 0x20a   : > { %v3520_v9 = vpop.f32.mrf.mxu1  ;;  %v3493_v15 = vpop.f32.mrf.mxu0 }
 0x20b   : > { %v3494_v30 = vadd.f32 %v3493_v15, %v3492_v6 }
 0x20c   : > { %v3521_v11 = vpop.f32.mrf.mxu1  ;;  %v3495_v18 = vpop.f32.mrf.mxu0 }
 0x20d   : > { %v2829_v33 = vadd.f32 %v3494_v30, %v2780_v40  ;;  %v3522_v45 = vadd.f32 %v3521_v11, %v3520_v9 }
 0x20e   : > { %v3523_v23 = vpop.f32.mrf.mxu1  ;;  %v3496_v27 = vpop.f32.mrf.mxu0 }
 0x20f   : > { %v3497_v31 = vadd.f32 %v3496_v27, %v3495_v18  ;;  %v2878_v53 = vadd.f32 %v3522_v45, %v2829_v33  ;;  %v2921_v27 = vld [vmem:[%s1279_s26] sm:$0x1] }
 0x210   : > { %v3524_v34 = vpop.f32.mrf.mxu1  ;;  %v3498_v38 = vpop.f32.mrf.mxu0 }
 0x211   : > { %v2832_v42 = vadd.f32 %v3497_v31, %v2783_v28  ;;  %v3525_v35 = vadd.f32 %v3524_v34, %v3523_v23  ;;  %v2931_v28 = vsub.s32 0, %v2930_v26  ;;  %v2925_v34 = vld [vmem:[%s1282_s29] sm:$0x1] }
 0x212   : > { %v3526_v43 = vpop.f32.mrf.mxu1  ;;  %v3499_v32 = vpop.f32.mrf.mxu0 }
 0x213   : > { %v3500_v37 = vadd.f32 %v3499_v32, %v3498_v38  ;;  %v2881_v47 = vadd.f32 %v3525_v35, %v2832_v42 }
 0x214   : > { %v3527_v39 = vpop.f32.mrf.mxu1  ;;  %v3501_v41 = vpop.f32.mrf.mxu0 }
 0x215   : > { %v2837_v48 = vadd.f32 %v3500_v37, %v2788_v44  ;;  %v3528_v49 = vadd.f32 %v3527_v39, %v3526_v43  ;;  %v2892_v58 = vadd.f32 %v2881_v47, %v2878_v53 }
 0x216   : > { %v3529_v50 = vpop.f32.mrf.mxu1  ;;  %v3502_v51 = vpop.f32.mrf.mxu0 }
 0x217   : > { %v2886_v55 = vadd.f32 %v3528_v49, %v2837_v48  ;;  %v3503_v56 = vadd.f32 %v3502_v51, %v3501_v41 }
 0x218   : > { %v3530_v57 = vpop.f32.mrf.mxu1 }
 0x219   : > { %v2840_v59 = vadd.f32 %v3503_v56, %v2791_v52  ;;  %v3531_v60 = vadd.f32 %v3530_v57, %v3529_v50  ;;  %v2893_v54 = vadd.f32 %v2892_v58, %v2886_v55 }
 0x21b   : > { %v2889_v61 = vadd.f32 %v3531_v60, %v2840_v59 }
 0x21d   : > { %v2894_v62 = vadd.f32 %v2893_v54, %v2889_v61 }
 0x21f   : > { %v2895_v63 = vrot.slane %v2894_v62, 4 }
 0x221   : > { %v2896_v3 = vadd.f32 %v2895_v63, %v2894_v62 }
 0x223   : > { %v2897_v5 = vrot.slane %v2896_v3, 2 }
 0x225   : > { %v2898_v0 = vadd.f32 %v2897_v5, %v2896_v3 }
 0x227   : > { %v2899_v1 = vrot.slane %v2898_v0, 1 }
 0x229   : > { %v2900_v2 = vadd.f32 %v2899_v1, %v2898_v0 }
 0x22b   : > { %v2902_v4 = vmul.f32 0.03125, %v2900_v2 }
 0x22d   : > { %v2903_v6 = vsub.f32 %v2878_v53, %v2902_v4  ;;  %v2904_v7 = vsub.f32 %v2881_v47, %v2902_v4  ;;  %v2905_v8 = vsub.f32 %v2886_v55, %v2902_v4  ;;  %v2906_v9 = vsub.f32 %v2889_v61, %v2902_v4 }
 0x22f   : > { %v2907_v10 = vmul.f32 %v2903_v6, %v2903_v6  ;;  %v2908_v12 = vmul.f32 %v2904_v7, %v2904_v7  ;;  %v2909_v15 = vmul.f32 %v2905_v8, %v2905_v8  ;;  %v2910_v19 = vmul.f32 %v2906_v9, %v2906_v9 }
 0x231   : > { %v2911_v17 = vadd.f32 %v2908_v12, %v2907_v10 }
 0x233   : > { %v2912_v11 = vadd.f32 %v2911_v17, %v2909_v15 }
 0x235   : > { %v2913_v13 = vadd.f32 %v2912_v11, %v2910_v19 }
 0x237   : > { %v2914_v14 = vrot.slane %v2913_v13, 4 }
 0x239   : > { %v2915_v16 = vadd.f32 %v2914_v14, %v2913_v13 }
 0x23b   : > { %v2916_v18 = vrot.slane %v2915_v16, 2 }
 0x23d   : > { %v2917_v20 = vadd.f32 %v2916_v18, %v2915_v16 }
 0x23f   : > { %v2918_v21 = vrot.slane %v2917_v20, 1 }
 0x241   : > { %v2919_v22 = vadd.f32 %v2918_v21, %v2917_v20 }
 0x243   : > { %v2920_v23 = vmul.f32 0.03125, %v2919_v22 }
 0x245   : > { %v2922_v24 = vadd.f32 1e-05, %v2920_v23 }
 0x247   : > { %3684 = vrsqrt.f32 %v2922_v24 }
 0x254   : > { %v3685_v30 = vpop.eup %3684 }
 0x255   : > { %v2924_v31 = vmul.f32 %v3685_v30, %v2921_v27 }
 0x257   : > { %v2926_v36 = vmul.f32 %v2924_v31, %v2902_v4  ;;  %v2932_v38 = vrot.slane %v2924_v31, %v2931_v28 }
 0x259   : > { %v2927_v40 = vsub.f32 %v2925_v34, %v2926_v36  ;;  %v2934_v42 = vmul.f32 %v2932_v38, %v2878_v53  ;;  %v2935_v43 = vmul.f32 %v2932_v38, %v2881_v47  ;;  %v2936_v44 = vmul.f32 %v2932_v38, %v2886_v55 }
 0x25a   : > { %v2937_v29 = vmul.f32 %v2932_v38, %v2889_v61 }
 0x25b   : > { %v2942_v32 = vrot.slane %v2927_v40, %v2931_v28 }
 0x25d   : > { %v2944_v46 = vadd.f32 %v2942_v32, %v2934_v42  ;;  %v2945_v33 = vadd.f32 %v2942_v32, %v2935_v43  ;;  %v2946_v35 = vadd.f32 %v2942_v32, %v2936_v44  ;;  %v2947_v37 = vadd.f32 %v2942_v32, %v2937_v29 }
 0x25f   : > { %vm2948_vm0 = vcmp.gt.f32.partialorder %v2944_v46, 0.0  ;;  %vm2949_vm1 = vcmp.gt.f32.partialorder %v2945_v33, 0.0  ;;  %vm2950_vm2 = vcmp.gt.f32.partialorder %v2946_v35, 0.0  ;;  %vm2951_vm3 = vcmp.gt.f32.partialorder %v2947_v37, 0.0 }
 0x260   : > { %v2952_v39 = vmul.f32 0.2, %v2944_v46  ;;  %v2953_v41 = vmul.f32 0.2, %v2945_v33  ;;  %v2954_v45 = vmul.f32 0.2, %v2946_v35 }
 0x261   : > { %v2955_v48 = vmul.f32 0.2, %v2947_v37 }
 0x262   : > { %v2956_v49 = vsel %vm2948_vm0, %v2944_v46, %v2952_v39  ;;  %v2957_v50 = vsel %vm2949_vm1, %v2945_v33, %v2953_v41  ;;  %v2958_v47 = vsel %vm2950_vm2, %v2946_v35, %v2954_v45  ;;  %2986 = sbr.rel (!%p3766_p5) target bundleno = 624 (0x270), region = 81 }
 0x263   : > { %v2959_v51 = vsel %vm2951_vm3, %v2947_v37, %v2955_v48  ;;  %v3300_v52 = vpack.c.bf16 %v2957_v50, %v2956_v49 }
 0x264   : > { %v3305_v53 = vpack.c.bf16 %v2959_v51, %v2958_v47 }
 0x265   : > { %3301 = vst [vmem:[%s1276_s6] sm:$0xff] %v3300_v52  }
 0x266   : > { %3307 = vst [vmem:[%s1276_s6 + $0x8] sm:$0xff] %v3305_v53  }
 0x26c   : > { %v3005_v55 = vld [vmem:[%s1276_s6] sm:$0xf]  ;;  %v3007_v56 = vld [vmem:[%s1276_s6 + $0x4] sm:$0xf] }
 0x26d   : > { %v3009_v57 = vld [vmem:[%s1276_s6 + $0x8] sm:$0xf]  ;;  %v3011_v58 = vld [vmem:[%s1276_s6 + $0xc] sm:$0xf]  ;;  %3006 = vst [vmem:[%s2988_s8] sm:$0xf] %v3005_v55 }
 0x26e   : > { %3008 = vst [vmem:[%s2988_s8 + $0x8] sm:$0xf] %v3007_v56  ;;  %3010 = vst [vmem:[%s2988_s8 + $0x10] sm:$0xf] %v3009_v57 }
 0x26f   : > { %3012 = vst [vmem:[%s2988_s8 + $0x18] sm:$0xf] %v3011_v58 }
 0x270 PF: > { %p11_p11 = scmp.ge.s32.totalorder %s3754_s19, 4   ;;  %s4571_s15 = smov %s3704_s16 }
 0x271   : > { %s4572_s16 = smov %s3764_s22  ;;  %s4573_s17 = smov %s3754_s19 }
 0x272   :  { %13 = sbr.rel (!%p11_p11) target bundleno = 2 (0x2), region = 159 }

</bundles_post_ra>
